<compile_context>
chip_gen: v5e
topology: v5e:2x2
jax: 0.10.0
libtpu: 0.0.40
codegen_flags: <defaults>
</compile_context>

<pallas_src>
import math
from functools import partial

import numpy as np
import jax
import jax.numpy as jnp
from jax.experimental import pallas as pl
from jax.experimental.pallas import tpu as pltpu


# ----------------------------- parameter glue ------------------------------

def _normalize_weight(weight, eps=1e-4):
    """l2norm(weight, dim=-1, eps) / sqrt(fan_in) — the module's forward path.

    F.normalize semantics: v / max(||v||_2, eps), norm over the LAST kernel
    axis (per (o, i, kh) row).  fan_in = dim_in * kernel_size**2.
    """
    _, i, kh, kw = weight.shape
    fan_in = i * kh * kw
    norm = jnp.sqrt(jnp.sum(weight * weight, axis=-1, keepdims=True))
    wn = weight / jnp.maximum(norm, eps)
    return wn / math.sqrt(fan_in)


def _banded_width_weight(wn, width, pad):
    """Block-Toeplitz (banded) weight over the width axis: (k, W*Ci, W*Co).

    band[dy, w_in*Ci+ci, w_out*Co+co] = wn[co, ci, dy, dx] with
    w_in = w_out + dx - pad (only in-range w_in kept), so the width taps and
    the width 'same' zero border are both encoded as matmul structure.
    """
    co, ci, k, _ = wn.shape
    wt = jnp.transpose(wn, (2, 3, 1, 0))                     # (k_dy, k_dx, Ci, Co)
    w_in_idx = jnp.arange(width)
    w_out_idx = jnp.arange(width)
    dx_idx = jnp.arange(k)
    # sel[dx, w_in, w_out] = 1  iff  w_in == w_out + dx - pad
    sel = (w_in_idx[None, :, None]
           == (w_out_idx[None, None, :] + dx_idx[:, None, None] - pad)
           ).astype(wt.dtype)                                # (k, W, W)
    band = jnp.einsum('ydco,dpq->ypcqo', wt, sel)            # (k, W, Ci, W, Co)
    return band.reshape(k, width * ci, width * co)


# ------------------------------ Pallas kernel ------------------------------

def _mp_conv2d_kernel(w_ref, x_ref, o_ref, acc_ref, *, k, pad):
    """One batch tile: (nb, H, W*Ci) @ (k, W*Ci, W*Co) -> (nb, H, W*Co).

    k lane-dense matmuls; each dy tap is accumulated into a row-shifted
    window of the halo'd f32 accumulator (height 'same' border = halo rows
    that are simply dropped at the end).
    """
    nb, h, wci = x_ref.shape
    wco = o_ref.shape[2]

    acc_ref[...] = jnp.zeros_like(acc_ref)
    x2 = x_ref[...].reshape(nb * h, wci)                     # layout-preserving (h % 8 == 0)

    for dy in range(k):                                      # statically unrolled, k small
        contrib = jnp.dot(x2, w_ref[dy],
                          preferred_element_type=jnp.float32)
        contrib = contrib.reshape(nb, h, wco)
        off = 2 * pad - dy                                   # static row offset into halo acc
        acc_ref[:, off:off + h, :] += contrib

    o_ref[...] = acc_ref[:, pad:pad + h, :].astype(o_ref.dtype)


# ------------------------------ tiling chooser ------------------------------

def _vmem_capacity_bytes():
    try:
        return int(pltpu.get_tpu_info().vmem_capacity_bytes)
    except Exception:
        return 64 * 1024 * 1024          # conservative: v7x per-TensorCore VMEM


def _choose_tiling(b, h, wci, wco, pad, weight_bytes, in_elem_bytes):
    """Per-step batch tile nb + vmem limit, with explicit footprint accounting."""
    vmem_cap = _vmem_capacity_bytes()
    per_img = (2 * in_elem_bytes * h * wci      # input block, double-buffered
               + 2 * 4 * h * wco                # output block, double-buffered
               + 4 * (h + 2 * pad) * wco        # f32 halo accumulator (scratch)
               + 4 * h * wco)                   # live matmul result
    budget = int(0.60 * vmem_cap) - 2 * weight_bytes
    nb = max(1, min(b, budget // per_img if per_img > 0 else b))
    # keep >=4 grid steps when batch allows (2 TCs on v7x x double buffering),
    # else >=2 steps for prefetch/compute overlap.
    if b >= 4:
        nb = min(nb, b // 4)
    elif b >= 2:
        nb = min(nb, b // 2)
    nb = max(1, nb)
    while b % nb:
        nb -= 1
    footprint = 2 * weight_bytes + nb * per_img + (4 << 20)   # + compiler scratch slack
    vmem_limit = min(int(0.85 * vmem_cap), max(32 << 20, 2 * footprint))
    vmem_limit = max(vmem_limit, footprint)
    vmem_limit = min(vmem_limit, vmem_cap)
    return nb, int(vmem_limit)


# --------------------------------- wrapper ----------------------------------

def mp_conv2d(x, weight, *, eps=1e-4, use_bf16_matmul=False):
    """x: (b, Ci, H, W) f32; weight: (Co, Ci, k, k). Returns (b, Co, H, W)."""
    b, ci, h, w = x.shape
    co, ci_w, kh, kw = weight.shape
    assert ci == ci_w and kh == kw
    # TODO(synk): PyTorch 'same' padding is asymmetric for even kernels; only odd handled.
    assert kh % 2 == 1, "only odd kernel sizes supported"
    k = kh
    pad = k // 2

    # channel-last, lane-merged activation (b, H, W*Ci): one relayout pass;
    # no spatial zero-padding is materialized in HBM.
    x_cl = jnp.transpose(x, (0, 2, 3, 1)).reshape(b, h, w * ci)

    wn = _normalize_weight(weight.astype(jnp.float32), eps)
    band = _banded_width_weight(wn, w, pad)                  # (k, W*Ci, W*Co)

    if use_bf16_matmul:
        # v6e/v7x MXUs are bf16-native; accumulation stays f32.  Off by default
        # to preserve the module's f32 forward numerics.
        x_cl = x_cl.astype(jnp.bfloat16)
        band = band.astype(jnp.bfloat16)

    weight_bytes = int(band.size) * band.dtype.itemsize
    nb, vmem_limit = _choose_tiling(b, h, w * ci, w * co, pad, weight_bytes,
                                    x_cl.dtype.itemsize)
    grid = (b // nb,)
    # TODO(synk): for small batches (<4 tiles) a second 'parallel' grid axis over
    # output-row blocks (with halo rows) would restore pipelining on v7x's 2 TCs.
    # TODO(synk): the banded weight scales as (W*Ci)x(W*Co); for large W*C switch
    # to width-tiled banding so the weight stays VMEM-resident.

    out_cl = pl.pallas_call(
        partial(_mp_conv2d_kernel, k=k, pad=pad),
        out_shape=jax.ShapeDtypeStruct((b, h, w * co), x.dtype),
        grid_spec=pltpu.PrefetchScalarGridSpec(
            num_scalar_prefetch=0,
            grid=grid,
            in_specs=[
                # banded weight: constant block index -> DMA'd once, resident
                pl.BlockSpec((k, w * ci, w * co), lambda n: (0, 0, 0)),
                # lane-dense input tile
                pl.BlockSpec((nb, h, w * ci), lambda n: (n, 0, 0)),
            ],
            # lane-dense output tile (W*Co on the 128-lane axis -> unmasked stores)
            out_specs=pl.BlockSpec((nb, h, w * co), lambda n: (n, 0, 0)),
            scratch_shapes=[pltpu.VMEM((nb, h + 2 * pad, w * co), jnp.float32)],
        ),
        compiler_params=pltpu.CompilerParams(
            dimension_semantics=("parallel",),
            vmem_limit_bytes=vmem_limit),
    )(band, x_cl)

    return jnp.transpose(out_cl.reshape(b, h, w, co), (0, 3, 1, 2))


# ------------------------------ pure-JAX reference ------------------------------

def reference(x, weight, eps=1e-4):
    wn = _normalize_weight(weight.astype(jnp.float32), eps)
    p = weight.shape[-1] // 2
    return jax.lax.conv_general_dilated(
        x, wn, window_strides=(1, 1),
        padding=((p, p), (p, p)),
        dimension_numbers=('NCHW', 'OIHW', 'NCHW'),
        precision=jax.lax.Precision.HIGHEST)


# ------------------------------------ main ------------------------------------

if __name__ == "__main__":
    key = jax.random.PRNGKey(0)
    key_x, key_w = jax.random.split(key)

    b, c_in, c_out, h, w, k = 2, 32, 32, 16, 16, 3
    x = jax.random.normal(key_x, (b, c_in, h, w), dtype=jnp.float32)
    weight = jax.random.normal(key_w, (c_out, c_in, k, k), dtype=jnp.float32)

    out = jax.block_until_ready(mp_conv2d(x, weight))
    assert out.shape == (b, c_out, h, w)

    ref = jax.block_until_ready(reference(x, weight))
    np.testing.assert_allclose(np.asarray(out), np.asarray(ref), rtol=1e-4, atol=1e-4)

    print("KERNEL_OK")
</pallas_src>

<mosaic_0001>
module attributes {stable_mosaic.version = 11 : i64} {
  func.func @_mp_conv2d_kernel(%arg0: i32, %arg1: memref<3x512x512xf32, #tpu.memory_space<vmem>>, %arg2: memref<1x16x512xf32, #tpu.memory_space<vmem>>, %arg3: memref<1x16x512xf32, #tpu.memory_space<vmem>>, %arg4: memref<1x18x512xf32, #tpu.memory_space<vmem>>) attributes {dimension_semantics = [#tpu.dimension_semantics<parallel>], iteration_bounds = array<i64: 2>, scalar_prefetch = 0 : i64, scratch_operands = 1 : i64, tpu.core_type = #tpu.core_type<tc>, window_params = [{pipeline_mode = #tpu.pipeline_mode<synchronous>, transform_indices = @transform_0, window_bounds = array<i64: 3, 512, 512>}, {transform_indices = @transform_1, window_bounds = array<i64: 1, 16, 512>}, {transform_indices = @transform_2, window_bounds = array<i64: 1, 16, 512>}]} {
    %cst = arith.constant 0.000000e+00 : f32
    %0 = vector.broadcast %cst : f32 to vector<1x18x512xf32>
    %c0 = arith.constant 0 : index
    %c0_0 = arith.constant 0 : index
    %c0_1 = arith.constant 0 : index
    %1 = vector.load %arg4[%c0, %c0_0, %c0_1] : memref<1x18x512xf32, #tpu.memory_space<vmem>>, vector<1x18x512xf32>
    tpu.vector_store %arg4[%c0, %c0_0, %c0_1], %0 {strides = array<i32>} : memref<1x18x512xf32, #tpu.memory_space<vmem>>, vector<1x18x512xf32>,
    %c0_2 = arith.constant 0 : index
    %c0_3 = arith.constant 0 : index
    %c0_4 = arith.constant 0 : index
    %2 = vector.load %arg2[%c0_2, %c0_3, %c0_4] : memref<1x16x512xf32, #tpu.memory_space<vmem>>, vector<1x16x512xf32>
    %3 = vector.shape_cast %2 : vector<1x16x512xf32> to vector<16x512xf32>
    %c0_5 = arith.constant 0 : index
    %c0_6 = arith.constant 0 : index
    %c0_7 = arith.constant 0 : index
    %4 = vector.load %arg1[%c0_5, %c0_6, %c0_7] : memref<3x512x512xf32, #tpu.memory_space<vmem>>, vector<1x512x512xf32>
    %5 = vector.shape_cast %4 : vector<1x512x512xf32> to vector<512x512xf32>
    %cst_8 = arith.constant dense<0.000000e+00> : vector<16x512xf32>
    %6 = tpu.matmul %3, %5, %cst_8 {dimension_numbers = #tpu.dot_dimension_numbers<[1], [0], [0], [1], [0, 0, 1, 1], [], []>} : vector<16x512xf32>, vector<512x512xf32>, vector<16x512xf32> -> vector<16x512xf32>
    %7 = vector.shape_cast %6 : vector<16x512xf32> to vector<1x16x512xf32>
    %c0_9 = arith.constant 0 : index
    %c2 = arith.constant 2 : index
    %c0_10 = arith.constant 0 : index
    %8 = vector.load %arg4[%c0_9, %c2, %c0_10] : memref<1x18x512xf32, #tpu.memory_space<vmem>>, vector<1x16x512xf32>
    %9 = arith.addf %8, %7 : vector<1x16x512xf32>
    %c0_11 = arith.constant 0 : index
    %c2_12 = arith.constant 2 : index
    %c0_13 = arith.constant 0 : index
    %10 = vector.load %arg4[%c0_11, %c2_12, %c0_13] : memref<1x18x512xf32, #tpu.memory_space<vmem>>, vector<1x16x512xf32>
    tpu.vector_store %arg4[%c0_11, %c2_12, %c0_13], %9 {strides = array<i32>} : memref<1x18x512xf32, #tpu.memory_space<vmem>>, vector<1x16x512xf32>,
    %c1 = arith.constant 1 : index
    %c0_14 = arith.constant 0 : index
    %c0_15 = arith.constant 0 : index
    %11 = vector.load %arg1[%c1, %c0_14, %c0_15] : memref<3x512x512xf32, #tpu.memory_space<vmem>>, vector<1x512x512xf32>
    %12 = vector.shape_cast %11 : vector<1x512x512xf32> to vector<512x512xf32>
    %cst_16 = arith.constant dense<0.000000e+00> : vector<16x512xf32>
    %13 = tpu.matmul %3, %12, %cst_16 {dimension_numbers = #tpu.dot_dimension_numbers<[1], [0], [0], [1], [0, 0, 1, 1], [], []>} : vector<16x512xf32>, vector<512x512xf32>, vector<16x512xf32> -> vector<16x512xf32>
    %14 = vector.shape_cast %13 : vector<16x512xf32> to vector<1x16x512xf32>
    %c0_17 = arith.constant 0 : index
    %c1_18 = arith.constant 1 : index
    %c0_19 = arith.constant 0 : index
    %15 = vector.load %arg4[%c0_17, %c1_18, %c0_19] : memref<1x18x512xf32, #tpu.memory_space<vmem>>, vector<1x16x512xf32>
    %16 = arith.addf %15, %14 : vector<1x16x512xf32>
    %c0_20 = arith.constant 0 : index
    %c1_21 = arith.constant 1 : index
    %c0_22 = arith.constant 0 : index
    %17 = vector.load %arg4[%c0_20, %c1_21, %c0_22] : memref<1x18x512xf32, #tpu.memory_space<vmem>>, vector<1x16x512xf32>
    tpu.vector_store %arg4[%c0_20, %c1_21, %c0_22], %16 {strides = array<i32>} : memref<1x18x512xf32, #tpu.memory_space<vmem>>, vector<1x16x512xf32>,
    %c2_23 = arith.constant 2 : index
    %c0_24 = arith.constant 0 : index
    %c0_25 = arith.constant 0 : index
    %18 = vector.load %arg1[%c2_23, %c0_24, %c0_25] : memref<3x512x512xf32, #tpu.memory_space<vmem>>, vector<1x512x512xf32>
    %19 = vector.shape_cast %18 : vector<1x512x512xf32> to vector<512x512xf32>
    %cst_26 = arith.constant dense<0.000000e+00> : vector<16x512xf32>
    %20 = tpu.matmul %3, %19, %cst_26 {dimension_numbers = #tpu.dot_dimension_numbers<[1], [0], [0], [1], [0, 0, 1, 1], [], []>} : vector<16x512xf32>, vector<512x512xf32>, vector<16x512xf32> -> vector<16x512xf32>
    %21 = vector.shape_cast %20 : vector<16x512xf32> to vector<1x16x512xf32>
    %c0_27 = arith.constant 0 : index
    %c0_28 = arith.constant 0 : index
    %c0_29 = arith.constant 0 : index
    %22 = vector.load %arg4[%c0_27, %c0_28, %c0_29] : memref<1x18x512xf32, #tpu.memory_space<vmem>>, vector<1x16x512xf32>
    %23 = arith.addf %22, %21 : vector<1x16x512xf32>
    %c0_30 = arith.constant 0 : index
    %c0_31 = arith.constant 0 : index
    %c0_32 = arith.constant 0 : index
    %24 = vector.load %arg4[%c0_30, %c0_31, %c0_32] : memref<1x18x512xf32, #tpu.memory_space<vmem>>, vector<1x16x512xf32>
    tpu.vector_store %arg4[%c0_30, %c0_31, %c0_32], %23 {strides = array<i32>} : memref<1x18x512xf32, #tpu.memory_space<vmem>>, vector<1x16x512xf32>,
    %c0_33 = arith.constant 0 : index
    %c1_34 = arith.constant 1 : index
    %c0_35 = arith.constant 0 : index
    %25 = vector.load %arg4[%c0_33, %c1_34, %c0_35] : memref<1x18x512xf32, #tpu.memory_space<vmem>>, vector<1x16x512xf32>
    %c0_36 = arith.constant 0 : index
    %c0_37 = arith.constant 0 : index
    %c0_38 = arith.constant 0 : index
    %26 = vector.load %arg3[%c0_36, %c0_37, %c0_38] : memref<1x16x512xf32, #tpu.memory_space<vmem>>, vector<1x16x512xf32>
    tpu.vector_store %arg3[%c0_36, %c0_37, %c0_38], %25 {strides = array<i32>} : memref<1x16x512xf32, #tpu.memory_space<vmem>>, vector<1x16x512xf32>,
    return
  }
  func.func @transform_0(%arg0: i32) -> (i32, i32, i32) {
    %c0_i32 = arith.constant 0 : i32
    %c0_i32_0 = arith.constant 0 : i32
    %c0_i32_1 = arith.constant 0 : i32
    %c0_i32_2 = arith.constant 0 : i32
    return %c0_i32, %c0_i32_0, %c0_i32_1 : i32, i32, i32
  }
  func.func @transform_1(%arg0: i32) -> (i32, i32, i32) {
    %c0_i32 = arith.constant 0 : i32
    %c0_i32_0 = arith.constant 0 : i32
    %c0_i32_1 = arith.constant 0 : i32
    return %arg0, %c0_i32, %c0_i32_0 : i32, i32, i32
  }
  func.func @transform_2(%arg0: i32) -> (i32, i32, i32) {
    %c0_i32 = arith.constant 0 : i32
    %c0_i32_0 = arith.constant 0 : i32
    %c0_i32_1 = arith.constant 0 : i32
    return %arg0, %c0_i32, %c0_i32_0 : i32, i32, i32
  }
}

</mosaic_0001>

<bundles_post_ra>
// kernel: tpu_custom_call.1
= control target key start
LH: loop header
LB: loop body
LE: loop exit
PB: predicated region body
PF: predicated region fallthrough
CT: control target
= control target key end

     0   :  { %7 = vsyncpa [#allocation4], 0  ;;  %s3026_s0 = inlined_call_operand.hbm [shape: f32[3,512,512], index: 0, kind: input, shape index: {}]   ;;  %s3027_s1 = inlined_call_operand.hbm [shape: f32[2,16,512], index: 1, kind: input, shape index: {}]   ;;  %s3028_s2 = inlined_call_operand.hbm [shape: f32[2,16,512], index: 2, kind: output, shape index: {}]  }
   0x1   :  { %8 = vsyncpa [#allocation7], 0 }
   0x2   :  { %10 = vsyncpa [#allocation7 + $0x1], 0 }
   0x3   :  { %11 = vsyncpa [#allocation5], 0 }
   0x4   :  { %13 = vsyncpa [#allocation5 + $0x1], 0  ;;  %s2648_s9 = smov 0   ;;  %s2650_s10 = smov 0  }
   0x5   :  { %s2652_s11 = smov 0   ;;  %s2654_s12 = smov 0  }
   0x6 LB: > { %s2669_s13 = sadd.s32 4294967295, %s2625_s12   ;;  %s2399_s14 = sadd.s32 4294967294, %s2625_s12   ;;  %s2625_s12 = sphi %s2654_s12, %s3038_s12   ;;  %s2621_s11 = sphi %s2652_s11, %s3037_s11   ;;  %s2617_s10 = sphi %s2650_s10, %s3036_s10   ;;  %s2613_s9 = sphi %s2648_s9, %s3035_s9  }
   0x7   : > { %p60_p0 = scmp.ne.s32.totalorder %s2617_s10, %s2613_s9  ;;  %p61_p1 = scmp.eq.s32.totalorder %s2669_s13, 0 }
   0x8   : > { %p84_p2 = scmp.eq.s32.totalorder %s2669_s13, 1  ;;  %p90_p3 = scmp.eq.s32.totalorder %s2399_s14, 1 }
   0x9   : > { %p2678_p4 = por %p61_p1, %p60_p0  ;;  %p2400_p5 = scmp.ge.s32.totalorder %s2625_s12, 1 }
   0xa   : > { %p2683_p6 = por %p90_p3, %p60_p0  ;;  %p97_p7 = scmp.lt.s32.totalorder %s2625_s12, 3 }
   0xb   : > { %s108_s19 = sshll.u32 %s3026_s0, 4  ;;  %s2627_s21 = smov [#allocation3]   ;;  %s109_s19 = int_to_ptr.hbm [resolvable:$true] %s108_s19 }
   0xc   : > { %p2691_p8 = pnand %p2400_p5, %p97_p7  ;;  %s110_s22 = sshll.u32 %s2627_s21, 4  ;;  %s111_s22 = int_to_ptr.vmem [resolvable:$true] %s110_s22 }
   0xd   : > { %s2701_s23 = sadd.s32 1, %s2625_s12   ;;  %s2628_s24 = smov 512  }
   0xe   : > { %p2425_p9 = pneg %p2691_p8  ;;  %s2629_s25 = smov 32  }
   0xf   : > { %s44_s26 = ssub.s32 %s2625_s12, %s2701_s23  ;;  %s47_s27 = sadd.s32 1, %s2621_s11 }
  0x10   : > { %p2426_p10 = pnand %p2425_p9, %p61_p1  ;;  %p45_p12 = scmp.eq.s32.totalorder %s44_s26, 0 }
  0x11   : > { %p54_p13 = scmp.ne.s32.totalorder %s2621_s11, %s2617_s10  ;;  %p55_p0 = scmp.eq.s32.totalorder %s2625_s12, 0 }
  0x12   : > { %2428 = dma.hbm_to_vmem [thread:$0]  (!%p2426_p10), %s109_s19, 98304, %s111_s22, [#allocation4], %s2628_s24, %s2628_s24, %s2629_s25  }
  0x13   : > { %s2713_s28 = scalar_select %p45_p12, %s2621_s11, %s47_s27  }
  0x14   : > { %p2717_p3 = por %p84_p2, %p54_p13  ;;  %p2438_p5 = scmp.lt.s32.totalorder %s2625_s12, 2 }
  0x15   : > { %s124_s30 = sand.u32 1, %s2621_s11   ;;  %s2415_s3 = sshll.u32 %s2625_s12, 6 }
  0x16   : > { %p56_p7 = por %p55_p0, %p54_p13  ;;  %s2403_s4 = sshll.u32 %s124_s30, 6 }
  0x17   : > { %s133_s7 = scalar_lea.hbm %s3027_s1, %s2415_s3  ;;  %s128_s14 = scalar_lea.vmem [#allocation6], %s2403_s4 }
  0x18   : > { %s134_s8 = sshll.u32 %s133_s7, 4  ;;  %s136_s17 = sshll.u32 %s128_s14, 4  ;;  %s135_s8 = int_to_ptr.hbm [resolvable:$true] %s134_s8  ;;  %s137_s17 = int_to_ptr.vmem [resolvable:$true] %s136_s17 }
  0x19   : > { %p2727_p9 = pnand %p2438_p5, %p56_p7  ;;  %s125_s19 = scalar_lea.sflag [#allocation7], %s124_s30 }
  0x1a   : > { %s2525_s21 = sshra.s32 %s135_s8, 4  ;;  %s2532_s3 = scalar_lea.hbm %s3027_s1, 128  ;;  %s2526_s21 = int_to_ptr.hbm [resolvable:$true] %s2525_s21 }
  0x1b   : > { %s2527_s22 = scalar_lea.hbm %s2526_s21, 64  ;;  %p2529_p10 = pneg %p2727_p9 }
  0x1c   : > { %p2528_p2 = scmp.ne.s32.totalorder %s2526_s21, %s2527_s22  ;;  %p2533_p0 = scmp.lt.s32.totalorder %s2526_s21, %s3027_s1 }
  0x1d   : > { %p2534_p5 = scmp.lt.s32.totalorder %s2532_s3, %s2527_s22 }
  0x1e   : > { %p2530_p12 = pnand %p2529_p10, %p2528_p2 }
  0x1f   : > { %p2535_p7 = por %p2534_p5, %p2533_p0 }
  0x20   : > { %p2531_p13 = pneg %p2530_p12 }
  0x22   : > { %p2536_p11 = pnand %p2535_p7, %p2531_p13 }
  0x24   : > { %2539 = shalt.err (!%p2536_p11)
}
  0x25   : > { %2432 = dma.hbm_to_vmem [thread:$0]  (!%p2727_p9), %s135_s8, 1024, %s137_s17, %s125_s19, %s2628_s24, %s2628_s24, %s2629_s25  }
  0x26   : > { %148 = sbr.rel (%p2691_p8) target bundleno = 673 (0x2a1), region = 28 }
  0x2b   : > { %2600 = dma.done.wait (%p61_p1), [#allocation4], 98304  }
  0x2c   : > { %2602 = vsyncadd (%p61_p1), [#allocation4], 4294868992  ;;  %s2751_s30 = sand.u32 1, %s2617_s10  }
  0x2d   : > { %s2408_s6 = sshll.u32 %s2751_s30, 6  ;;  %s156_s7 = scalar_lea.sflag [#allocation7], %s2751_s30 }
  0x2e   : > { %s2757_s24 = scalar_lea.vmem [#allocation6], %s2408_s6 }
  0x2f   : > { %2604 = dma.done.wait (%p2678_p4), %s156_s7, 1024  }
  0x30   : > { %2606 = vsyncadd (%p2678_p4), %s156_s7, 4294966272  ;;  %v389_v0 = vld [vmem:[#allocation3 + $0x5e0] sm:$0xff]  ;;  %v390_v62 = vld [vmem:[#allocation3 + $0x5e8] sm:$0xff]  ;;  %vm845_vm0 = vcmask 1041408   ;;  %vm1539_vm1 = vcmask 1040384   ;;  %vm2261_vm2 = vcmask 1046528  }
  0x31   : > { %v385_v1 = vld [vmem:[#allocation3 + $0x5c0] sm:$0xff]  ;;  %503 = vmatpush.msra.mxu2 %v389_v0  ;;  %v454_v63 = vld [vmem:[#allocation3 + $0x7e8] sm:$0xff]  ;;  %s2973_s15 = scalar_lea.vmem [#allocation8], %s2408_s6  ;;  %s2416_s20 = sshll.u32 %s2669_s13, 6 }
  0x32   : > { %v453_v2 = vld [vmem:[#allocation3 + $0x7e0] sm:$0xff]  ;;  %s2310_s14 = scalar_lea.hbm %s3028_s2, %s2416_s20  ;;  %s2311_s17 = sshll.u32 %s2973_s15, 4  ;;  %s2312_s17 = int_to_ptr.vmem [resolvable:$true] %s2311_s17 }
  0x33   : > { %526 = vmatpush.msra.mxu3 %v453_v2  ;;  %v261_v3 = vld [vmem:[#allocation3 + $0x1e0] sm:$0xff]  ;;  %504 = vmatpush.msra.mxu2 %v385_v1  ;;  %v386_v2 = vld [vmem:[#allocation3 + $0x5c8] sm:$0xff]  ;;  %s2313_s18 = sshll.u32 %s2310_s14, 4  ;;  %s2299_s13 = scalar_lea.sflag [#allocation5], %s2751_s30  ;;  %s2314_s18 = int_to_ptr.hbm [resolvable:$true] %s2313_s18 }
  0x34   : > { %v325_v4 = vld [vmem:[#allocation3 + $0x3e0] sm:$0xff]  ;;  %457 = vmatpush.msra.mxu0 %v261_v3  ;;  %v262_v3 = vld [vmem:[#allocation3 + $0x1e8] sm:$0xff]  ;;  %s2569_s19 = sshra.s32 %s2314_s18, 4  ;;  %s2575_s27 = scalar_lea.hbm %s3028_s2, 128  ;;  %s2570_s19 = int_to_ptr.hbm [resolvable:$true] %s2569_s19 }
  0x35   : > { %v381_v5 = vld [vmem:[#allocation3 + $0x5a0] sm:$0xff]  ;;  %480 = vmatpush.msra.mxu1 %v325_v4  ;;  %v326_v4 = vld [vmem:[#allocation3 + $0x3e8] sm:$0xff]  ;;  %s2571_s21 = scalar_lea.hbm %s2570_s19, 64  ;;  %p2576_p11 = scmp.lt.s32.totalorder %s2570_s19, %s3028_s2 }
  0x36   : > { %v449_v6 = vld [vmem:[#allocation3 + $0x7c0] sm:$0xff]  ;;  %505 = vmatpush.msra.mxu2 %v381_v5  ;;  %v450_v5 = vld [vmem:[#allocation3 + $0x7c8] sm:$0xff]  ;;  %p2572_p1 = scmp.ne.s32.totalorder %s2570_s19, %s2571_s21  ;;  %p2577_p9 = scmp.lt.s32.totalorder %s2575_s27, %s2571_s21 }
  0x37   : > { %v257_v7 = vld [vmem:[#allocation3 + $0x1c0] sm:$0xff]  ;;  %527 = vmatpush.msra.mxu3 %v449_v6  ;;  %v382_v6 = vld [vmem:[#allocation3 + $0x5a8] sm:$0xff] }
  0x38   : > { %v321_v8 = vld [vmem:[#allocation3 + $0x3c0] sm:$0xff]  ;;  %458 = vmatpush.msra.mxu0 %v257_v7  ;;  %v258_v7 = vld [vmem:[#allocation3 + $0x1c8] sm:$0xff]  ;;  %p2573_p4 = pnand %p2572_p1, %p2717_p3  ;;  %p2578_p2 = por %p2577_p9, %p2576_p11 }
  0x39   : > { %v445_v9 = vld [vmem:[#allocation3 + $0x7a0] sm:$0xff]  ;;  %481 = vmatpush.msra.mxu1 %v321_v8  ;;  %v322_v8 = vld [vmem:[#allocation3 + $0x3c8] sm:$0xff] }
  0x3a   : > { %v253_v10 = vld [vmem:[#allocation3 + $0x1a0] sm:$0xff]  ;;  %528 = vmatpush.msra.mxu3 %v445_v9  ;;  %v446_v9 = vld [vmem:[#allocation3 + $0x7a8] sm:$0xff]  ;;  %p2574_p8 = pneg %p2573_p4 }
  0x3b   : > { %v377_v11 = vld [vmem:[#allocation3 + $0x580] sm:$0xff]  ;;  %459 = vmatpush.msra.mxu0 %v253_v10  ;;  %v378_v10 = vld [vmem:[#allocation3 + $0x588] sm:$0xff] }
  0x3c   : > { %v317_v12 = vld [vmem:[#allocation3 + $0x3a0] sm:$0xff]  ;;  %506 = vmatpush.msra.mxu2 %v377_v11  ;;  %v254_v11 = vld [vmem:[#allocation3 + $0x1a8] sm:$0xff]  ;;  %p2579_p10 = pnand %p2578_p2, %p2574_p8 }
  0x3d   : > { %v441_v13 = vld [vmem:[#allocation3 + $0x780] sm:$0xff]  ;;  %482 = vmatpush.msra.mxu1 %v317_v12  ;;  %v318_v12 = vld [vmem:[#allocation3 + $0x3a8] sm:$0xff] }
  0x3e   : > { %v249_v14 = vld [vmem:[#allocation3 + $0x180] sm:$0xff]  ;;  %529 = vmatpush.msra.mxu3 %v441_v13  ;;  %v442_v13 = vld [vmem:[#allocation3 + $0x788] sm:$0xff] }
  0x3f   : > { %v313_v15 = vld [vmem:[#allocation3 + $0x380] sm:$0xff]  ;;  %460 = vmatpush.msra.mxu0 %v249_v14  ;;  %v374_v14 = vld [vmem:[#allocation3 + $0x568] sm:$0xff] }
  0x40   : > { %v373_v16 = vld [vmem:[#allocation3 + $0x560] sm:$0xff]  ;;  %483 = vmatpush.msra.mxu1 %v313_v15  ;;  %v250_v15 = vld [vmem:[#allocation3 + $0x188] sm:$0xff] }
  0x41   : > { %v437_v17 = vld [vmem:[#allocation3 + $0x760] sm:$0xff]  ;;  %507 = vmatpush.msra.mxu2 %v373_v16  ;;  %v314_v16 = vld [vmem:[#allocation3 + $0x388] sm:$0xff] }
  0x42   : > { %v245_v18 = vld [vmem:[#allocation3 + $0x160] sm:$0xff]  ;;  %530 = vmatpush.msra.mxu3 %v437_v17  ;;  %v438_v17 = vld [vmem:[#allocation3 + $0x768] sm:$0xff] }
  0x43   : > { %v309_v19 = vld [vmem:[#allocation3 + $0x360] sm:$0xff]  ;;  %461 = vmatpush.msra.mxu0 %v245_v18  ;;  %v370_v18 = vld [vmem:[#allocation3 + $0x548] sm:$0xff] }
  0x44   : > { %v369_v20 = vld [vmem:[#allocation3 + $0x540] sm:$0xff]  ;;  %484 = vmatpush.msra.mxu1 %v309_v19  ;;  %v246_v19 = vld [vmem:[#allocation3 + $0x168] sm:$0xff] }
  0x45   : > { %v433_v21 = vld [vmem:[#allocation3 + $0x740] sm:$0xff]  ;;  %508 = vmatpush.msra.mxu2 %v369_v20  ;;  %v310_v20 = vld [vmem:[#allocation3 + $0x368] sm:$0xff] }
  0x46   : > { %v241_v22 = vld [vmem:[#allocation3 + $0x140] sm:$0xff]  ;;  %531 = vmatpush.msra.mxu3 %v433_v21  ;;  %v434_v21 = vld [vmem:[#allocation3 + $0x748] sm:$0xff] }
  0x47   : > { %v305_v23 = vld [vmem:[#allocation3 + $0x340] sm:$0xff]  ;;  %462 = vmatpush.msra.mxu0 %v241_v22  ;;  %v366_v22 = vld [vmem:[#allocation3 + $0x528] sm:$0xff] }
  0x48   : > { %v365_v24 = vld [vmem:[#allocation3 + $0x520] sm:$0xff]  ;;  %485 = vmatpush.msra.mxu1 %v305_v23  ;;  %v242_v23 = vld [vmem:[#allocation3 + $0x148] sm:$0xff] }
  0x49   : > { %v429_v25 = vld [vmem:[#allocation3 + $0x720] sm:$0xff]  ;;  %509 = vmatpush.msra.mxu2 %v365_v24  ;;  %v306_v24 = vld [vmem:[#allocation3 + $0x348] sm:$0xff] }
  0x4a   : > { %v237_v26 = vld [vmem:[#allocation3 + $0x120] sm:$0xff]  ;;  %532 = vmatpush.msra.mxu3 %v429_v25  ;;  %v430_v25 = vld [vmem:[#allocation3 + $0x728] sm:$0xff] }
  0x4b   : > { %v301_v27 = vld [vmem:[#allocation3 + $0x320] sm:$0xff]  ;;  %463 = vmatpush.msra.mxu0 %v237_v26  ;;  %v362_v26 = vld [vmem:[#allocation3 + $0x508] sm:$0xff] }
  0x4c   : > { %v361_v28 = vld [vmem:[#allocation3 + $0x500] sm:$0xff]  ;;  %486 = vmatpush.msra.mxu1 %v301_v27  ;;  %v238_v27 = vld [vmem:[#allocation3 + $0x128] sm:$0xff] }
  0x4d   : > { %v425_v29 = vld [vmem:[#allocation3 + $0x700] sm:$0xff]  ;;  %510 = vmatpush.msra.mxu2 %v361_v28  ;;  %v302_v28 = vld [vmem:[#allocation3 + $0x328] sm:$0xff] }
  0x4e   : > { %v233_v30 = vld [vmem:[#allocation3 + $0x100] sm:$0xff]  ;;  %533 = vmatpush.msra.mxu3 %v425_v29  ;;  %v426_v29 = vld [vmem:[#allocation3 + $0x708] sm:$0xff] }
  0x4f   : > { %v297_v31 = vld [vmem:[#allocation3 + $0x300] sm:$0xff]  ;;  %464 = vmatpush.msra.mxu0 %v233_v30  ;;  %v358_v30 = vld [vmem:[#allocation3 + $0x4e8] sm:$0xff] }
  0x50   : > { %v357_v32 = vld [vmem:[#allocation3 + $0x4e0] sm:$0xff]  ;;  %487 = vmatpush.msra.mxu1 %v297_v31  ;;  %v234_v31 = vld [vmem:[#allocation3 + $0x108] sm:$0xff] }
  0x51   : > { %v421_v33 = vld [vmem:[#allocation3 + $0x6e0] sm:$0xff]  ;;  %511 = vmatpush.msra.mxu2 %v357_v32  ;;  %v298_v32 = vld [vmem:[#allocation3 + $0x308] sm:$0xff] }
  0x52   : > { %v229_v34 = vld [vmem:[#allocation3 + $0xe0] sm:$0xff]  ;;  %534 = vmatpush.msra.mxu3 %v421_v33  ;;  %v422_v33 = vld [vmem:[#allocation3 + $0x6e8] sm:$0xff] }
  0x53   : > { %v293_v35 = vld [vmem:[#allocation3 + $0x2e0] sm:$0xff]  ;;  %465 = vmatpush.msra.mxu0 %v229_v34  ;;  %v354_v34 = vld [vmem:[#allocation3 + $0x4c8] sm:$0xff] }
  0x54   : > { %v353_v36 = vld [vmem:[#allocation3 + $0x4c0] sm:$0xff]  ;;  %488 = vmatpush.msra.mxu1 %v293_v35  ;;  %v230_v35 = vld [vmem:[#allocation3 + $0xe8] sm:$0xff] }
  0x55   : > { %v417_v37 = vld [vmem:[#allocation3 + $0x6c0] sm:$0xff]  ;;  %512 = vmatpush.msra.mxu2 %v353_v36  ;;  %v294_v36 = vld [vmem:[#allocation3 + $0x2e8] sm:$0xff] }
  0x56   : > { %v225_v38 = vld [vmem:[#allocation3 + $0xc0] sm:$0xff]  ;;  %535 = vmatpush.msra.mxu3 %v417_v37  ;;  %v418_v37 = vld [vmem:[#allocation3 + $0x6c8] sm:$0xff] }
  0x57   : > { %v289_v39 = vld [vmem:[#allocation3 + $0x2c0] sm:$0xff]  ;;  %466 = vmatpush.msra.mxu0 %v225_v38  ;;  %v350_v38 = vld [vmem:[#allocation3 + $0x4a8] sm:$0xff] }
  0x58   : > { %v349_v40 = vld [vmem:[#allocation3 + $0x4a0] sm:$0xff]  ;;  %489 = vmatpush.msra.mxu1 %v289_v39  ;;  %v226_v39 = vld [vmem:[#allocation3 + $0xc8] sm:$0xff] }
  0x59   : > { %v413_v41 = vld [vmem:[#allocation3 + $0x6a0] sm:$0xff]  ;;  %513 = vmatpush.msra.mxu2 %v349_v40  ;;  %v290_v40 = vld [vmem:[#allocation3 + $0x2c8] sm:$0xff] }
  0x5a   : > { %v221_v42 = vld [vmem:[#allocation3 + $0xa0] sm:$0xff]  ;;  %536 = vmatpush.msra.mxu3 %v413_v41  ;;  %v414_v41 = vld [vmem:[#allocation3 + $0x6a8] sm:$0xff] }
  0x5b   : > { %v285_v43 = vld [vmem:[#allocation3 + $0x2a0] sm:$0xff]  ;;  %467 = vmatpush.msra.mxu0 %v221_v42  ;;  %v346_v42 = vld [vmem:[#allocation3 + $0x488] sm:$0xff] }
  0x5c   : > { %v345_v44 = vld [vmem:[#allocation3 + $0x480] sm:$0xff]  ;;  %490 = vmatpush.msra.mxu1 %v285_v43  ;;  %v222_v43 = vld [vmem:[#allocation3 + $0xa8] sm:$0xff] }
  0x5d   : > { %v409_v45 = vld [vmem:[#allocation3 + $0x680] sm:$0xff]  ;;  %514 = vmatpush.msra.mxu2 %v345_v44  ;;  %v2764_v44 = vld [vmem:[%s2757_s24 + $0x10] sm:$0xff] }
  0x5e   : > { %v217_v46 = vld [vmem:[#allocation3 + $0x80] sm:$0xff]  ;;  %537 = vmatpush.msra.mxu3 %v409_v45  ;;  %v286_v45 = vld [vmem:[#allocation3 + $0x2a8] sm:$0xff] }
  0x5f   : > { %v281_v47 = vld [vmem:[#allocation3 + $0x280] sm:$0xff]  ;;  %468 = vmatpush.msra.mxu0 %v217_v46  ;;  %v342_v46 = vld [vmem:[#allocation3 + $0x468] sm:$0xff] }
  0x60   : > { %v341_v48 = vld [vmem:[#allocation3 + $0x460] sm:$0xff]  ;;  %491 = vmatpush.msra.mxu1 %v281_v47  ;;  %v410_v47 = vld [vmem:[#allocation3 + $0x688] sm:$0xff] }
  0x61   : > { %v405_v49 = vld [vmem:[#allocation3 + $0x660] sm:$0xff]  ;;  %515 = vmatpush.msra.mxu2 %v341_v48  ;;  %v2767_v48 = vld [vmem:[%s2757_s24 + $0x18] sm:$0xff] }
  0x62   : > { %v213_v50 = vld [vmem:[#allocation3 + $0x60] sm:$0xff]  ;;  %538 = vmatpush.msra.mxu3 %v405_v49  ;;  %v218_v49 = vld [vmem:[#allocation3 + $0x88] sm:$0xff] }
  0x63   : > { %v277_v51 = vld [vmem:[#allocation3 + $0x260] sm:$0xff]  ;;  %469 = vmatpush.msra.mxu0 %v213_v50  ;;  %v282_v50 = vld [vmem:[#allocation3 + $0x288] sm:$0xff] }
  0x64   : > { %v337_v52 = vld [vmem:[#allocation3 + $0x440] sm:$0xff]  ;;  %492 = vmatpush.msra.mxu1 %v277_v51  ;;  %v338_v51 = vld [vmem:[#allocation3 + $0x448] sm:$0xff] }
  0x65   : > { %v401_v53 = vld [vmem:[#allocation3 + $0x640] sm:$0xff]  ;;  %516 = vmatpush.msra.mxu2 %v337_v52  ;;  %v406_v52 = vld [vmem:[#allocation3 + $0x668] sm:$0xff] }
  0x66   : > { %v209_v54 = vld [vmem:[#allocation3 + $0x40] sm:$0xff]  ;;  %539 = vmatpush.msra.mxu3 %v401_v53 }
  0x67   : > { %v273_v55 = vld [vmem:[#allocation3 + $0x240] sm:$0xff]  ;;  %470 = vmatpush.msra.mxu0 %v209_v54  ;;  %v2775_v54 = vld [vmem:[%s2757_s24 + $0x8] sm:$0xff] }
  0x68   : > { %v333_v56 = vld [vmem:[#allocation3 + $0x420] sm:$0xff]  ;;  %493 = vmatpush.msra.mxu1 %v273_v55  ;;  %v214_v55 = vld [vmem:[#allocation3 + $0x68] sm:$0xff] }
  0x69   : > { %v397_v57 = vld [vmem:[#allocation3 + $0x620] sm:$0xff]  ;;  %517 = vmatpush.msra.mxu2 %v333_v56  ;;  %v278_v56 = vld [vmem:[#allocation3 + $0x268] sm:$0xff] }
  0x6a   : > { %v205_v58 = vld [vmem:[#allocation3 + $0x20] sm:$0xff]  ;;  %540 = vmatpush.msra.mxu3 %v397_v57  ;;  %v334_v57 = vld [vmem:[#allocation3 + $0x428] sm:$0xff] }
  0x6b   : > { %v269_v59 = vld [vmem:[#allocation3 + $0x220] sm:$0xff]  ;;  %471 = vmatpush.msra.mxu0 %v205_v58  ;;  %v402_v58 = vld [vmem:[#allocation3 + $0x648] sm:$0xff] }
  0x6c   : > { %v329_v60 = vld [vmem:[#allocation3 + $0x400] sm:$0xff]  ;;  %494 = vmatpush.msra.mxu1 %v269_v59  ;;  %v210_v59 = vld [vmem:[#allocation3 + $0x48] sm:$0xff] }
  0x6d   : > { %v393_v61 = vld [vmem:[#allocation3 + $0x600] sm:$0xff]  ;;  %518 = vmatpush.msra.mxu2 %v329_v60  ;;  %v274_v60 = vld [vmem:[#allocation3 + $0x248] sm:$0xff] }
  0x6e   : > { %v201_v0 = vld [vmem:[#allocation3] sm:$0xff]  ;;  %541 = vmatpush.msra.mxu3 %v393_v61  ;;  %519 = vmatmul.f32.vlgmr.msra.gmra.mxu2 %v2764_v44  ;;  %v330_v61 = vld [vmem:[#allocation3 + $0x408] sm:$0xff] }
  0x6f   : > { %v265_v1 = vld [vmem:[#allocation3 + $0x200] sm:$0xff]  ;;  %595 = vmatpush.msrb.mxu2 %v390_v62  ;;  %472 = vmatpush.msra.mxu0 %v201_v0  ;;  %v398_v62 = vld [vmem:[#allocation3 + $0x628] sm:$0xff]  ;;  %v391_v0 = vld [vmem:[#allocation3 + $0x5f0] sm:$0xff] }
  0x70   : > { %618 = vmatpush.msrb.mxu3 %v454_v63  ;;  %495 = vmatpush.msra.mxu1 %v265_v1  ;;  %v2771_v53 = vld [vmem:[%s2757_s24] sm:$0xff]  ;;  %v2780_v63 = vld [vmem:[%s2757_s24 + $0x30] sm:$0xff]  ;;  %v206_v1 = vld [vmem:[#allocation3 + $0x28] sm:$0xff] }
  0x71   : > { %596 = vmatpush.msrb.mxu2 %v386_v2  ;;  %549 = vmatpush.msrb.mxu0 %v262_v3  ;;  %v270_v2 = vld [vmem:[#allocation3 + $0x228] sm:$0xff] }
  0x72   : > { %572 = vmatpush.msrb.mxu1 %v326_v4  ;;  %619 = vmatpush.msrb.mxu3 %v450_v5  ;;  %v394_v3 = vld [vmem:[#allocation3 + $0x608] sm:$0xff]  ;;  %v2784_v4 = vld [vmem:[%s2757_s24 + $0x38] sm:$0xff]  ;;  %v387_v5 = vld [vmem:[#allocation3 + $0x5d0] sm:$0xff] }
  0x73   : > { %597 = vmatpush.msrb.mxu2 %v382_v6  ;;  %550 = vmatpush.msrb.mxu0 %v258_v7  ;;  %v455_v6 = vld [vmem:[#allocation3 + $0x7f0] sm:$0xff]  ;;  %v202_v7 = vld [vmem:[#allocation3 + $0x8] sm:$0xff] }
  0x74   : > { %573 = vmatpush.msrb.mxu1 %v322_v8  ;;  %620 = vmatpush.msrb.mxu3 %v446_v9  ;;  %v266_v8 = vld [vmem:[#allocation3 + $0x208] sm:$0xff]  ;;  %v2787_v9 = vld [vmem:[%s2757_s24 + $0x20] sm:$0xff] }
  0x75   : > { %598 = vmatpush.msrb.mxu2 %v378_v10  ;;  %551 = vmatpush.msrb.mxu0 %v254_v11  ;;  %v2791_v10 = vld [vmem:[%s2757_s24 + $0x28] sm:$0xff]  ;;  %v263_v11 = vld [vmem:[#allocation3 + $0x1f0] sm:$0xff] }
  0x76   : > { %574 = vmatpush.msrb.mxu1 %v318_v12  ;;  %621 = vmatpush.msrb.mxu3 %v442_v13  ;;  %v327_v12 = vld [vmem:[#allocation3 + $0x3f0] sm:$0xff] }
  0x77   : > { %599 = vmatpush.msrb.mxu2 %v374_v14  ;;  %552 = vmatpush.msrb.mxu0 %v250_v15  ;;  %v383_v13 = vld [vmem:[#allocation3 + $0x5b0] sm:$0xff] }
  0x78   : > { %575 = vmatpush.msrb.mxu1 %v314_v16  ;;  %622 = vmatpush.msrb.mxu3 %v438_v17  ;;  %v451_v14 = vld [vmem:[#allocation3 + $0x7d0] sm:$0xff] }
  0x79   : > { %600 = vmatpush.msrb.mxu2 %v370_v18  ;;  %553 = vmatpush.msrb.mxu0 %v246_v19  ;;  %v259_v15 = vld [vmem:[#allocation3 + $0x1d0] sm:$0xff] }
  0x7a   : > { %576 = vmatpush.msrb.mxu1 %v310_v20  ;;  %623 = vmatpush.msrb.mxu3 %v434_v21  ;;  %v323_v16 = vld [vmem:[#allocation3 + $0x3d0] sm:$0xff] }
  0x7b   : > { %601 = vmatpush.msrb.mxu2 %v366_v22  ;;  %554 = vmatpush.msrb.mxu0 %v242_v23  ;;  %v379_v17 = vld [vmem:[#allocation3 + $0x590] sm:$0xff] }
  0x7c   : > { %577 = vmatpush.msrb.mxu1 %v306_v24  ;;  %624 = vmatpush.msrb.mxu3 %v430_v25  ;;  %v447_v18 = vld [vmem:[#allocation3 + $0x7b0] sm:$0xff] }
  0x7d   : > { %602 = vmatpush.msrb.mxu2 %v362_v26  ;;  %555 = vmatpush.msrb.mxu0 %v238_v27  ;;  %v255_v19 = vld [vmem:[#allocation3 + $0x1b0] sm:$0xff] }
  0x7e   : > { %578 = vmatpush.msrb.mxu1 %v302_v28  ;;  %625 = vmatpush.msrb.mxu3 %v426_v29  ;;  %v319_v20 = vld [vmem:[#allocation3 + $0x3b0] sm:$0xff] }
  0x7f   : > { %603 = vmatpush.msrb.mxu2 %v358_v30  ;;  %556 = vmatpush.msrb.mxu0 %v234_v31  ;;  %v375_v21 = vld [vmem:[#allocation3 + $0x570] sm:$0xff] }
  0x80   : > { %579 = vmatpush.msrb.mxu1 %v298_v32  ;;  %626 = vmatpush.msrb.mxu3 %v422_v33  ;;  %v443_v22 = vld [vmem:[#allocation3 + $0x790] sm:$0xff] }
  0x81   : > { %604 = vmatpush.msrb.mxu2 %v354_v34  ;;  %557 = vmatpush.msrb.mxu0 %v230_v35  ;;  %v251_v23 = vld [vmem:[#allocation3 + $0x190] sm:$0xff] }
  0x82   : > { %580 = vmatpush.msrb.mxu1 %v294_v36  ;;  %627 = vmatpush.msrb.mxu3 %v418_v37  ;;  %v315_v24 = vld [vmem:[#allocation3 + $0x390] sm:$0xff] }
  0x83   : > { %605 = vmatpush.msrb.mxu2 %v350_v38  ;;  %558 = vmatpush.msrb.mxu0 %v226_v39  ;;  %v371_v25 = vld [vmem:[#allocation3 + $0x550] sm:$0xff] }
  0x84   : > { %581 = vmatpush.msrb.mxu1 %v290_v40  ;;  %628 = vmatpush.msrb.mxu3 %v414_v41  ;;  %v439_v26 = vld [vmem:[#allocation3 + $0x770] sm:$0xff] }
  0x85   : > { %606 = vmatpush.msrb.mxu2 %v346_v42  ;;  %559 = vmatpush.msrb.mxu0 %v222_v43  ;;  %v247_v27 = vld [vmem:[#allocation3 + $0x170] sm:$0xff] }
  0x86   : > { %582 = vmatpush.msrb.mxu1 %v286_v45  ;;  %629 = vmatpush.msrb.mxu3 %v410_v47  ;;  %v311_v28 = vld [vmem:[#allocation3 + $0x370] sm:$0xff] }
  0x87   : > { %607 = vmatpush.msrb.mxu2 %v342_v46  ;;  %542 = vmatmul.f32.vlgmr.msra.gmra.mxu3 %v2767_v48  ;;  %v367_v29 = vld [vmem:[#allocation3 + $0x530] sm:$0xff] }
  0x88   : > { %560 = vmatpush.msrb.mxu0 %v218_v49  ;;  %583 = vmatpush.msrb.mxu1 %v282_v50  ;;  %v435_v30 = vld [vmem:[#allocation3 + $0x750] sm:$0xff] }
  0x89   : > { %608 = vmatpush.msrb.mxu2 %v338_v51  ;;  %630 = vmatpush.msrb.mxu3 %v406_v52  ;;  %v243_v31 = vld [vmem:[#allocation3 + $0x150] sm:$0xff] }
  0x8a   : > { %473 = vmatmul.f32.vlgmr.msra.gmra.mxu0 %v2771_v53  ;;  %496 = vmatmul.f32.vlgmr.msra.gmra.mxu1 %v2775_v54  ;;  %v307_v32 = vld [vmem:[#allocation3 + $0x350] sm:$0xff] }
  0x8b   : > { %561 = vmatpush.msrb.mxu0 %v214_v55  ;;  %584 = vmatpush.msrb.mxu1 %v278_v56  ;;  %v363_v33 = vld [vmem:[#allocation3 + $0x510] sm:$0xff] }
  0x8c   : > { %609 = vmatpush.msrb.mxu2 %v334_v57  ;;  %631 = vmatpush.msrb.mxu3 %v402_v58  ;;  %v431_v34 = vld [vmem:[#allocation3 + $0x730] sm:$0xff] }
  0x8d   : > { %562 = vmatpush.msrb.mxu0 %v210_v59  ;;  %585 = vmatpush.msrb.mxu1 %v274_v60  ;;  %v239_v35 = vld [vmem:[#allocation3 + $0x130] sm:$0xff] }
  0x8e   : > { %610 = vmatpush.msrb.mxu2 %v330_v61  ;;  %632 = vmatpush.msrb.mxu3 %v398_v62  ;;  %v303_v36 = vld [vmem:[#allocation3 + $0x330] sm:$0xff] }
  0x8f   : > { %522 = vmatmul.f32.gmra.mxu2 %v2780_v63  ;;  %563 = vmatpush.msrb.mxu0 %v206_v1  ;;  %v359_v37 = vld [vmem:[#allocation3 + $0x4f0] sm:$0xff] }
  0x90   : > { %687 = vmatpush.msra.mxu2 %v391_v0  ;;  %586 = vmatpush.msrb.mxu1 %v270_v2  ;;  %v427_v38 = vld [vmem:[#allocation3 + $0x710] sm:$0xff] }
  0x91   : > { %633 = vmatpush.msrb.mxu3 %v394_v3  ;;  %564 = vmatpush.msrb.mxu0 %v202_v7  ;;  %v235_v39 = vld [vmem:[#allocation3 + $0x110] sm:$0xff] }
  0x92   : > { %545 = vmatmul.f32.gmra.mxu3 %v2784_v4  ;;  %688 = vmatpush.msra.mxu2 %v387_v5  ;;  %v299_v40 = vld [vmem:[#allocation3 + $0x310] sm:$0xff] }
  0x93   : > { %710 = vmatpush.msra.mxu3 %v455_v6  ;;  %587 = vmatpush.msrb.mxu1 %v266_v8  ;;  %v355_v41 = vld [vmem:[#allocation3 + $0x4d0] sm:$0xff] }
  0x94   : > { %476 = vmatmul.f32.gmra.mxu0 %v2787_v9  ;;  %499 = vmatmul.f32.gmra.mxu1 %v2791_v10  ;;  %v423_v42 = vld [vmem:[#allocation3 + $0x6f0] sm:$0xff] }
  0x95   : > { %641 = vmatpush.msra.mxu0 %v263_v11  ;;  %664 = vmatpush.msra.mxu1 %v327_v12  ;;  %v231_v43 = vld [vmem:[#allocation3 + $0xf0] sm:$0xff]  ;;  %v392_v11 = vld [vmem:[#allocation3 + $0x5f8] sm:$0xff] }
  0x96   : > { %689 = vmatpush.msra.mxu2 %v383_v13  ;;  %711 = vmatpush.msra.mxu3 %v451_v14  ;;  %v295_v45 = vld [vmem:[#allocation3 + $0x2f0] sm:$0xff] }
  0x97   : > { %642 = vmatpush.msra.mxu0 %v259_v15  ;;  %665 = vmatpush.msra.mxu1 %v323_v16  ;;  %v351_v46 = vld [vmem:[#allocation3 + $0x4b0] sm:$0xff]  ;;  %v388_v15 = vld [vmem:[#allocation3 + $0x5d8] sm:$0xff] }
  0x98   : > { %690 = vmatpush.msra.mxu2 %v379_v17  ;;  %712 = vmatpush.msra.mxu3 %v447_v18  ;;  %v419_v47 = vld [vmem:[#allocation3 + $0x6d0] sm:$0xff]  ;;  %v456_v16 = vld [vmem:[#allocation3 + $0x7f8] sm:$0xff] }
  0x99   : > { %643 = vmatpush.msra.mxu0 %v255_v19  ;;  %666 = vmatpush.msra.mxu1 %v319_v20  ;;  %v227_v49 = vld [vmem:[#allocation3 + $0xd0] sm:$0xff]  ;;  %v264_v19 = vld [vmem:[#allocation3 + $0x1f8] sm:$0xff] }
  0x9a   : > { %691 = vmatpush.msra.mxu2 %v375_v21  ;;  %713 = vmatpush.msra.mxu3 %v443_v22  ;;  %v291_v50 = vld [vmem:[#allocation3 + $0x2d0] sm:$0xff]  ;;  %v328_v20 = vld [vmem:[#allocation3 + $0x3f8] sm:$0xff] }
  0x9b   : > { %644 = vmatpush.msra.mxu0 %v251_v23  ;;  %667 = vmatpush.msra.mxu1 %v315_v24  ;;  %v347_v51 = vld [vmem:[#allocation3 + $0x490] sm:$0xff]  ;;  %v384_v21 = vld [vmem:[#allocation3 + $0x5b8] sm:$0xff] }
  0x9c   : > { %692 = vmatpush.msra.mxu2 %v371_v25  ;;  %714 = vmatpush.msra.mxu3 %v439_v26  ;;  %v415_v52 = vld [vmem:[#allocation3 + $0x6b0] sm:$0xff]  ;;  %v452_v22 = vld [vmem:[#allocation3 + $0x7d8] sm:$0xff] }
  0x9d   : > { %645 = vmatpush.msra.mxu0 %v247_v27  ;;  %668 = vmatpush.msra.mxu1 %v311_v28  ;;  %v223_v55 = vld [vmem:[#allocation3 + $0xb0] sm:$0xff]  ;;  %v260_v23 = vld [vmem:[#allocation3 + $0x1d8] sm:$0xff] }
  0x9e   : > { %693 = vmatpush.msra.mxu2 %v367_v29  ;;  %715 = vmatpush.msra.mxu3 %v435_v30  ;;  %v287_v56 = vld [vmem:[#allocation3 + $0x2b0] sm:$0xff]  ;;  %v324_v24 = vld [vmem:[#allocation3 + $0x3d8] sm:$0xff] }
  0x9f   : > { %646 = vmatpush.msra.mxu0 %v243_v31  ;;  %669 = vmatpush.msra.mxu1 %v307_v32  ;;  %v343_v57 = vld [vmem:[#allocation3 + $0x470] sm:$0xff]  ;;  %v380_v25 = vld [vmem:[#allocation3 + $0x598] sm:$0xff] }
  0xa0   : > { %694 = vmatpush.msra.mxu2 %v363_v33  ;;  %716 = vmatpush.msra.mxu3 %v431_v34  ;;  %v411_v58 = vld [vmem:[#allocation3 + $0x690] sm:$0xff]  ;;  %v448_v26 = vld [vmem:[#allocation3 + $0x7b8] sm:$0xff] }
  0xa1   : > { %647 = vmatpush.msra.mxu0 %v239_v35  ;;  %670 = vmatpush.msra.mxu1 %v303_v36  ;;  %v219_v59 = vld [vmem:[#allocation3 + $0x90] sm:$0xff]  ;;  %v256_v27 = vld [vmem:[#allocation3 + $0x1b8] sm:$0xff] }
  0xa2   : > { %695 = vmatpush.msra.mxu2 %v359_v37  ;;  %717 = vmatpush.msra.mxu3 %v427_v38  ;;  %v283_v60 = vld [vmem:[#allocation3 + $0x290] sm:$0xff]  ;;  %v320_v28 = vld [vmem:[#allocation3 + $0x3b8] sm:$0xff] }
  0xa3   : > { %648 = vmatpush.msra.mxu0 %v235_v39  ;;  %671 = vmatpush.msra.mxu1 %v299_v40  ;;  %v339_v61 = vld [vmem:[#allocation3 + $0x450] sm:$0xff]  ;;  %v376_v29 = vld [vmem:[#allocation3 + $0x578] sm:$0xff] }
  0xa4   : > { %696 = vmatpush.msra.mxu2 %v355_v41  ;;  %718 = vmatpush.msra.mxu3 %v423_v42  ;;  %v407_v62 = vld [vmem:[#allocation3 + $0x670] sm:$0xff]  ;;  %v444_v30 = vld [vmem:[#allocation3 + $0x798] sm:$0xff] }
  0xa5   : > { %649 = vmatpush.msra.mxu0 %v231_v43  ;;  %672 = vmatpush.msra.mxu1 %v295_v45  ;;  %v215_v0 = vld [vmem:[#allocation3 + $0x70] sm:$0xff]  ;;  %v252_v31 = vld [vmem:[#allocation3 + $0x198] sm:$0xff] }
  0xa6   : > { %697 = vmatpush.msra.mxu2 %v351_v46  ;;  %719 = vmatpush.msra.mxu3 %v419_v47  ;;  %v279_v1 = vld [vmem:[#allocation3 + $0x270] sm:$0xff]  ;;  %v316_v32 = vld [vmem:[#allocation3 + $0x398] sm:$0xff] }
  0xa7   : > { %650 = vmatpush.msra.mxu0 %v227_v49  ;;  %673 = vmatpush.msra.mxu1 %v291_v50  ;;  %v335_v2 = vld [vmem:[#allocation3 + $0x430] sm:$0xff]  ;;  %v372_v33 = vld [vmem:[#allocation3 + $0x558] sm:$0xff] }
  0xa8   : > { %698 = vmatpush.msra.mxu2 %v347_v51  ;;  %720 = vmatpush.msra.mxu3 %v415_v52  ;;  %v403_v3 = vld [vmem:[#allocation3 + $0x650] sm:$0xff]  ;;  %v440_v34 = vld [vmem:[#allocation3 + $0x778] sm:$0xff] }
  0xa9   : > { %611 = vmatmul.f32.vlgmr.msrb.gmra.mxu2 %v2764_v44  ;;  %651 = vmatpush.msra.mxu0 %v223_v55  ;;  %v211_v5 = vld [vmem:[#allocation3 + $0x50] sm:$0xff]  ;;  %v248_v35 = vld [vmem:[#allocation3 + $0x178] sm:$0xff] }
  0xaa   : > { %674 = vmatpush.msra.mxu1 %v287_v56  ;;  %699 = vmatpush.msra.mxu2 %v343_v57  ;;  %v275_v6 = vld [vmem:[#allocation3 + $0x250] sm:$0xff]  ;;  %v312_v36 = vld [vmem:[#allocation3 + $0x378] sm:$0xff] }
  0xab   : > { %721 = vmatpush.msra.mxu3 %v411_v58  ;;  %652 = vmatpush.msra.mxu0 %v219_v59  ;;  %v331_v7 = vld [vmem:[#allocation3 + $0x410] sm:$0xff]  ;;  %v368_v37 = vld [vmem:[#allocation3 + $0x538] sm:$0xff] }
  0xac   : > { %634 = vmatmul.f32.vlgmr.msrb.gmra.mxu3 %v2767_v48  ;;  %675 = vmatpush.msra.mxu1 %v283_v60  ;;  %v399_v8 = vld [vmem:[#allocation3 + $0x630] sm:$0xff]  ;;  %v436_v38 = vld [vmem:[#allocation3 + $0x758] sm:$0xff] }
  0xad   : > { %700 = vmatpush.msra.mxu2 %v339_v61  ;;  %722 = vmatpush.msra.mxu3 %v407_v62  ;;  %v207_v12 = vld [vmem:[#allocation3 + $0x30] sm:$0xff]  ;;  %v244_v39 = vld [vmem:[#allocation3 + $0x158] sm:$0xff] }
  0xae   : > { %565 = vmatmul.f32.vlgmr.msrb.gmra.mxu0 %v2771_v53  ;;  %588 = vmatmul.f32.vlgmr.msrb.gmra.mxu1 %v2775_v54  ;;  %v271_v13 = vld [vmem:[#allocation3 + $0x230] sm:$0xff]  ;;  %v308_v40 = vld [vmem:[#allocation3 + $0x358] sm:$0xff] }
  0xaf   : > { %653 = vmatpush.msra.mxu0 %v215_v0  ;;  %676 = vmatpush.msra.mxu1 %v279_v1  ;;  %v395_v14 = vld [vmem:[#allocation3 + $0x610] sm:$0xff]  ;;  %v364_v41 = vld [vmem:[#allocation3 + $0x518] sm:$0xff] }
  0xb0   : > { %701 = vmatpush.msra.mxu2 %v335_v2  ;;  %723 = vmatpush.msra.mxu3 %v403_v3  ;;  %v203_v17 = vld [vmem:[#allocation3 + $0x10] sm:$0xff]  ;;  %v432_v42 = vld [vmem:[#allocation3 + $0x738] sm:$0xff] }
  0xb1   : > { %654 = vmatpush.msra.mxu0 %v211_v5  ;;  %677 = vmatpush.msra.mxu1 %v275_v6  ;;  %v267_v18 = vld [vmem:[#allocation3 + $0x210] sm:$0xff]  ;;  %v240_v43 = vld [vmem:[#allocation3 + $0x138] sm:$0xff] }
  0xb2   : > { %702 = vmatpush.msra.mxu2 %v331_v7  ;;  %724 = vmatpush.msra.mxu3 %v399_v8  ;;  %v304_v45 = vld [vmem:[#allocation3 + $0x338] sm:$0xff] }
  0xb3   : > { %614 = vmatmul.f32.gmra.mxu2 %v2780_v63  ;;  %655 = vmatpush.msra.mxu0 %v207_v12  ;;  %v360_v46 = vld [vmem:[#allocation3 + $0x4f8] sm:$0xff] }
  0xb4   : > { %779 = vmatpush.msrb.mxu2 %v392_v11  ;;  %678 = vmatpush.msra.mxu1 %v271_v13  ;;  %v428_v47 = vld [vmem:[#allocation3 + $0x718] sm:$0xff] }
  0xb5   : > { %725 = vmatpush.msra.mxu3 %v395_v14  ;;  %656 = vmatpush.msra.mxu0 %v203_v17  ;;  %v236_v49 = vld [vmem:[#allocation3 + $0x118] sm:$0xff] }
  0xb6   : > { %637 = vmatmul.f32.gmra.mxu3 %v2784_v4  ;;  %780 = vmatpush.msrb.mxu2 %v388_v15  ;;  %v300_v50 = vld [vmem:[#allocation3 + $0x318] sm:$0xff] }
  0xb7   : > { %802 = vmatpush.msrb.mxu3 %v456_v16  ;;  %679 = vmatpush.msra.mxu1 %v267_v18  ;;  %v356_v51 = vld [vmem:[#allocation3 + $0x4d8] sm:$0xff] }
  0xb8   : > { %568 = vmatmul.f32.gmra.mxu0 %v2787_v9  ;;  %591 = vmatmul.f32.gmra.mxu1 %v2791_v10  ;;  %v424_v52 = vld [vmem:[#allocation3 + $0x6f8] sm:$0xff] }
  0xb9   : > { %733 = vmatpush.msrb.mxu0 %v264_v19  ;;  %756 = vmatpush.msrb.mxu1 %v328_v20  ;;  %v232_v55 = vld [vmem:[#allocation3 + $0xf8] sm:$0xff]  ;;  %v1083_v19 = vld [vmem:[#allocation3 + $0xde0] sm:$0xff] }
  0xba   : > { %781 = vmatpush.msrb.mxu2 %v384_v21  ;;  %803 = vmatpush.msrb.mxu3 %v452_v22  ;;  %v296_v56 = vld [vmem:[#allocation3 + $0x2f8] sm:$0xff] }
  0xbb   : > { %734 = vmatpush.msrb.mxu0 %v260_v23  ;;  %757 = vmatpush.msrb.mxu1 %v324_v24  ;;  %v352_v57 = vld [vmem:[#allocation3 + $0x4b8] sm:$0xff]  ;;  %v1079_v23 = vld [vmem:[#allocation3 + $0xdc0] sm:$0xff] }
  0xbc   : > { %782 = vmatpush.msrb.mxu2 %v380_v25  ;;  %804 = vmatpush.msrb.mxu3 %v448_v26  ;;  %v420_v58 = vld [vmem:[#allocation3 + $0x6d8] sm:$0xff]  ;;  %v1147_v24 = vld [vmem:[#allocation3 + $0xfe0] sm:$0xff] }
  0xbd   : > { %735 = vmatpush.msrb.mxu0 %v256_v27  ;;  %758 = vmatpush.msrb.mxu1 %v320_v28  ;;  %v228_v59 = vld [vmem:[#allocation3 + $0xd8] sm:$0xff]  ;;  %v955_v27 = vld [vmem:[#allocation3 + $0x9e0] sm:$0xff] }
  0xbe   : > { %783 = vmatpush.msrb.mxu2 %v376_v29  ;;  %805 = vmatpush.msrb.mxu3 %v444_v30  ;;  %v292_v60 = vld [vmem:[#allocation3 + $0x2d8] sm:$0xff]  ;;  %v1019_v28 = vld [vmem:[#allocation3 + $0xbe0] sm:$0xff] }
  0xbf   : > { %736 = vmatpush.msrb.mxu0 %v252_v31  ;;  %759 = vmatpush.msrb.mxu1 %v316_v32  ;;  %v348_v61 = vld [vmem:[#allocation3 + $0x498] sm:$0xff]  ;;  %v1075_v29 = vld [vmem:[#allocation3 + $0xda0] sm:$0xff] }
  0xc0   : > { %784 = vmatpush.msrb.mxu2 %v372_v33  ;;  %806 = vmatpush.msrb.mxu3 %v440_v34  ;;  %v416_v62 = vld [vmem:[#allocation3 + $0x6b8] sm:$0xff]  ;;  %v1143_v30 = vld [vmem:[#allocation3 + $0xfc0] sm:$0xff] }
  0xc1   : > { %737 = vmatpush.msrb.mxu0 %v248_v35  ;;  %760 = vmatpush.msrb.mxu1 %v312_v36  ;;  %v224_v0 = vld [vmem:[#allocation3 + $0xb8] sm:$0xff]  ;;  %v951_v31 = vld [vmem:[#allocation3 + $0x9c0] sm:$0xff] }
  0xc2   : > { %785 = vmatpush.msrb.mxu2 %v368_v37  ;;  %807 = vmatpush.msrb.mxu3 %v436_v38  ;;  %v288_v1 = vld [vmem:[#allocation3 + $0x2b8] sm:$0xff]  ;;  %v1015_v32 = vld [vmem:[#allocation3 + $0xbc0] sm:$0xff] }
  0xc3   : > { %738 = vmatpush.msrb.mxu0 %v244_v39  ;;  %761 = vmatpush.msrb.mxu1 %v308_v40  ;;  %v344_v2 = vld [vmem:[#allocation3 + $0x478] sm:$0xff]  ;;  %v1071_v33 = vld [vmem:[#allocation3 + $0xd80] sm:$0xff] }
  0xc4   : > { %786 = vmatpush.msrb.mxu2 %v364_v41  ;;  %808 = vmatpush.msrb.mxu3 %v432_v42  ;;  %v412_v3 = vld [vmem:[#allocation3 + $0x698] sm:$0xff]  ;;  %v1139_v34 = vld [vmem:[#allocation3 + $0xfa0] sm:$0xff] }
  0xc5   : > { %739 = vmatpush.msrb.mxu0 %v240_v43  ;;  %762 = vmatpush.msrb.mxu1 %v304_v45  ;;  %v220_v5 = vld [vmem:[#allocation3 + $0x98] sm:$0xff]  ;;  %v947_v35 = vld [vmem:[#allocation3 + $0x9a0] sm:$0xff] }
  0xc6   : > { %787 = vmatpush.msrb.mxu2 %v360_v46  ;;  %809 = vmatpush.msrb.mxu3 %v428_v47  ;;  %v284_v6 = vld [vmem:[#allocation3 + $0x298] sm:$0xff]  ;;  %v1011_v36 = vld [vmem:[#allocation3 + $0xba0] sm:$0xff] }
  0xc7   : > { %740 = vmatpush.msrb.mxu0 %v236_v49  ;;  %763 = vmatpush.msrb.mxu1 %v300_v50  ;;  %v340_v7 = vld [vmem:[#allocation3 + $0x458] sm:$0xff]  ;;  %v1067_v37 = vld [vmem:[#allocation3 + $0xd60] sm:$0xff] }
  0xc8   : > { %788 = vmatpush.msrb.mxu2 %v356_v51  ;;  %810 = vmatpush.msrb.mxu3 %v424_v52  ;;  %v408_v8 = vld [vmem:[#allocation3 + $0x678] sm:$0xff]  ;;  %v1135_v38 = vld [vmem:[#allocation3 + $0xf80] sm:$0xff] }
  0xc9   : > { %741 = vmatpush.msrb.mxu0 %v232_v55  ;;  %764 = vmatpush.msrb.mxu1 %v296_v56  ;;  %v216_v11 = vld [vmem:[#allocation3 + $0x78] sm:$0xff]  ;;  %v943_v39 = vld [vmem:[#allocation3 + $0x980] sm:$0xff] }
  0xca   : > { %789 = vmatpush.msrb.mxu2 %v352_v57  ;;  %811 = vmatpush.msrb.mxu3 %v420_v58  ;;  %v280_v12 = vld [vmem:[#allocation3 + $0x278] sm:$0xff]  ;;  %v1007_v40 = vld [vmem:[#allocation3 + $0xb80] sm:$0xff] }
  0xcb   : > { %742 = vmatpush.msrb.mxu0 %v228_v59  ;;  %765 = vmatpush.msrb.mxu1 %v292_v60  ;;  %v336_v13 = vld [vmem:[#allocation3 + $0x438] sm:$0xff]  ;;  %v1063_v41 = vld [vmem:[#allocation3 + $0xd40] sm:$0xff] }
  0xcc   : > { %790 = vmatpush.msrb.mxu2 %v348_v61  ;;  %812 = vmatpush.msrb.mxu3 %v416_v62  ;;  %v404_v14 = vld [vmem:[#allocation3 + $0x658] sm:$0xff]  ;;  %v1131_v42 = vld [vmem:[#allocation3 + $0xf60] sm:$0xff] }
  0xcd   : > { %703 = vmatmul.f32.vlgmr.msra.gmra.mxu2 %v2764_v44  ;;  %743 = vmatpush.msrb.mxu0 %v224_v0  ;;  %v212_v15 = vld [vmem:[#allocation3 + $0x58] sm:$0xff]  ;;  %v939_v43 = vld [vmem:[#allocation3 + $0x960] sm:$0xff] }
  0xce   : > { %766 = vmatpush.msrb.mxu1 %v288_v1  ;;  %791 = vmatpush.msrb.mxu2 %v344_v2  ;;  %v276_v16 = vld [vmem:[#allocation3 + $0x258] sm:$0xff]  ;;  %v1003_v45 = vld [vmem:[#allocation3 + $0xb60] sm:$0xff] }
  0xcf   : > { %813 = vmatpush.msrb.mxu3 %v412_v3  ;;  %744 = vmatpush.msrb.mxu0 %v220_v5  ;;  %v332_v17 = vld [vmem:[#allocation3 + $0x418] sm:$0xff]  ;;  %v1059_v46 = vld [vmem:[#allocation3 + $0xd20] sm:$0xff] }
  0xd0   : > { %726 = vmatmul.f32.vlgmr.msra.gmra.mxu3 %v2767_v48  ;;  %767 = vmatpush.msrb.mxu1 %v284_v6  ;;  %v400_v18 = vld [vmem:[#allocation3 + $0x638] sm:$0xff]  ;;  %v1127_v47 = vld [vmem:[#allocation3 + $0xf40] sm:$0xff] }
  0xd1   : > { %792 = vmatpush.msrb.mxu2 %v340_v7  ;;  %814 = vmatpush.msrb.mxu3 %v408_v8  ;;  %v208_v20 = vld [vmem:[#allocation3 + $0x38] sm:$0xff]  ;;  %v935_v49 = vld [vmem:[#allocation3 + $0x940] sm:$0xff] }
  0xd2   : > { %657 = vmatmul.f32.vlgmr.msra.gmra.mxu0 %v2771_v53  ;;  %680 = vmatmul.f32.vlgmr.msra.gmra.mxu1 %v2775_v54  ;;  %v272_v21 = vld [vmem:[#allocation3 + $0x238] sm:$0xff]  ;;  %v999_v50 = vld [vmem:[#allocation3 + $0xb40] sm:$0xff] }
  0xd3   : > { %745 = vmatpush.msrb.mxu0 %v216_v11  ;;  %768 = vmatpush.msrb.mxu1 %v280_v12  ;;  %v396_v22 = vld [vmem:[#allocation3 + $0x618] sm:$0xff]  ;;  %v1055_v51 = vld [vmem:[#allocation3 + $0xd00] sm:$0xff] }
  0xd4   : > { %793 = vmatpush.msrb.mxu2 %v336_v13  ;;  %815 = vmatpush.msrb.mxu3 %v404_v14  ;;  %v204_v25 = vld [vmem:[#allocation3 + $0x18] sm:$0xff]  ;;  %v1123_v52 = vld [vmem:[#allocation3 + $0xf20] sm:$0xff] }
  0xd5   : > { %746 = vmatpush.msrb.mxu0 %v212_v15  ;;  %769 = vmatpush.msrb.mxu1 %v276_v16  ;;  %v268_v26 = vld [vmem:[#allocation3 + $0x218] sm:$0xff]  ;;  %v931_v55 = vld [vmem:[#allocation3 + $0x920] sm:$0xff] }
  0xd6   : > { %794 = vmatpush.msrb.mxu2 %v332_v17  ;;  %816 = vmatpush.msrb.mxu3 %v400_v18  ;;  %v995_v56 = vld [vmem:[#allocation3 + $0xb20] sm:$0xff] }
  0xd7   : > { %706 = vmatmul.f32.gmra.mxu2 %v2780_v63  ;;  %747 = vmatpush.msrb.mxu0 %v208_v20  ;;  %v1051_v57 = vld [vmem:[#allocation3 + $0xce0] sm:$0xff] }
  0xd8   : > { %1197 = vmatpush.msra.mxu2 %v1083_v19  ;;  %770 = vmatpush.msrb.mxu1 %v272_v21  ;;  %v1119_v58 = vld [vmem:[#allocation3 + $0xf00] sm:$0xff] }
  0xd9   : > { %817 = vmatpush.msrb.mxu3 %v396_v22  ;;  %748 = vmatpush.msrb.mxu0 %v204_v25  ;;  %v927_v59 = vld [vmem:[#allocation3 + $0x900] sm:$0xff] }
  0xda   : > { %729 = vmatmul.f32.gmra.mxu3 %v2784_v4  ;;  %1198 = vmatpush.msra.mxu2 %v1079_v23  ;;  %v991_v60 = vld [vmem:[#allocation3 + $0xb00] sm:$0xff] }
  0xdb   : > { %1220 = vmatpush.msra.mxu3 %v1147_v24  ;;  %771 = vmatpush.msrb.mxu1 %v268_v26  ;;  %v1047_v61 = vld [vmem:[#allocation3 + $0xcc0] sm:$0xff] }
  0xdc   : > { %660 = vmatmul.f32.gmra.mxu0 %v2787_v9  ;;  %683 = vmatmul.f32.gmra.mxu1 %v2791_v10  ;;  %v1115_v62 = vld [vmem:[#allocation3 + $0xee0] sm:$0xff] }
  0xdd   : > { %1151 = vmatpush.msra.mxu0 %v955_v27  ;;  %1174 = vmatpush.msra.mxu1 %v1019_v28  ;;  %v923_v0 = vld [vmem:[#allocation3 + $0x8e0] sm:$0xff]  ;;  %v1084_v27 = vld [vmem:[#allocation3 + $0xde8] sm:$0xff] }
  0xde   : > { %1199 = vmatpush.msra.mxu2 %v1075_v29  ;;  %1221 = vmatpush.msra.mxu3 %v1143_v30  ;;  %v987_v1 = vld [vmem:[#allocation3 + $0xae0] sm:$0xff] }
  0xdf   : > { %1152 = vmatpush.msra.mxu0 %v951_v31  ;;  %1175 = vmatpush.msra.mxu1 %v1015_v32  ;;  %v1043_v2 = vld [vmem:[#allocation3 + $0xca0] sm:$0xff]  ;;  %v1080_v31 = vld [vmem:[#allocation3 + $0xdc8] sm:$0xff] }
  0xe0   : > { %1200 = vmatpush.msra.mxu2 %v1071_v33  ;;  %1222 = vmatpush.msra.mxu3 %v1139_v34  ;;  %v1111_v3 = vld [vmem:[#allocation3 + $0xec0] sm:$0xff]  ;;  %v1148_v32 = vld [vmem:[#allocation3 + $0xfe8] sm:$0xff] }
  0xe1   : > { %1153 = vmatpush.msra.mxu0 %v947_v35  ;;  %1176 = vmatpush.msra.mxu1 %v1011_v36  ;;  %v919_v5 = vld [vmem:[#allocation3 + $0x8c0] sm:$0xff]  ;;  %v956_v35 = vld [vmem:[#allocation3 + $0x9e8] sm:$0xff] }
  0xe2   : > { %1201 = vmatpush.msra.mxu2 %v1067_v37  ;;  %1223 = vmatpush.msra.mxu3 %v1135_v38  ;;  %v983_v6 = vld [vmem:[#allocation3 + $0xac0] sm:$0xff]  ;;  %v1020_v36 = vld [vmem:[#allocation3 + $0xbe8] sm:$0xff] }
  0xe3   : > { %1154 = vmatpush.msra.mxu0 %v943_v39  ;;  %1177 = vmatpush.msra.mxu1 %v1007_v40  ;;  %v1039_v7 = vld [vmem:[#allocation3 + $0xc80] sm:$0xff]  ;;  %v1076_v37 = vld [vmem:[#allocation3 + $0xda8] sm:$0xff] }
  0xe4   : > { %1202 = vmatpush.msra.mxu2 %v1063_v41  ;;  %1224 = vmatpush.msra.mxu3 %v1131_v42  ;;  %v1107_v8 = vld [vmem:[#allocation3 + $0xea0] sm:$0xff]  ;;  %v952_v38 = vld [vmem:[#allocation3 + $0x9c8] sm:$0xff]  ;;  %v2630_v41 = vmov 0.0  }
  0xe5   : > { %1155 = vmatpush.msra.mxu0 %v939_v43  ;;  %1178 = vmatpush.msra.mxu1 %v1003_v45  ;;  %v915_v11 = vld [vmem:[#allocation3 + $0x8a0] sm:$0xff]  ;;  %v1016_v39 = vld [vmem:[#allocation3 + $0xbc8] sm:$0xff]  ;;  %181 = vst [vmem:[#allocation2 + $0x30] sm:$0xff] %v2630_v41 }
  0xe6   : > { %1203 = vmatpush.msra.mxu2 %v1059_v46  ;;  %1225 = vmatpush.msra.mxu3 %v1127_v47  ;;  %v979_v12 = vld [vmem:[#allocation3 + $0xaa0] sm:$0xff]  ;;  %v1072_v40 = vld [vmem:[#allocation3 + $0xd88] sm:$0xff]  ;;  %182 = vst [vmem:[#allocation2] sm:$0xff] %v2630_v41 }
  0xe7   : > { %1156 = vmatpush.msra.mxu0 %v935_v49  ;;  %1179 = vmatpush.msra.mxu1 %v999_v50  ;;  %v1035_v13 = vld [vmem:[#allocation3 + $0xc60] sm:$0xff]  ;;  %v948_v42 = vld [vmem:[#allocation3 + $0x9a8] sm:$0xff]  ;;  %183 = vst [vmem:[#allocation2 + $0x58] sm:$0xff] %v2630_v41 }
  0xe8   : > { %1204 = vmatpush.msra.mxu2 %v1055_v51  ;;  %1226 = vmatpush.msra.mxu3 %v1123_v52  ;;  %v1103_v14 = vld [vmem:[#allocation3 + $0xe80] sm:$0xff]  ;;  %v1012_v43 = vld [vmem:[#allocation3 + $0xba8] sm:$0xff]  ;;  %184 = vst [vmem:[#allocation2 + $0x18] sm:$0xff] %v2630_v41 }
  0xe9   : > { %795 = vmatmul.f32.vlgmr.msrb.gmra.mxu2 %v2764_v44  ;;  %1157 = vmatpush.msra.mxu0 %v931_v55  ;;  %v911_v15 = vld [vmem:[#allocation3 + $0x880] sm:$0xff]  ;;  %v1136_v45 = vld [vmem:[#allocation3 + $0xf88] sm:$0xff]  ;;  %189 = vst [vmem:[#allocation2 + $0x28] sm:$0x3] %v2630_v41 }
  0xea   : > { %1180 = vmatpush.msra.mxu1 %v995_v56  ;;  %1205 = vmatpush.msra.mxu2 %v1051_v57  ;;  %v975_v16 = vld [vmem:[#allocation3 + $0xa80] sm:$0xff]  ;;  %v1008_v47 = vld [vmem:[#allocation3 + $0xb88] sm:$0xff]  ;;  %190 = vst [vmem:[#allocation2 + $0x48] sm:$0x3] %v2630_v41 }
  0xeb   : > { %1227 = vmatpush.msra.mxu3 %v1119_v58  ;;  %1158 = vmatpush.msra.mxu0 %v927_v59  ;;  %v1031_v17 = vld [vmem:[#allocation3 + $0xc40] sm:$0xff]  ;;  %v1064_v49 = vld [vmem:[#allocation3 + $0xd48] sm:$0xff]  ;;  %191 = vst [vmem:[#allocation2 + $0x10] sm:$0x3] %v2630_v41 }
  0xec   : > { %818 = vmatmul.f32.vlgmr.msrb.gmra.mxu3 %v2767_v48  ;;  %1181 = vmatpush.msra.mxu1 %v991_v60  ;;  %v1099_v18 = vld [vmem:[#allocation3 + $0xe60] sm:$0xff]  ;;  %v1132_v51 = vld [vmem:[#allocation3 + $0xf68] sm:$0xff]  ;;  %192 = vst [vmem:[#allocation2 + $0x40] sm:$0x3] %v2630_v41 }
  0xed   : > { %1206 = vmatpush.msra.mxu2 %v1047_v61  ;;  %1228 = vmatpush.msra.mxu3 %v1115_v62  ;;  %v907_v19 = vld [vmem:[#allocation3 + $0x860] sm:$0xff]  ;;  %v940_v56 = vld [vmem:[#allocation3 + $0x968] sm:$0xff] }
  0xee   : > { %749 = vmatmul.f32.vlgmr.msrb.gmra.mxu0 %v2771_v53  ;;  %772 = vmatmul.f32.vlgmr.msrb.gmra.mxu1 %v2775_v54  ;;  %v971_v20 = vld [vmem:[#allocation3 + $0xa60] sm:$0xff]  ;;  %v1060_v57 = vld [vmem:[#allocation3 + $0xd28] sm:$0xff] }
  0xef   : > { %1159 = vmatpush.msra.mxu0 %v923_v0  ;;  %1182 = vmatpush.msra.mxu1 %v987_v1  ;;  %v1027_v21 = vld [vmem:[#allocation3 + $0xc20] sm:$0xff]  ;;  %v1128_v60 = vld [vmem:[#allocation3 + $0xf48] sm:$0xff] }
  0xf0   : > { %1207 = vmatpush.msra.mxu2 %v1043_v2  ;;  %1229 = vmatpush.msra.mxu3 %v1111_v3  ;;  %v1095_v22 = vld [vmem:[#allocation3 + $0xe40] sm:$0xff]  ;;  %v936_v61 = vld [vmem:[#allocation3 + $0x948] sm:$0xff]  ;;  %v825_v3 = vld [vmem:[#allocation2 + $0x30] sm:$0xfc] }
  0xf1   : > { %1160 = vmatpush.msra.mxu0 %v919_v5  ;;  %1183 = vmatpush.msra.mxu1 %v983_v6  ;;  %v903_v23 = vld [vmem:[#allocation3 + $0x840] sm:$0xff]  ;;  %v520_v55 = vpop.f32.mrf.mxu2  ;;  %v1000_v62 = vld [vmem:[#allocation3 + $0xb48] sm:$0xff] }
  0xf2   : > { %1208 = vmatpush.msra.mxu2 %v1039_v7  ;;  %1230 = vmatpush.msra.mxu3 %v1107_v8  ;;  %v967_v24 = vld [vmem:[#allocation3 + $0xa40] sm:$0xff]  ;;  %v1056_v0 = vld [vmem:[#allocation3 + $0xd08] sm:$0xff] }
  0xf3   : > { %798 = vmatmul.f32.gmra.mxu2 %v2780_v63  ;;  %1161 = vmatpush.msra.mxu0 %v915_v11  ;;  %v1023_v25 = vld [vmem:[#allocation3 + $0xc00] sm:$0xff]  ;;  %v1124_v1 = vld [vmem:[#allocation3 + $0xf28] sm:$0xff] }
  0xf4   : > { %1184 = vmatpush.msra.mxu1 %v979_v12  ;;  %1209 = vmatpush.msra.mxu2 %v1035_v13  ;;  %v1091_v26 = vld [vmem:[#allocation3 + $0xe20] sm:$0xff]  ;;  %v932_v2 = vld [vmem:[#allocation3 + $0x928] sm:$0xff] }
  0xf5   : > { %1231 = vmatpush.msra.mxu3 %v1103_v14  ;;  %1162 = vmatpush.msra.mxu0 %v911_v15  ;;  %v899_v28 = vld [vmem:[#allocation3 + $0x820] sm:$0xff]  ;;  %v996_v5 = vld [vmem:[#allocation3 + $0xb28] sm:$0xff] }
  0xf6   : > { %821 = vmatmul.f32.gmra.mxu3 %v2784_v4  ;;  %1185 = vmatpush.msra.mxu1 %v975_v16  ;;  %v963_v29 = vld [vmem:[#allocation3 + $0xa20] sm:$0xff]  ;;  %v1052_v6 = vld [vmem:[#allocation3 + $0xce8] sm:$0xff] }
  0xf7   : > { %1210 = vmatpush.msra.mxu2 %v1031_v17  ;;  %1232 = vmatpush.msra.mxu3 %v1099_v18  ;;  %v1087_v30 = vld [vmem:[#allocation3 + $0xe00] sm:$0xff]  ;;  %v1120_v7 = vld [vmem:[#allocation3 + $0xf08] sm:$0xff] }
  0xf8   : > { %752 = vmatmul.f32.gmra.mxu0 %v2787_v9  ;;  %775 = vmatmul.f32.gmra.mxu1 %v2791_v10  ;;  %v895_v33 = vld [vmem:[#allocation3 + $0x800] sm:$0xff]  ;;  %v992_v8 = vld [vmem:[#allocation3 + $0xb08] sm:$0xff] }
  0xf9   : > { %1163 = vmatpush.msra.mxu0 %v907_v19  ;;  %1186 = vmatpush.msra.mxu1 %v971_v20  ;;  %v959_v34 = vld [vmem:[#allocation3 + $0xa00] sm:$0xff]  ;;  %v1048_v11 = vld [vmem:[#allocation3 + $0xcc8] sm:$0xff] }
  0xfa   : > { %1211 = vmatpush.msra.mxu2 %v1027_v21  ;;  %1233 = vmatpush.msra.mxu3 %v1095_v22  ;;  %v1116_v14 = vld [vmem:[#allocation3 + $0xee8] sm:$0xff] }
  0xfb   : > { %1164 = vmatpush.msra.mxu0 %v903_v23  ;;  %1187 = vmatpush.msra.mxu1 %v967_v24  ;;  %v924_v15 = vld [vmem:[#allocation3 + $0x8e8] sm:$0xff] }
  0xfc   : > { %1212 = vmatpush.msra.mxu2 %v1023_v25  ;;  %1234 = vmatpush.msra.mxu3 %v1091_v26  ;;  %v988_v18 = vld [vmem:[#allocation3 + $0xae8] sm:$0xff] }
  0xfd   : > { %1213 = vmatmul.f32.vlgmr.msra.gmra.mxu2 %v2764_v44  ;;  %1165 = vmatpush.msra.mxu0 %v899_v28  ;;  %v1144_v44 = vld [vmem:[#allocation3 + $0xfc8] sm:$0xff] }
  0xfe   : > { %1289 = vmatpush.msrb.mxu2 %v1084_v27  ;;  %1188 = vmatpush.msra.mxu1 %v963_v29  ;;  %v1044_v19 = vld [vmem:[#allocation3 + $0xca8] sm:$0xff] }
  0xff   : > { %1235 = vmatpush.msra.mxu3 %v1087_v30  ;;  %1166 = vmatpush.msra.mxu0 %v895_v33  ;;  %v1112_v21 = vld [vmem:[#allocation3 + $0xec8] sm:$0xff] }
 0x100   : > { %1236 = vmatmul.f32.vlgmr.msra.gmra.mxu3 %v2767_v48  ;;  %1290 = vmatpush.msrb.mxu2 %v1080_v31  ;;  %v1140_v48 = vld [vmem:[#allocation3 + $0xfa8] sm:$0xff] }
 0x101   : > { %1312 = vmatpush.msrb.mxu3 %v1148_v32  ;;  %1189 = vmatpush.msra.mxu1 %v959_v34  ;;  %v920_v22 = vld [vmem:[#allocation3 + $0x8c8] sm:$0xff] }
 0x102   : > { %1167 = vmatmul.f32.vlgmr.msra.gmra.mxu0 %v2771_v53  ;;  %1190 = vmatmul.f32.vlgmr.msra.gmra.mxu1 %v2775_v54  ;;  %v1068_v53 = vld [vmem:[#allocation3 + $0xd68] sm:$0xff] }
 0x103   : > { %1243 = vmatpush.msrb.mxu0 %v956_v35  ;;  %1266 = vmatpush.msrb.mxu1 %v1020_v36  ;;  %v944_v54 = vld [vmem:[#allocation3 + $0x988] sm:$0xff] }
 0x104   : > { %1291 = vmatpush.msrb.mxu2 %v1076_v37  ;;  %1313 = vmatpush.msrb.mxu3 %v1144_v44  ;;  %v984_v23 = vld [vmem:[#allocation3 + $0xac8] sm:$0xff] }
 0x105   : > { %1244 = vmatpush.msrb.mxu0 %v952_v38  ;;  %1267 = vmatpush.msrb.mxu1 %v1016_v39  ;;  %v1040_v24 = vld [vmem:[#allocation3 + $0xc88] sm:$0xff] }
 0x106   : > { %1292 = vmatpush.msrb.mxu2 %v1072_v40  ;;  %1314 = vmatpush.msrb.mxu3 %v1140_v48  ;;  %v1108_v27 = vld [vmem:[#allocation3 + $0xea8] sm:$0xff] }
 0x107   : > { %1216 = vmatmul.f32.gmra.mxu2 %v2780_v63  ;;  %v474_v46 = vpop.f32.mrf.mxu0  ;;  %1245 = vmatpush.msrb.mxu0 %v948_v42  ;;  %v497_v50 = vpop.f32.mrf.mxu1  ;;  %v1004_v63 = vld [vmem:[#allocation3 + $0xb68] sm:$0xff] }
 0x108   : > { %1268 = vmatpush.msrb.mxu1 %v1012_v43  ;;  %1293 = vmatpush.msrb.mxu2 %v1068_v53  ;;  %v498_v52 = vadd.f32 %v497_v50, %v474_v46  ;;  %v916_v28 = vld [vmem:[#allocation3 + $0x8a8] sm:$0xff]  ;;  %v1085_v46 = vld [vmem:[#allocation3 + $0xdf0] sm:$0xff] }
 0x109   : > { %1315 = vmatpush.msrb.mxu3 %v1136_v45  ;;  %1246 = vmatpush.msrb.mxu0 %v944_v54  ;;  %v980_v29 = vld [vmem:[#allocation3 + $0xaa8] sm:$0xff] }
 0x10a   : > { %1239 = vmatmul.f32.gmra.mxu3 %v2784_v4  ;;  %1269 = vmatpush.msrb.mxu1 %v1008_v47  ;;  %v521_v58 = vadd.f32 %v520_v55, %v498_v52  ;;  %v543_v59 = vpop.f32.mrf.mxu3  ;;  %v1036_v30 = vld [vmem:[#allocation3 + $0xc68] sm:$0xff]  ;;  %v1081_v52 = vld [vmem:[#allocation3 + $0xdd0] sm:$0xff] }
 0x10b   : > { %1294 = vmatpush.msrb.mxu2 %v1064_v49  ;;  %1316 = vmatpush.msrb.mxu3 %v1132_v51  ;;  %v1104_v32 = vld [vmem:[#allocation3 + $0xe88] sm:$0xff]  ;;  %v2832_v51 = vld [vmem:[%s2757_s24 + $0x10] sm:$0xff] }
 0x10c   : > { %1170 = vmatmul.f32.gmra.mxu0 %v2787_v9  ;;  %1193 = vmatmul.f32.gmra.mxu1 %v2791_v10  ;;  %v2827_v4 = vadd.f32 %v543_v59, %v521_v58  ;;  %v928_v10 = vld [vmem:[#allocation3 + $0x908] sm:$0xff]  ;;  %v1149_v55 = vld [vmem:[#allocation3 + $0xff0] sm:$0xff] }
 0x10d   : > { %1247 = vmatpush.msrb.mxu0 %v940_v56  ;;  %1270 = vmatpush.msrb.mxu1 %v1004_v63  ;;  %v912_v33 = vld [vmem:[#allocation3 + $0x888] sm:$0xff]  ;;  %v957_v58 = vld [vmem:[#allocation3 + $0x9f0] sm:$0xff] }
 0x10e   : > { %1295 = vmatpush.msrb.mxu2 %v1060_v57  ;;  %1317 = vmatpush.msrb.mxu3 %v1128_v60  ;;  %v846_v9 = vrot.slane %v2827_v4, 6  ;;  %v833_v34 = vld [vmem:[#allocation2 + $0x28] sm:$0x3]  ;;  %v2836_v57 = vld [vmem:[%s2757_s24 + $0x18] sm:$0xff]  ;;  %v1021_v59 = vld [vmem:[#allocation3 + $0xbf0] sm:$0xff] }
 0x10f   : > { %1248 = vmatpush.msrb.mxu0 %v936_v61  ;;  %1271 = vmatpush.msrb.mxu1 %v1000_v62  ;;  %v976_v35 = vld [vmem:[#allocation3 + $0xa88] sm:$0xff]  ;;  %v1077_v60 = vld [vmem:[#allocation3 + $0xdb0] sm:$0xff]  ;;  %v2840_v61 = vld [vmem:[%s2757_s24] sm:$0xff] }
 0x110   : > { %1296 = vmatpush.msrb.mxu2 %v1056_v0  ;;  %1318 = vmatpush.msrb.mxu3 %v1124_v1  ;;  %v870_v12 = vadd.f32 %v846_v9, %v825_v3  ;;  %v1032_v36 = vld [vmem:[#allocation3 + $0xc48] sm:$0xff]  ;;  %v1145_v62 = vld [vmem:[#allocation3 + $0xfd0] sm:$0xff] }
 0x111   : > { %1249 = vmatpush.msrb.mxu0 %v932_v2  ;;  %v477_v13 = vpop.f32.mrf.mxu0  ;;  %1272 = vmatpush.msrb.mxu1 %v996_v5  ;;  %v500_v16 = vpop.f32.mrf.mxu1  ;;  %v1100_v44 = vld [vmem:[#allocation3 + $0xe68] sm:$0xff]  ;;  %v953_v0 = vld [vmem:[#allocation3 + $0x9d0] sm:$0xff] }
 0x112   : > { %1297 = vmatpush.msrb.mxu2 %v1052_v6  ;;  %v523_v17 = vpop.f32.mrf.mxu2  ;;  %1319 = vmatpush.msrb.mxu3 %v1120_v7  ;;  %882 = vst [vmem:[#allocation2 + $0x30] sm:$0xfc] %v870_v12  ;;  %v501_v20 = vadd.f32 %v500_v16, %v477_v13  ;;  %v908_v38 = vld [vmem:[#allocation3 + $0x868] sm:$0xff]  ;;  %v1017_v1 = vld [vmem:[#allocation3 + $0xbd0] sm:$0xff] }
 0x113   : > { %1250 = vmatpush.msrb.mxu0 %v928_v10  ;;  %1273 = vmatpush.msrb.mxu1 %v992_v8  ;;  %v972_v39 = vld [vmem:[#allocation3 + $0xa68] sm:$0xff]  ;;  %v1073_v2 = vld [vmem:[#allocation3 + $0xd90] sm:$0xff] }
 0x114   : > { %1298 = vmatpush.msrb.mxu2 %v1048_v11  ;;  %1320 = vmatpush.msrb.mxu3 %v1116_v14  ;;  %v524_v25 = vadd.f32 %v523_v17, %v501_v20  ;;  %v1028_v40 = vld [vmem:[#allocation3 + $0xc28] sm:$0xff]  ;;  %v1141_v3 = vld [vmem:[#allocation3 + $0xfb0] sm:$0xff] }
 0x115   : > { %1251 = vmatpush.msrb.mxu0 %v924_v15  ;;  %v546_v26 = vpop.f32.mrf.mxu3  ;;  %1274 = vmatpush.msrb.mxu1 %v988_v18  ;;  %v1096_v42 = vld [vmem:[#allocation3 + $0xe48] sm:$0xff]  ;;  %v949_v5 = vld [vmem:[#allocation3 + $0x9b0] sm:$0xff]  ;;  %v2852_v18 = vld [vmem:[%s2757_s24 + $0x38] sm:$0xff] }
 0x116   : > { %1299 = vmatpush.msrb.mxu2 %v1044_v19  ;;  %1321 = vmatpush.msrb.mxu3 %v1112_v21  ;;  %v547_v31 = vadd.f32 %v546_v26, %v524_v25  ;;  %v904_v43 = vld [vmem:[#allocation3 + $0x848] sm:$0xff]  ;;  %v1013_v6 = vld [vmem:[#allocation3 + $0xbb0] sm:$0xff] }
 0x117   : > { %1252 = vmatpush.msrb.mxu0 %v920_v22  ;;  %1275 = vmatpush.msrb.mxu1 %v984_v23  ;;  %v968_v53 = vld [vmem:[#allocation3 + $0xa48] sm:$0xff]  ;;  %v1137_v7 = vld [vmem:[#allocation3 + $0xf90] sm:$0xff] }
 0x118   : > { %1300 = vmatpush.msrb.mxu2 %v1040_v24  ;;  %1322 = vmatpush.msrb.mxu3 %v1108_v27  ;;  %v850_v37 = vrot.slane %v547_v31, 6  ;;  %v1024_v45 = vld [vmem:[#allocation3 + $0xc08] sm:$0xff]  ;;  %v2848_v10 = vld [vmem:[%s2757_s24 + $0x30] sm:$0xff]  ;;  %v2856_v24 = vld [vmem:[%s2757_s24 + $0x20] sm:$0xff] }
 0x119   : > { %1253 = vmatpush.msrb.mxu0 %v916_v28  ;;  %1276 = vmatpush.msrb.mxu1 %v980_v29  ;;  %v1092_v54 = vld [vmem:[#allocation3 + $0xe28] sm:$0xff]  ;;  %v945_v8 = vld [vmem:[#allocation3 + $0x990] sm:$0xff] }
 0x11a   : > { %1301 = vmatpush.msrb.mxu2 %v1036_v30  ;;  %1323 = vmatpush.msrb.mxu3 %v1104_v32  ;;  %v851_v41 = vsel %vm845_vm0, %v846_v9, %v850_v37  ;;  %v878_v48 = vadd.f32 %v850_v37, %v833_v34  ;;  %v900_v47 = vld [vmem:[#allocation3 + $0x828] sm:$0xff]  ;;  %v1069_v9 = vld [vmem:[#allocation3 + $0xd70] sm:$0xff] }
 0x11b   : > { %1254 = vmatpush.msrb.mxu0 %v912_v33  ;;  %1277 = vmatpush.msrb.mxu1 %v976_v35  ;;  %886 = vst [vmem:[#allocation2 + $0x50] sm:$0xff] %v851_v41  ;;  %v964_v49 = vld [vmem:[#allocation3 + $0xa28] sm:$0xff]  ;;  %v1009_v12 = vld [vmem:[#allocation3 + $0xb90] sm:$0xff]  ;;  %v826_v33 = vld [vmem:[#allocation2] sm:$0xfc] }
 0x11c   : > { %1302 = vmatpush.msrb.mxu2 %v1032_v36  ;;  %1324 = vmatpush.msrb.mxu3 %v1100_v44  ;;  %890 = vst [vmem:[#allocation2 + $0x28] sm:$0x3] %v878_v48  ;;  %v1088_v50 = vld [vmem:[#allocation3 + $0xe08] sm:$0xff]  ;;  %v1065_v13 = vld [vmem:[#allocation3 + $0xd50] sm:$0xff] }
 0x11d   : > { %1255 = vmatpush.msrb.mxu0 %v908_v38  ;;  %1278 = vmatpush.msrb.mxu1 %v972_v39  ;;  %v896_v56 = vld [vmem:[#allocation3 + $0x808] sm:$0xff]  ;;  %v1133_v16 = vld [vmem:[#allocation3 + $0xf70] sm:$0xff] }
 0x11e   : > { %1303 = vmatpush.msrb.mxu2 %v1028_v40  ;;  %1325 = vmatpush.msrb.mxu3 %v1096_v42  ;;  %v960_v63 = vld [vmem:[#allocation3 + $0xa08] sm:$0xff]  ;;  %v941_v19 = vld [vmem:[#allocation3 + $0x970] sm:$0xff] }
 0x11f   : > { %1256 = vmatpush.msrb.mxu0 %v904_v43  ;;  %1279 = vmatpush.msrb.mxu1 %v968_v53  ;;  %v2844_v4 = vld [vmem:[%s2757_s24 + $0x8] sm:$0xff]  ;;  %v1005_v20 = vld [vmem:[#allocation3 + $0xb70] sm:$0xff] }
 0x120   : > { %1304 = vmatpush.msrb.mxu2 %v1024_v45  ;;  %1326 = vmatpush.msrb.mxu3 %v1092_v54  ;;  %v1061_v21 = vld [vmem:[#allocation3 + $0xd30] sm:$0xff]  ;;  %v2860_v27 = vld [vmem:[%s2757_s24 + $0x28] sm:$0xff] }
 0x121   : > { %1305 = vmatmul.f32.vlgmr.msrb.gmra.mxu2 %v2832_v51  ;;  %1257 = vmatpush.msrb.mxu0 %v900_v47  ;;  %v1129_v25 = vld [vmem:[#allocation3 + $0xf50] sm:$0xff] }
 0x122   : > { %1381 = vmatpush.msra.mxu2 %v1085_v46  ;;  %1280 = vmatpush.msrb.mxu1 %v964_v49  ;;  %v937_v26 = vld [vmem:[#allocation3 + $0x950] sm:$0xff] }
 0x123   : > { %1327 = vmatpush.msrb.mxu3 %v1088_v50  ;;  %1258 = vmatpush.msrb.mxu0 %v896_v56  ;;  %v1001_v28 = vld [vmem:[#allocation3 + $0xb50] sm:$0xff] }
 0x124   : > { %1328 = vmatmul.f32.vlgmr.msrb.gmra.mxu3 %v2836_v57  ;;  %1382 = vmatpush.msra.mxu2 %v1081_v52  ;;  %v1057_v29 = vld [vmem:[#allocation3 + $0xd10] sm:$0xff] }
 0x125   : > { %1404 = vmatpush.msra.mxu3 %v1149_v55  ;;  %1281 = vmatpush.msrb.mxu1 %v960_v63  ;;  %v1125_v31 = vld [vmem:[#allocation3 + $0xf30] sm:$0xff] }
 0x126   : > { %1259 = vmatmul.f32.vlgmr.msrb.gmra.mxu0 %v2840_v61  ;;  %1282 = vmatmul.f32.vlgmr.msrb.gmra.mxu1 %v2844_v4  ;;  %v933_v32 = vld [vmem:[#allocation3 + $0x930] sm:$0xff] }
 0x127   : > { %1335 = vmatpush.msra.mxu0 %v957_v58  ;;  %1358 = vmatpush.msra.mxu1 %v1021_v59  ;;  %v997_v34 = vld [vmem:[#allocation3 + $0xb30] sm:$0xff] }
 0x128   : > { %1383 = vmatpush.msra.mxu2 %v1077_v60  ;;  %1405 = vmatpush.msra.mxu3 %v1145_v62  ;;  %v1053_v35 = vld [vmem:[#allocation3 + $0xcf0] sm:$0xff] }
 0x129   : > { %1336 = vmatpush.msra.mxu0 %v953_v0  ;;  %1359 = vmatpush.msra.mxu1 %v1017_v1  ;;  %v1121_v37 = vld [vmem:[#allocation3 + $0xf10] sm:$0xff] }
 0x12a   : > { %1384 = vmatpush.msra.mxu2 %v1073_v2  ;;  %1406 = vmatpush.msra.mxu3 %v1141_v3  ;;  %v929_v44 = vld [vmem:[#allocation3 + $0x910] sm:$0xff]  ;;  %v834_v2 = vld [vmem:[#allocation2 + $0x48] sm:$0x3] }
 0x12b   : > { %1308 = vmatmul.f32.gmra.mxu2 %v2848_v10  ;;  %v566_v11 = vpop.f32.mrf.mxu0  ;;  %1337 = vmatpush.msra.mxu0 %v949_v5  ;;  %v589_v14 = vpop.f32.mrf.mxu1  ;;  %v993_v38 = vld [vmem:[#allocation3 + $0xb10] sm:$0xff] }
 0x12c   : > { %1360 = vmatpush.msra.mxu1 %v1013_v6  ;;  %v612_v15 = vpop.f32.mrf.mxu2  ;;  %1385 = vmatpush.msra.mxu2 %v1069_v9  ;;  %v590_v17 = vadd.f32 %v589_v14, %v566_v11  ;;  %v1049_v39 = vld [vmem:[#allocation3 + $0xcd0] sm:$0xff] }
 0x12d   : > { %1407 = vmatpush.msra.mxu3 %v1137_v7  ;;  %1338 = vmatpush.msra.mxu0 %v945_v8  ;;  %v1117_v48 = vld [vmem:[#allocation3 + $0xef0] sm:$0xff] }
 0x12e   : > { %1331 = vmatmul.f32.gmra.mxu3 %v2852_v18  ;;  %1361 = vmatpush.msra.mxu1 %v1009_v12  ;;  %v613_v22 = vadd.f32 %v612_v15, %v590_v17  ;;  %v925_v42 = vld [vmem:[#allocation3 + $0x8f0] sm:$0xff] }
 0x12f   : > { %1386 = vmatpush.msra.mxu2 %v1065_v13  ;;  %v635_v23 = vpop.f32.mrf.mxu3  ;;  %1408 = vmatpush.msra.mxu3 %v1133_v16  ;;  %v989_v45 = vld [vmem:[#allocation3 + $0xaf0] sm:$0xff] }
 0x130   : > { %1262 = vmatmul.f32.gmra.mxu0 %v2856_v24  ;;  %1285 = vmatmul.f32.gmra.mxu1 %v2860_v27  ;;  %v2863_v30 = vadd.f32 %v635_v23, %v613_v22  ;;  %v1045_v54 = vld [vmem:[#allocation3 + $0xcb0] sm:$0xff] }
 0x131   : > { %1339 = vmatpush.msra.mxu0 %v941_v19  ;;  %1362 = vmatpush.msra.mxu1 %v1005_v20  ;;  %v1113_v47 = vld [vmem:[#allocation3 + $0xed0] sm:$0xff]  ;;  %v1086_v20 = vld [vmem:[#allocation3 + $0xdf8] sm:$0xff] }
 0x132   : > { %1387 = vmatpush.msra.mxu2 %v1061_v21  ;;  %1409 = vmatpush.msra.mxu3 %v1129_v25  ;;  %v847_v36 = vrot.slane %v2863_v30, 6  ;;  %v921_v49 = vld [vmem:[#allocation3 + $0x8d0] sm:$0xff]  ;;  %v1082_v25 = vld [vmem:[#allocation3 + $0xdd8] sm:$0xff] }
 0x133   : > { %1340 = vmatpush.msra.mxu0 %v937_v26  ;;  %1363 = vmatpush.msra.mxu1 %v1001_v28  ;;  %v985_v50 = vld [vmem:[#allocation3 + $0xad0] sm:$0xff]  ;;  %v1150_v26 = vld [vmem:[#allocation3 + $0xff8] sm:$0xff] }
 0x134   : > { %1388 = vmatpush.msra.mxu2 %v1057_v29  ;;  %1410 = vmatpush.msra.mxu3 %v1125_v31  ;;  %v871_v40 = vadd.f32 %v847_v36, %v826_v33  ;;  %v1041_v52 = vld [vmem:[#allocation3 + $0xc90] sm:$0xff]  ;;  %v958_v30 = vld [vmem:[#allocation3 + $0x9f8] sm:$0xff] }
 0x135   : > { %1341 = vmatpush.msra.mxu0 %v933_v32  ;;  %v569_v41 = vpop.f32.mrf.mxu0  ;;  %1364 = vmatpush.msra.mxu1 %v997_v34  ;;  %v592_v43 = vpop.f32.mrf.mxu1  ;;  %v1109_v63 = vld [vmem:[#allocation3 + $0xeb0] sm:$0xff]  ;;  %v1022_v31 = vld [vmem:[#allocation3 + $0xbf8] sm:$0xff] }
 0x136   : > { %1389 = vmatpush.msra.mxu2 %v1053_v35  ;;  %v615_v53 = vpop.f32.mrf.mxu2  ;;  %1411 = vmatpush.msra.mxu3 %v1121_v37  ;;  %883 = vst [vmem:[#allocation2] sm:$0xfc] %v871_v40  ;;  %v593_v46 = vadd.f32 %v592_v43, %v569_v41  ;;  %v917_v58 = vld [vmem:[#allocation3 + $0x8b0] sm:$0xff]  ;;  %v1078_v32 = vld [vmem:[#allocation3 + $0xdb8] sm:$0xff] }
 0x137   : > { %1342 = vmatpush.msra.mxu0 %v929_v44  ;;  %1365 = vmatpush.msra.mxu1 %v993_v38  ;;  %v981_v59 = vld [vmem:[#allocation3 + $0xab0] sm:$0xff]  ;;  %v1146_v33 = vld [vmem:[#allocation3 + $0xfd8] sm:$0xff] }
 0x138   : > { %1390 = vmatpush.msra.mxu2 %v1049_v39  ;;  %1412 = vmatpush.msra.mxu3 %v1117_v48  ;;  %v616_v55 = vadd.f32 %v615_v53, %v593_v46  ;;  %v1037_v60 = vld [vmem:[#allocation3 + $0xc70] sm:$0xff]  ;;  %v954_v34 = vld [vmem:[#allocation3 + $0x9d8] sm:$0xff] }
 0x139   : > { %1343 = vmatpush.msra.mxu0 %v925_v42  ;;  %v638_v56 = vpop.f32.mrf.mxu3  ;;  %1366 = vmatpush.msra.mxu1 %v989_v45  ;;  %v1105_v0 = vld [vmem:[#allocation3 + $0xe90] sm:$0xff]  ;;  %v1018_v35 = vld [vmem:[#allocation3 + $0xbd8] sm:$0xff] }
 0x13a   : > { %1391 = vmatpush.msra.mxu2 %v1045_v54  ;;  %1413 = vmatpush.msra.mxu3 %v1113_v47  ;;  %v639_v62 = vadd.f32 %v638_v56, %v616_v55  ;;  %v913_v1 = vld [vmem:[#allocation3 + $0x890] sm:$0xff]  ;;  %v1142_v37 = vld [vmem:[#allocation3 + $0xfb8] sm:$0xff] }
 0x13b   : > { %1344 = vmatpush.msra.mxu0 %v921_v49  ;;  %1367 = vmatpush.msra.mxu1 %v985_v50  ;;  %v977_v3 = vld [vmem:[#allocation3 + $0xa90] sm:$0xff]  ;;  %v950_v44 = vld [vmem:[#allocation3 + $0x9b8] sm:$0xff] }
 0x13c   : > { %1392 = vmatpush.msra.mxu2 %v1041_v52  ;;  %1414 = vmatpush.msra.mxu3 %v1109_v63  ;;  %v1033_v5 = vld [vmem:[#allocation3 + $0xc50] sm:$0xff]  ;;  %v852_v6 = vrot.slane %v639_v62, 6  ;;  %v1014_v38 = vld [vmem:[#allocation3 + $0xbb8] sm:$0xff] }
 0x13d   : > { %1345 = vmatpush.msra.mxu0 %v917_v58  ;;  %1368 = vmatpush.msra.mxu1 %v981_v59  ;;  %v1101_v9 = vld [vmem:[#allocation3 + $0xe70] sm:$0xff]  ;;  %v1070_v39 = vld [vmem:[#allocation3 + $0xd78] sm:$0xff] }
 0x13e   : > { %1393 = vmatpush.msra.mxu2 %v1037_v60  ;;  %v909_v7 = vld [vmem:[#allocation3 + $0x870] sm:$0xff]  ;;  %1415 = vmatpush.msra.mxu3 %v1105_v0  ;;  %v853_v12 = vsel %vm845_vm0, %v847_v36, %v852_v6  ;;  %v879_v13 = vadd.f32 %v852_v6, %v834_v2  ;;  %v1074_v36 = vld [vmem:[#allocation3 + $0xd98] sm:$0xff] }
 0x13f   : > { %1346 = vmatpush.msra.mxu0 %v913_v1  ;;  %v973_v8 = vld [vmem:[#allocation3 + $0xa70] sm:$0xff]  ;;  %1369 = vmatpush.msra.mxu1 %v977_v3  ;;  %887 = vst [vmem:[#allocation2 + $0x20] sm:$0xff] %v853_v12  ;;  %v1138_v40 = vld [vmem:[#allocation3 + $0xf98] sm:$0xff] }
 0x140   : > { %v1029_v11 = vld [vmem:[#allocation3 + $0xc30] sm:$0xff]  ;;  %1394 = vmatpush.msra.mxu2 %v1033_v5  ;;  %1416 = vmatpush.msra.mxu3 %v1101_v9  ;;  %891 = vst [vmem:[#allocation2 + $0x48] sm:$0x3] %v879_v13  ;;  %v946_v41 = vld [vmem:[#allocation3 + $0x998] sm:$0xff] }
 0x141   : > { %v1097_v14 = vld [vmem:[#allocation3 + $0xe50] sm:$0xff]  ;;  %1347 = vmatpush.msra.mxu0 %v909_v7  ;;  %1370 = vmatpush.msra.mxu1 %v973_v8  ;;  %v1010_v42 = vld [vmem:[#allocation3 + $0xb98] sm:$0xff] }
 0x142   : > { %v905_v15 = vld [vmem:[#allocation3 + $0x850] sm:$0xff]  ;;  %1395 = vmatpush.msra.mxu2 %v1029_v11  ;;  %1417 = vmatpush.msra.mxu3 %v1097_v14  ;;  %v1066_v43 = vld [vmem:[#allocation3 + $0xd58] sm:$0xff] }
 0x143   : > { %v969_v16 = vld [vmem:[#allocation3 + $0xa50] sm:$0xff]  ;;  %1348 = vmatpush.msra.mxu0 %v905_v15  ;;  %v1134_v54 = vld [vmem:[#allocation3 + $0xf78] sm:$0xff] }
 0x144   : > { %v1025_v17 = vld [vmem:[#allocation3 + $0xc10] sm:$0xff]  ;;  %1371 = vmatpush.msra.mxu1 %v969_v16  ;;  %v942_v47 = vld [vmem:[#allocation3 + $0x978] sm:$0xff] }
 0x145   : > { %v1093_v19 = vld [vmem:[#allocation3 + $0xe30] sm:$0xff]  ;;  %1396 = vmatpush.msra.mxu2 %v1025_v17  ;;  %v1006_v49 = vld [vmem:[#allocation3 + $0xb78] sm:$0xff] }
 0x146   : > { %v901_v21 = vld [vmem:[#allocation3 + $0x830] sm:$0xff]  ;;  %1418 = vmatpush.msra.mxu3 %v1093_v19  ;;  %1397 = vmatmul.f32.vlgmr.msra.gmra.mxu2 %v2832_v51  ;;  %v1062_v50 = vld [vmem:[#allocation3 + $0xd38] sm:$0xff] }
 0x147   : > { %v965_v22 = vld [vmem:[#allocation3 + $0xa30] sm:$0xff]  ;;  %1473 = vmatpush.msrb.mxu2 %v1086_v20  ;;  %1349 = vmatpush.msra.mxu0 %v901_v21  ;;  %v1130_v56 = vld [vmem:[#allocation3 + $0xf58] sm:$0xff] }
 0x148   : > { %v1089_v23 = vld [vmem:[#allocation3 + $0xe10] sm:$0xff]  ;;  %1372 = vmatpush.msra.mxu1 %v965_v22  ;;  %v938_v63 = vld [vmem:[#allocation3 + $0x958] sm:$0xff] }
 0x149   : > { %v897_v28 = vld [vmem:[#allocation3 + $0x810] sm:$0xff]  ;;  %1419 = vmatpush.msra.mxu3 %v1089_v23  ;;  %1474 = vmatpush.msrb.mxu2 %v1082_v25  ;;  %v1002_v58 = vld [vmem:[#allocation3 + $0xb58] sm:$0xff] }
 0x14a   : > { %v961_v29 = vld [vmem:[#allocation3 + $0xa10] sm:$0xff]  ;;  %1420 = vmatmul.f32.vlgmr.msra.gmra.mxu3 %v2836_v57  ;;  %1350 = vmatpush.msra.mxu0 %v897_v28  ;;  %v1058_v59 = vld [vmem:[#allocation3 + $0xd18] sm:$0xff] }
 0x14b   : > { %1496 = vmatpush.msrb.mxu3 %v1150_v26  ;;  %1373 = vmatpush.msra.mxu1 %v961_v29  ;;  %v1126_v62 = vld [vmem:[#allocation3 + $0xf38] sm:$0xff] }
 0x14c   : > { %1351 = vmatmul.f32.vlgmr.msra.gmra.mxu0 %v2840_v61  ;;  %1374 = vmatmul.f32.vlgmr.msra.gmra.mxu1 %v2844_v4  ;;  %v934_v0 = vld [vmem:[#allocation3 + $0x938] sm:$0xff] }
 0x14d   : > { %1427 = vmatpush.msrb.mxu0 %v958_v30  ;;  %1450 = vmatpush.msrb.mxu1 %v1022_v31  ;;  %v827_v1 = vld [vmem:[#allocation2 + $0x58] sm:$0xfc] }
 0x14e   : > { %1475 = vmatpush.msrb.mxu2 %v1078_v32  ;;  %1497 = vmatpush.msrb.mxu3 %v1146_v33  ;;  %v998_v2 = vld [vmem:[#allocation3 + $0xb38] sm:$0xff] }
 0x14f   : > { %1428 = vmatpush.msrb.mxu0 %v954_v34  ;;  %1451 = vmatpush.msrb.mxu1 %v1018_v35  ;;  %v658_v48 = vpop.f32.mrf.mxu0  ;;  %v681_v53 = vpop.f32.mrf.mxu1  ;;  %v1054_v3 = vld [vmem:[#allocation3 + $0xcf8] sm:$0xff] }
 0x150   : > { %1476 = vmatpush.msrb.mxu2 %v1074_v36  ;;  %1498 = vmatpush.msrb.mxu3 %v1142_v37  ;;  %v704_v45 = vpop.f32.mrf.mxu2  ;;  %v682_v46 = vadd.f32 %v681_v53, %v658_v48  ;;  %v1122_v6 = vld [vmem:[#allocation3 + $0xf18] sm:$0xff]  ;;  %v835_v36 = vld [vmem:[#allocation2 + $0x10] sm:$0x3] }
 0x151   : > { %1400 = vmatmul.f32.gmra.mxu2 %v2848_v10  ;;  %1429 = vmatpush.msrb.mxu0 %v950_v44  ;;  %v930_v9 = vld [vmem:[#allocation3 + $0x918] sm:$0xff] }
 0x152   : > { %1452 = vmatpush.msrb.mxu1 %v1014_v38  ;;  %1477 = vmatpush.msrb.mxu2 %v1070_v39  ;;  %v705_v52 = vadd.f32 %v704_v45, %v682_v46  ;;  %v994_v7 = vld [vmem:[#allocation3 + $0xb18] sm:$0xff] }
 0x153   : > { %1499 = vmatpush.msrb.mxu3 %v1138_v40  ;;  %1430 = vmatpush.msrb.mxu0 %v946_v41  ;;  %v727_v55 = vpop.f32.mrf.mxu3  ;;  %v1050_v8 = vld [vmem:[#allocation3 + $0xcd8] sm:$0xff] }
 0x154   : > { %1423 = vmatmul.f32.gmra.mxu3 %v2852_v18  ;;  %1453 = vmatpush.msrb.mxu1 %v1010_v42  ;;  %v2875_v60 = vadd.f32 %v727_v55, %v705_v52  ;;  %v1118_v13 = vld [vmem:[#allocation3 + $0xef8] sm:$0xff] }
 0x155   : > { %1478 = vmatpush.msrb.mxu2 %v1066_v43  ;;  %1500 = vmatpush.msrb.mxu3 %v1134_v54  ;;  %v926_v14 = vld [vmem:[#allocation3 + $0x8f8] sm:$0xff] }
 0x156   : > { %1354 = vmatmul.f32.gmra.mxu0 %v2856_v24  ;;  %1377 = vmatmul.f32.gmra.mxu1 %v2860_v27  ;;  %v848_v5 = vrot.slane %v2875_v60, 6  ;;  %v990_v17 = vld [vmem:[#allocation3 + $0xaf8] sm:$0xff] }
 0x157   : > { %1431 = vmatpush.msrb.mxu0 %v942_v47  ;;  %1454 = vmatpush.msrb.mxu1 %v1006_v49  ;;  %v1046_v19 = vld [vmem:[#allocation3 + $0xcb8] sm:$0xff]  ;;  %v1777_v49 = vld [vmem:[#allocation3 + $0x15e0] sm:$0xff] }
 0x158   : > { %1479 = vmatpush.msrb.mxu2 %v1062_v50  ;;  %1501 = vmatpush.msrb.mxu3 %v1130_v56  ;;  %v872_v11 = vadd.f32 %v848_v5, %v827_v1  ;;  %v1114_v21 = vld [vmem:[#allocation3 + $0xed8] sm:$0xff]  ;;  %v1773_v56 = vld [vmem:[#allocation3 + $0x15c0] sm:$0xff] }
 0x159   : > { %1432 = vmatpush.msrb.mxu0 %v938_v63  ;;  %1455 = vmatpush.msrb.mxu1 %v1002_v58  ;;  %v661_v12 = vpop.f32.mrf.mxu0  ;;  %v684_v15 = vpop.f32.mrf.mxu1  ;;  %v922_v22 = vld [vmem:[#allocation3 + $0x8d8] sm:$0xff]  ;;  %v1841_v63 = vld [vmem:[#allocation3 + $0x17e0] sm:$0xff] }
 0x15a   : > { %1480 = vmatpush.msrb.mxu2 %v1058_v59  ;;  %1502 = vmatpush.msrb.mxu3 %v1126_v62  ;;  %v707_v16 = vpop.f32.mrf.mxu2  ;;  %884 = vst [vmem:[#allocation2 + $0x58] sm:$0xfc] %v872_v11  ;;  %v685_v20 = vadd.f32 %v684_v15, %v661_v12  ;;  %v986_v23 = vld [vmem:[#allocation3 + $0xad8] sm:$0xff]  ;;  %v1649_v62 = vld [vmem:[#allocation3 + $0x11e0] sm:$0xff] }
 0x15b   : > { %1433 = vmatpush.msrb.mxu0 %v934_v0  ;;  %1456 = vmatpush.msrb.mxu1 %v998_v2  ;;  %v1042_v25 = vld [vmem:[#allocation3 + $0xc98] sm:$0xff]  ;;  %v1713_v2 = vld [vmem:[#allocation3 + $0x13e0] sm:$0xff] }
 0x15c   : > { %1481 = vmatpush.msrb.mxu2 %v1054_v3  ;;  %1503 = vmatpush.msrb.mxu3 %v1122_v6  ;;  %v708_v26 = vadd.f32 %v707_v16, %v685_v20  ;;  %v1110_v29 = vld [vmem:[#allocation3 + $0xeb8] sm:$0xff]  ;;  %v1769_v3 = vld [vmem:[#allocation3 + $0x15a0] sm:$0xff] }
 0x15d   : > { %1434 = vmatpush.msrb.mxu0 %v930_v9  ;;  %1457 = vmatpush.msrb.mxu1 %v994_v7  ;;  %v730_v28 = vpop.f32.mrf.mxu3  ;;  %v918_v30 = vld [vmem:[#allocation3 + $0x8b8] sm:$0xff]  ;;  %v1837_v6 = vld [vmem:[#allocation3 + $0x17c0] sm:$0xff] }
 0x15e   : > { %1482 = vmatpush.msrb.mxu2 %v1050_v8  ;;  %1504 = vmatpush.msrb.mxu3 %v1118_v13  ;;  %v982_v31 = vld [vmem:[#allocation3 + $0xab8] sm:$0xff]  ;;  %v731_v33 = vadd.f32 %v730_v28, %v708_v26  ;;  %v1645_v9 = vld [vmem:[#allocation3 + $0x11c0] sm:$0xff] }
 0x15f   : > { %1435 = vmatpush.msrb.mxu0 %v926_v14  ;;  %1458 = vmatpush.msrb.mxu1 %v990_v17  ;;  %v1038_v32 = vld [vmem:[#allocation3 + $0xc78] sm:$0xff]  ;;  %v1709_v7 = vld [vmem:[#allocation3 + $0x13c0] sm:$0xff] }
 0x160   : > { %1483 = vmatpush.msrb.mxu2 %v1046_v19  ;;  %1505 = vmatpush.msrb.mxu3 %v1114_v21  ;;  %v1106_v34 = vld [vmem:[#allocation3 + $0xe98] sm:$0xff]  ;;  %v854_v38 = vrot.slane %v731_v33, 6  ;;  %v1765_v8 = vld [vmem:[#allocation3 + $0x1580] sm:$0xff] }
 0x161   : > { %1436 = vmatpush.msrb.mxu0 %v922_v22  ;;  %1459 = vmatpush.msrb.mxu1 %v986_v23  ;;  %v914_v35 = vld [vmem:[#allocation3 + $0x898] sm:$0xff]  ;;  %v1833_v13 = vld [vmem:[#allocation3 + $0x17a0] sm:$0xff] }
 0x162   : > { %1484 = vmatpush.msrb.mxu2 %v1042_v25  ;;  %1506 = vmatpush.msrb.mxu3 %v1110_v29  ;;  %v978_v37 = vld [vmem:[#allocation3 + $0xa98] sm:$0xff]  ;;  %v855_v42 = vsel %vm845_vm0, %v848_v5, %v854_v38  ;;  %v880_v43 = vadd.f32 %v854_v38, %v835_v36  ;;  %v1641_v14 = vld [vmem:[#allocation3 + $0x11a0] sm:$0xff] }
 0x163   : > { %1437 = vmatpush.msrb.mxu0 %v918_v30  ;;  %v1034_v44 = vld [vmem:[#allocation3 + $0xc58] sm:$0xff]  ;;  %1460 = vmatpush.msrb.mxu1 %v982_v31  ;;  %888 = vst [vmem:[#allocation2 + $0x8] sm:$0xff] %v855_v42  ;;  %v1705_v15 = vld [vmem:[#allocation3 + $0x13a0] sm:$0xff] }
 0x164   : > { %1485 = vmatpush.msrb.mxu2 %v1038_v32  ;;  %v1102_v39 = vld [vmem:[#allocation3 + $0xe78] sm:$0xff]  ;;  %1507 = vmatpush.msrb.mxu3 %v1106_v34  ;;  %892 = vst [vmem:[#allocation2 + $0x10] sm:$0x3] %v880_v43  ;;  %v1761_v17 = vld [vmem:[#allocation3 + $0x1560] sm:$0xff] }
 0x165   : > { %v910_v40 = vld [vmem:[#allocation3 + $0x878] sm:$0xff]  ;;  %1438 = vmatpush.msrb.mxu0 %v914_v35  ;;  %1461 = vmatpush.msrb.mxu1 %v978_v37  ;;  %v1829_v19 = vld [vmem:[#allocation3 + $0x1780] sm:$0xff] }
 0x166   : > { %v974_v41 = vld [vmem:[#allocation3 + $0xa78] sm:$0xff]  ;;  %1486 = vmatpush.msrb.mxu2 %v1034_v44  ;;  %1508 = vmatpush.msrb.mxu3 %v1102_v39  ;;  %v1637_v21 = vld [vmem:[#allocation3 + $0x1180] sm:$0xff] }
 0x167   : > { %v1030_v48 = vld [vmem:[#allocation3 + $0xc38] sm:$0xff]  ;;  %1439 = vmatpush.msrb.mxu0 %v910_v40  ;;  %1462 = vmatpush.msrb.mxu1 %v974_v41  ;;  %v1701_v23 = vld [vmem:[#allocation3 + $0x1380] sm:$0xff] }
 0x168   : > { %v1098_v53 = vld [vmem:[#allocation3 + $0xe58] sm:$0xff]  ;;  %1487 = vmatpush.msrb.mxu2 %v1030_v48  ;;  %v1757_v25 = vld [vmem:[#allocation3 + $0x1540] sm:$0xff] }
 0x169   : > { %v906_v45 = vld [vmem:[#allocation3 + $0x858] sm:$0xff]  ;;  %1509 = vmatpush.msrb.mxu3 %v1098_v53  ;;  %v1825_v26 = vld [vmem:[#allocation3 + $0x1760] sm:$0xff] }
 0x16a   : > { %v970_v54 = vld [vmem:[#allocation3 + $0xa58] sm:$0xff]  ;;  %1440 = vmatpush.msrb.mxu0 %v906_v45  ;;  %v1633_v30 = vld [vmem:[#allocation3 + $0x1160] sm:$0xff] }
 0x16b   : > { %v1026_v46 = vld [vmem:[#allocation3 + $0xc18] sm:$0xff]  ;;  %1463 = vmatpush.msrb.mxu1 %v970_v54  ;;  %v750_v60 = vpop.f32.mrf.mxu0  ;;  %v773_v0 = vpop.f32.mrf.mxu1  ;;  %v1697_v33 = vld [vmem:[#allocation3 + $0x1360] sm:$0xff] }
 0x16c   : > { %v1094_v47 = vld [vmem:[#allocation3 + $0xe38] sm:$0xff]  ;;  %1488 = vmatpush.msrb.mxu2 %v1026_v46  ;;  %v796_v1 = vpop.f32.mrf.mxu2  ;;  %v774_v5 = vadd.f32 %v773_v0, %v750_v60  ;;  %v1753_v34 = vld [vmem:[#allocation3 + $0x1520] sm:$0xff] }
 0x16d   : > { %v902_v50 = vld [vmem:[#allocation3 + $0x838] sm:$0xff]  ;;  %1510 = vmatpush.msrb.mxu3 %v1094_v47  ;;  %1489 = vmatmul.f32.vlgmr.msrb.gmra.mxu2 %v2832_v51  ;;  %v1821_v36 = vld [vmem:[#allocation3 + $0x1740] sm:$0xff] }
 0x16e   : > { %v966_v52 = vld [vmem:[#allocation3 + $0xa38] sm:$0xff]  ;;  %1891 = vmatpush.msra.mxu2 %v1777_v49  ;;  %1441 = vmatpush.msrb.mxu0 %v902_v50  ;;  %v797_v11 = vadd.f32 %v796_v1, %v774_v5  ;;  %v1629_v37 = vld [vmem:[#allocation3 + $0x1140] sm:$0xff] }
 0x16f   : > { %v1090_v55 = vld [vmem:[#allocation3 + $0xe18] sm:$0xff]  ;;  %1464 = vmatpush.msrb.mxu1 %v966_v52  ;;  %v819_v12 = vpop.f32.mrf.mxu3  ;;  %v1693_v44 = vld [vmem:[#allocation3 + $0x1340] sm:$0xff] }
 0x170   : > { %v898_v58 = vld [vmem:[#allocation3 + $0x818] sm:$0xff]  ;;  %1511 = vmatpush.msrb.mxu3 %v1090_v55  ;;  %1892 = vmatpush.msra.mxu2 %v1773_v56  ;;  %v2883_v16 = vadd.f32 %v819_v12, %v797_v11  ;;  %v1749_v38 = vld [vmem:[#allocation3 + $0x1500] sm:$0xff] }
 0x171   : > { %v962_v59 = vld [vmem:[#allocation3 + $0xa18] sm:$0xff]  ;;  %1512 = vmatmul.f32.vlgmr.msrb.gmra.mxu3 %v2836_v57  ;;  %1442 = vmatpush.msrb.mxu0 %v898_v58  ;;  %v1817_v41 = vld [vmem:[#allocation3 + $0x1720] sm:$0xff] }
 0x172   : > { %1914 = vmatpush.msra.mxu3 %v1841_v63  ;;  %1465 = vmatpush.msrb.mxu1 %v962_v59  ;;  %v828_v20 = vld [vmem:[#allocation2 + $0x18] sm:$0xfc]  ;;  %v849_v22 = vrot.slane %v2883_v16, 6  ;;  %v1625_v48 = vld [vmem:[#allocation3 + $0x1120] sm:$0xff] }
 0x173   : > { %1443 = vmatmul.f32.vlgmr.msrb.gmra.mxu0 %v2840_v61  ;;  %1466 = vmatmul.f32.vlgmr.msrb.gmra.mxu1 %v2844_v4  ;;  %v1689_v42 = vld [vmem:[#allocation3 + $0x1320] sm:$0xff] }
 0x174   : > { %1845 = vmatpush.msra.mxu0 %v1649_v62  ;;  %1868 = vmatpush.msra.mxu1 %v1713_v2  ;;  %v873_v28 = vadd.f32 %v849_v22, %v828_v20  ;;  %v1745_v43 = vld [vmem:[#allocation3 + $0x14e0] sm:$0xff] }
 0x175   : > { %1893 = vmatpush.msra.mxu2 %v1769_v3  ;;  %1915 = vmatpush.msra.mxu3 %v1837_v6  ;;  %v753_v29 = vpop.f32.mrf.mxu0  ;;  %v776_v31 = vpop.f32.mrf.mxu1  ;;  %v1813_v45 = vld [vmem:[#allocation3 + $0x1700] sm:$0xff] }
 0x176   : > { %1846 = vmatpush.msra.mxu0 %v1645_v9  ;;  %1869 = vmatpush.msra.mxu1 %v1709_v7  ;;  %v799_v32 = vpop.f32.mrf.mxu2  ;;  %885 = vst [vmem:[#allocation2 + $0x18] sm:$0xfc] %v873_v28  ;;  %v777_v35 = vadd.f32 %v776_v31, %v753_v29  ;;  %v1621_v54 = vld [vmem:[#allocation3 + $0x1100] sm:$0xff]  ;;  %v1519_v29 = vld [vmem:[#allocation2 + $0x30] sm:$0xfe] }
 0x177   : > { %1894 = vmatpush.msra.mxu2 %v1765_v8  ;;  %1916 = vmatpush.msra.mxu3 %v1833_v13  ;;  %v836_v46 = vld [vmem:[#allocation2 + $0x40] sm:$0x3] }
 0x178   : > { %1492 = vmatmul.f32.gmra.mxu2 %v2848_v10  ;;  %1847 = vmatpush.msra.mxu0 %v1641_v14  ;;  %v800_v39 = vadd.f32 %v799_v32, %v777_v35  ;;  %v1685_v47 = vld [vmem:[#allocation3 + $0x1300] sm:$0xff] }
 0x179   : > { %1870 = vmatpush.msra.mxu1 %v1705_v15  ;;  %1895 = vmatpush.msra.mxu2 %v1761_v17  ;;  %v822_v40 = vpop.f32.mrf.mxu3  ;;  %v1741_v49 = vld [vmem:[#allocation3 + $0x14c0] sm:$0xff] }
 0x17a   : > { %1917 = vmatpush.msra.mxu3 %v1829_v19  ;;  %1848 = vmatpush.msra.mxu0 %v1637_v21  ;;  %v823_v53 = vadd.f32 %v822_v40, %v800_v39  ;;  %v1809_v52 = vld [vmem:[#allocation3 + $0x16e0] sm:$0xff] }
 0x17b   : > { %1515 = vmatmul.f32.gmra.mxu3 %v2852_v18  ;;  %1871 = vmatpush.msra.mxu1 %v1701_v23  ;;  %v1617_v55 = vld [vmem:[#allocation3 + $0x10e0] sm:$0xff] }
 0x17c   : > { %1896 = vmatpush.msra.mxu2 %v1757_v25  ;;  %1918 = vmatpush.msra.mxu3 %v1825_v26  ;;  %v856_v50 = vrot.slane %v823_v53, 6  ;;  %v1681_v56 = vld [vmem:[#allocation3 + $0x12e0] sm:$0xff] }
 0x17d   : > { %1446 = vmatmul.f32.gmra.mxu0 %v2856_v24  ;;  %1469 = vmatmul.f32.gmra.mxu1 %v2860_v27  ;;  %v1737_v63 = vld [vmem:[#allocation3 + $0x14a0] sm:$0xff] }
 0x17e   : > { %1849 = vmatpush.msra.mxu0 %v1633_v30  ;;  %1872 = vmatpush.msra.mxu1 %v1697_v33  ;;  %v857_v58 = vsel %vm845_vm0, %v849_v22, %v856_v50  ;;  %v881_v59 = vadd.f32 %v856_v50, %v836_v46  ;;  %v1805_v62 = vld [vmem:[#allocation3 + $0x16c0] sm:$0xff]  ;;  %v1650_v46 = vld [vmem:[#allocation3 + $0x11e8] sm:$0xff] }
 0x17f   : > { %1897 = vmatpush.msra.mxu2 %v1753_v34  ;;  %1919 = vmatpush.msra.mxu3 %v1821_v36  ;;  %v1168_v60 = vpop.f32.mrf.mxu0  ;;  %v1613_v0 = vld [vmem:[#allocation3 + $0x10c0] sm:$0xff]  ;;  %v1191_v1 = vpop.f32.mrf.mxu1  ;;  %889 = vst [vmem:[#allocation2 + $0x38] sm:$0xff] %v857_v58  ;;  %v1838_v50 = vld [vmem:[#allocation3 + $0x17c8] sm:$0xff] }
 0x180   : > { %1850 = vmatpush.msra.mxu0 %v1629_v37  ;;  %1873 = vmatpush.msra.mxu1 %v1693_v44  ;;  %v1214_v2 = vpop.f32.mrf.mxu2  ;;  %v1677_v3 = vld [vmem:[#allocation3 + $0x12c0] sm:$0xff]  ;;  %893 = vst [vmem:[#allocation2 + $0x40] sm:$0x3] %v881_v59  ;;  %v1192_v6 = vadd.f32 %v1191_v1, %v1168_v60  ;;  %v1778_v37 = vld [vmem:[#allocation3 + $0x15e8] sm:$0xff] }
 0x181   : > { %1898 = vmatpush.msra.mxu2 %v1749_v38  ;;  %1920 = vmatpush.msra.mxu3 %v1817_v41  ;;  %v1733_v5 = vld [vmem:[#allocation3 + $0x1480] sm:$0xff]  ;;  %v1774_v41 = vld [vmem:[#allocation3 + $0x15c8] sm:$0xff] }
 0x182   : > { %1851 = vmatpush.msra.mxu0 %v1625_v48  ;;  %1874 = vmatpush.msra.mxu1 %v1689_v42  ;;  %v1801_v9 = vld [vmem:[#allocation3 + $0x16a0] sm:$0xff]  ;;  %v1215_v12 = vadd.f32 %v1214_v2, %v1192_v6  ;;  %v1834_v59 = vld [vmem:[#allocation3 + $0x17a8] sm:$0xff] }
 0x183   : > { %1899 = vmatpush.msra.mxu2 %v1745_v43  ;;  %1921 = vmatpush.msra.mxu3 %v1813_v45  ;;  %v1609_v7 = vld [vmem:[#allocation3 + $0x10a0] sm:$0xff]  ;;  %v1237_v13 = vpop.f32.mrf.mxu3  ;;  %v1842_v43 = vld [vmem:[#allocation3 + $0x17e8] sm:$0xff] }
 0x184   : > { %1852 = vmatpush.msra.mxu0 %v1621_v54  ;;  %1875 = vmatpush.msra.mxu1 %v1685_v47  ;;  %v1673_v8 = vld [vmem:[#allocation3 + $0x12a0] sm:$0xff]  ;;  %v2891_v19 = vadd.f32 %v1237_v13, %v1215_v12  ;;  %v1714_v47 = vld [vmem:[#allocation3 + $0x13e8] sm:$0xff] }
 0x185   : > { %1900 = vmatpush.msra.mxu2 %v1741_v49  ;;  %1922 = vmatpush.msra.mxu3 %v1809_v52  ;;  %v1729_v11 = vld [vmem:[#allocation3 + $0x1460] sm:$0xff]  ;;  %v1646_v52 = vld [vmem:[#allocation3 + $0x11c8] sm:$0xff] }
 0x186   : > { %1853 = vmatpush.msra.mxu0 %v1617_v55  ;;  %1876 = vmatpush.msra.mxu1 %v1681_v56  ;;  %v1797_v14 = vld [vmem:[#allocation3 + $0x1680] sm:$0xff]  ;;  %v1540_v25 = vrot.slane %v2891_v19, 7  ;;  %v1527_v55 = vld [vmem:[#allocation2 + $0x28] sm:$0x1] }
 0x187   : > { %1901 = vmatpush.msra.mxu2 %v1737_v63  ;;  %1923 = vmatpush.msra.mxu3 %v1805_v62  ;;  %v1605_v15 = vld [vmem:[#allocation3 + $0x1080] sm:$0xff]  ;;  %v1710_v56 = vld [vmem:[#allocation3 + $0x13c8] sm:$0xff] }
 0x188   : > { %1854 = vmatpush.msra.mxu0 %v1613_v0  ;;  %1877 = vmatpush.msra.mxu1 %v1677_v3  ;;  %v1669_v16 = vld [vmem:[#allocation3 + $0x1280] sm:$0xff]  ;;  %v1564_v32 = vadd.f32 %v1540_v25, %v1519_v29  ;;  %v1766_v63 = vld [vmem:[#allocation3 + $0x1588] sm:$0xff] }
 0x189   : > { %1902 = vmatpush.msra.mxu2 %v1733_v5  ;;  %1924 = vmatpush.msra.mxu3 %v1801_v9  ;;  %v1725_v17 = vld [vmem:[#allocation3 + $0x1440] sm:$0xff]  ;;  %v1171_v33 = vpop.f32.mrf.mxu0  ;;  %v1194_v35 = vpop.f32.mrf.mxu1  ;;  %v1642_v60 = vld [vmem:[#allocation3 + $0x11a8] sm:$0xff] }
 0x18a   : > { %1855 = vmatpush.msra.mxu0 %v1609_v7  ;;  %1878 = vmatpush.msra.mxu1 %v1673_v8  ;;  %v1793_v20 = vld [vmem:[#allocation3 + $0x1660] sm:$0xff]  ;;  %v1217_v36 = vpop.f32.mrf.mxu2  ;;  %1576 = vst [vmem:[#allocation2 + $0x30] sm:$0xfe] %v1564_v32  ;;  %v1195_v38 = vadd.f32 %v1194_v35, %v1171_v33  ;;  %v1706_v62 = vld [vmem:[#allocation3 + $0x13a8] sm:$0xff] }
 0x18b   : > { %1903 = vmatpush.msra.mxu2 %v1729_v11  ;;  %v1601_v21 = vld [vmem:[#allocation3 + $0x1060] sm:$0xff]  ;;  %1925 = vmatpush.msra.mxu3 %v1797_v14  ;;  %v1830_v0 = vld [vmem:[#allocation3 + $0x1788] sm:$0xff] }
 0x18c   : > { %1856 = vmatpush.msra.mxu0 %v1605_v15  ;;  %v1665_v22 = vld [vmem:[#allocation3 + $0x1260] sm:$0xff]  ;;  %1879 = vmatpush.msra.mxu1 %v1669_v16  ;;  %v1218_v48 = vadd.f32 %v1217_v36, %v1195_v38  ;;  %v1702_v1 = vld [vmem:[#allocation3 + $0x1388] sm:$0xff] }
 0x18d   : > { %v1721_v23 = vld [vmem:[#allocation3 + $0x1420] sm:$0xff]  ;;  %1904 = vmatpush.msra.mxu2 %v1725_v17  ;;  %1926 = vmatpush.msra.mxu3 %v1793_v20  ;;  %v1240_v42 = vpop.f32.mrf.mxu3  ;;  %v1758_v2 = vld [vmem:[#allocation3 + $0x1548] sm:$0xff] }
 0x18e   : > { %v1789_v26 = vld [vmem:[#allocation3 + $0x1640] sm:$0xff]  ;;  %1857 = vmatpush.msra.mxu0 %v1601_v21  ;;  %1880 = vmatpush.msra.mxu1 %v1665_v22  ;;  %v1241_v54 = vadd.f32 %v1240_v42, %v1218_v48  ;;  %v1826_v3 = vld [vmem:[#allocation3 + $0x1768] sm:$0xff] }
 0x18f   : > { %v1597_v28 = vld [vmem:[#allocation3 + $0x1040] sm:$0xff]  ;;  %1905 = vmatpush.msra.mxu2 %v1721_v23  ;;  %1927 = vmatpush.msra.mxu3 %v1789_v26  ;;  %v1634_v5 = vld [vmem:[#allocation3 + $0x1168] sm:$0xff] }
 0x190   : > { %v1661_v30 = vld [vmem:[#allocation3 + $0x1240] sm:$0xff]  ;;  %1858 = vmatpush.msra.mxu0 %v1597_v28  ;;  %v1544_v49 = vrot.slane %v1241_v54, 7  ;;  %v1698_v6 = vld [vmem:[#allocation3 + $0x1368] sm:$0xff] }
 0x191   : > { %v1717_v31 = vld [vmem:[#allocation3 + $0x1400] sm:$0xff]  ;;  %1881 = vmatpush.msra.mxu1 %v1661_v30  ;;  %v1754_v9 = vld [vmem:[#allocation3 + $0x1528] sm:$0xff] }
 0x192   : > { %v1785_v34 = vld [vmem:[#allocation3 + $0x1620] sm:$0xff]  ;;  %1906 = vmatpush.msra.mxu2 %v1717_v31  ;;  %v1572_v58 = vadd.f32 %v1544_v49, %v1527_v55  ;;  %v1630_v7 = vld [vmem:[#allocation3 + $0x1148] sm:$0xff] }
 0x193   : > { %v1593_v44 = vld [vmem:[#allocation3 + $0x1020] sm:$0xff]  ;;  %1928 = vmatpush.msra.mxu3 %v1785_v34  ;;  %1907 = vmatmul.f32.vlgmr.msra.gmra.mxu2 %v2832_v51  ;;  %v1770_v51 = vld [vmem:[#allocation3 + $0x15a8] sm:$0xff] }
 0x194   : > { %v1657_v39 = vld [vmem:[#allocation3 + $0x1220] sm:$0xff]  ;;  %1983 = vmatpush.msrb.mxu2 %v1778_v37  ;;  %1859 = vmatpush.msra.mxu0 %v1593_v44  ;;  %1584 = vst [vmem:[#allocation2 + $0x28] sm:$0x1] %v1572_v58  ;;  %v1694_v8 = vld [vmem:[#allocation3 + $0x1348] sm:$0xff]  ;;  %v1779_v58 = vld [vmem:[#allocation3 + $0x15f0] sm:$0xff] }
 0x195   : > { %v1781_v40 = vld [vmem:[#allocation3 + $0x1600] sm:$0xff]  ;;  %1882 = vmatpush.msra.mxu1 %v1657_v39  ;;  %v1750_v11 = vld [vmem:[#allocation3 + $0x1508] sm:$0xff] }
 0x196   : > { %v1589_v53 = vld [vmem:[#allocation3 + $0x1000] sm:$0xff]  ;;  %1929 = vmatpush.msra.mxu3 %v1781_v40  ;;  %1984 = vmatpush.msrb.mxu2 %v1774_v41  ;;  %v1818_v12 = vld [vmem:[#allocation3 + $0x1728] sm:$0xff] }
 0x197   : > { %v1653_v45 = vld [vmem:[#allocation3 + $0x1200] sm:$0xff]  ;;  %1930 = vmatmul.f32.vlgmr.msra.gmra.mxu3 %v2836_v57  ;;  %1860 = vmatpush.msra.mxu0 %v1589_v53  ;;  %v2899_v57 = vsel %vm1539_vm1, %v1540_v25, %v1544_v49  ;;  %v1690_v13 = vld [vmem:[#allocation3 + $0x1328] sm:$0xff] }
 0x198   : > { %2006 = vmatpush.msrb.mxu3 %v1842_v43  ;;  %1883 = vmatpush.msra.mxu1 %v1653_v45  ;;  %v1746_v14 = vld [vmem:[#allocation3 + $0x14e8] sm:$0xff] }
 0x199   : > { %1861 = vmatmul.f32.vlgmr.msra.gmra.mxu0 %v2840_v61  ;;  %1884 = vmatmul.f32.vlgmr.msra.gmra.mxu1 %v2844_v4  ;;  %v1762_v61 = vld [vmem:[#allocation3 + $0x1568] sm:$0xff] }
 0x19a   : > { %1937 = vmatpush.msrb.mxu0 %v1650_v46  ;;  %1960 = vmatpush.msrb.mxu1 %v1714_v47  ;;  %v1638_v4 = vld [vmem:[#allocation3 + $0x1188] sm:$0xff]  ;;  %v1520_v47 = vld [vmem:[#allocation2] sm:$0xfe] }
 0x19b   : > { %1985 = vmatpush.msrb.mxu2 %v1770_v51  ;;  %2007 = vmatpush.msrb.mxu3 %v1838_v50  ;;  %v1814_v15 = vld [vmem:[#allocation3 + $0x1708] sm:$0xff] }
 0x19c   : > { %1938 = vmatpush.msrb.mxu0 %v1646_v52  ;;  %1961 = vmatpush.msrb.mxu1 %v1710_v56  ;;  %v1622_v16 = vld [vmem:[#allocation3 + $0x1108] sm:$0xff] }
 0x19d   : > { %1986 = vmatpush.msrb.mxu2 %v1766_v63  ;;  %2008 = vmatpush.msrb.mxu3 %v1834_v59  ;;  %v1742_v17 = vld [vmem:[#allocation3 + $0x14c8] sm:$0xff] }
 0x19e   : > { %1910 = vmatmul.f32.gmra.mxu2 %v2848_v10  ;;  %1939 = vmatpush.msrb.mxu0 %v1642_v60  ;;  %v1822_v10 = vld [vmem:[#allocation3 + $0x1748] sm:$0xff] }
 0x19f   : > { %1962 = vmatpush.msrb.mxu1 %v1706_v62  ;;  %1987 = vmatpush.msrb.mxu2 %v1762_v61  ;;  %v1618_v19 = vld [vmem:[#allocation3 + $0x10e8] sm:$0xff] }
 0x1a0   : > { %2009 = vmatpush.msrb.mxu3 %v1830_v0  ;;  %1940 = vmatpush.msrb.mxu0 %v1638_v4  ;;  %v1682_v20 = vld [vmem:[#allocation3 + $0x12e8] sm:$0xff]  ;;  %v2909_v0 = vld [vmem:[%s2757_s24 + $0x10] sm:$0xff] }
 0x1a1   : > { %1933 = vmatmul.f32.gmra.mxu3 %v2852_v18  ;;  %1963 = vmatpush.msrb.mxu1 %v1702_v1  ;;  %v1626_v18 = vld [vmem:[#allocation3 + $0x1128] sm:$0xff]  ;;  %v1775_v4 = vld [vmem:[#allocation3 + $0x15d0] sm:$0xff] }
 0x1a2   : > { %1988 = vmatpush.msrb.mxu2 %v1758_v2  ;;  %2010 = vmatpush.msrb.mxu3 %v1826_v3  ;;  %v1738_v21 = vld [vmem:[#allocation3 + $0x14a8] sm:$0xff]  ;;  %v1843_v3 = vld [vmem:[#allocation3 + $0x17f0] sm:$0xff] }
 0x1a3   : > { %1864 = vmatmul.f32.gmra.mxu0 %v2856_v24  ;;  %1887 = vmatmul.f32.gmra.mxu1 %v2860_v27  ;;  %v1686_v24 = vld [vmem:[#allocation3 + $0x1308] sm:$0xff]  ;;  %v1260_v22 = vpop.f32.mrf.mxu0  ;;  %v1283_v26 = vpop.f32.mrf.mxu1 }
 0x1a4   : > { %1941 = vmatpush.msrb.mxu0 %v1634_v5  ;;  %1964 = vmatpush.msrb.mxu1 %v1698_v6  ;;  %v1810_v27 = vld [vmem:[#allocation3 + $0x16e8] sm:$0xff]  ;;  %v1306_v28 = vpop.f32.mrf.mxu2  ;;  %v1284_v31 = vadd.f32 %v1283_v26, %v1260_v22  ;;  %v1707_v22 = vld [vmem:[#allocation3 + $0x13b0] sm:$0xff] }
 0x1a5   : > { %1989 = vmatpush.msrb.mxu2 %v1754_v9  ;;  %2011 = vmatpush.msrb.mxu3 %v1822_v10  ;;  %v1806_v23 = vld [vmem:[#allocation3 + $0x16c8] sm:$0xff]  ;;  %v2913_v10 = vld [vmem:[%s2757_s24 + $0x18] sm:$0xff]  ;;  %v2928_v26 = vld [vmem:[%s2757_s24 + $0x30] sm:$0xff] }
 0x1a6   : > { %1942 = vmatpush.msrb.mxu0 %v1630_v7  ;;  %1965 = vmatpush.msrb.mxu1 %v1694_v8  ;;  %v1614_v25 = vld [vmem:[#allocation3 + $0x10c8] sm:$0xff]  ;;  %v1307_v36 = vadd.f32 %v1306_v28, %v1284_v31  ;;  %v1651_v7 = vld [vmem:[#allocation3 + $0x11f0] sm:$0xff] }
 0x1a7   : > { %1990 = vmatpush.msrb.mxu2 %v1750_v11  ;;  %2012 = vmatpush.msrb.mxu3 %v1818_v12  ;;  %v1678_v29 = vld [vmem:[#allocation3 + $0x12c8] sm:$0xff]  ;;  %v1329_v37 = vpop.f32.mrf.mxu3  ;;  %v1715_v8 = vld [vmem:[#allocation3 + $0x13f0] sm:$0xff] }
 0x1a8   : > { %1943 = vmatpush.msrb.mxu0 %v1626_v18  ;;  %1966 = vmatpush.msrb.mxu1 %v1690_v13  ;;  %v1734_v30 = vld [vmem:[#allocation3 + $0x1488] sm:$0xff]  ;;  %v2905_v41 = vadd.f32 %v1329_v37, %v1307_v36  ;;  %v1771_v11 = vld [vmem:[#allocation3 + $0x15b0] sm:$0xff]  ;;  %v2917_v18 = vld [vmem:[%s2757_s24] sm:$0xff] }
 0x1a9   : > { %1991 = vmatpush.msrb.mxu2 %v1746_v14  ;;  %2013 = vmatpush.msrb.mxu3 %v1814_v15  ;;  %v1802_v32 = vld [vmem:[#allocation3 + $0x16a8] sm:$0xff]  ;;  %v1839_v13 = vld [vmem:[#allocation3 + $0x17d0] sm:$0xff]  ;;  %v2936_v36 = vld [vmem:[%s2757_s24 + $0x20] sm:$0xff] }
 0x1aa   : > { %1944 = vmatpush.msrb.mxu0 %v1622_v16  ;;  %1967 = vmatpush.msrb.mxu1 %v1686_v24  ;;  %v1610_v33 = vld [vmem:[#allocation3 + $0x10a8] sm:$0xff]  ;;  %v1541_v45 = vrot.slane %v2905_v41, 7  ;;  %v1647_v14 = vld [vmem:[#allocation3 + $0x11d0] sm:$0xff] }
 0x1ab   : > { %1992 = vmatpush.msrb.mxu2 %v1742_v17  ;;  %2014 = vmatpush.msrb.mxu3 %v1810_v27  ;;  %v1674_v34 = vld [vmem:[#allocation3 + $0x12a8] sm:$0xff]  ;;  %v1711_v24 = vld [vmem:[#allocation3 + $0x13d0] sm:$0xff] }
 0x1ac   : > { %1945 = vmatpush.msrb.mxu0 %v1618_v19  ;;  %1968 = vmatpush.msrb.mxu1 %v1682_v20  ;;  %v1730_v35 = vld [vmem:[#allocation3 + $0x1468] sm:$0xff]  ;;  %v1565_v50 = vadd.f32 %v1541_v45, %v1520_v47  ;;  %v1767_v17 = vld [vmem:[#allocation3 + $0x1590] sm:$0xff] }
 0x1ad   : > { %1993 = vmatpush.msrb.mxu2 %v1738_v21  ;;  %2015 = vmatpush.msrb.mxu3 %v1806_v23  ;;  %v1798_v44 = vld [vmem:[#allocation3 + $0x1688] sm:$0xff]  ;;  %v1263_v52 = vpop.f32.mrf.mxu0  ;;  %v1286_v56 = vpop.f32.mrf.mxu1  ;;  %v1835_v20 = vld [vmem:[#allocation3 + $0x17b0] sm:$0xff] }
 0x1ae   : > { %1946 = vmatpush.msrb.mxu0 %v1614_v25  ;;  %1969 = vmatpush.msrb.mxu1 %v1678_v29  ;;  %v1606_v38 = vld [vmem:[#allocation3 + $0x1088] sm:$0xff]  ;;  %v1309_v63 = vpop.f32.mrf.mxu2  ;;  %1577 = vst [vmem:[#allocation2] sm:$0xfe] %v1565_v50  ;;  %v1287_v60 = vadd.f32 %v1286_v56, %v1263_v52  ;;  %v1643_v21 = vld [vmem:[#allocation3 + $0x11b0] sm:$0xff] }
 0x1af   : > { %1994 = vmatpush.msrb.mxu2 %v1734_v30  ;;  %2016 = vmatpush.msrb.mxu3 %v1802_v32  ;;  %v1670_v39 = vld [vmem:[#allocation3 + $0x1288] sm:$0xff]  ;;  %v1763_v23 = vld [vmem:[#allocation3 + $0x1570] sm:$0xff]  ;;  %v2932_v32 = vld [vmem:[%s2757_s24 + $0x38] sm:$0xff] }
 0x1b0   : > { %1947 = vmatpush.msrb.mxu0 %v1610_v33  ;;  %v1726_v40 = vld [vmem:[#allocation3 + $0x1448] sm:$0xff]  ;;  %1970 = vmatpush.msrb.mxu1 %v1674_v34  ;;  %v1310_v1 = vadd.f32 %v1309_v63, %v1287_v60  ;;  %v1831_v25 = vld [vmem:[#allocation3 + $0x1790] sm:$0xff] }
 0x1b1   : > { %1995 = vmatpush.msrb.mxu2 %v1730_v35  ;;  %v1794_v48 = vld [vmem:[#allocation3 + $0x1668] sm:$0xff]  ;;  %2017 = vmatpush.msrb.mxu3 %v1798_v44  ;;  %v1332_v2 = vpop.f32.mrf.mxu3  ;;  %v1639_v28 = vld [vmem:[#allocation3 + $0x1190] sm:$0xff] }
 0x1b2   : > { %v1602_v42 = vld [vmem:[#allocation3 + $0x1068] sm:$0xff]  ;;  %1948 = vmatpush.msrb.mxu0 %v1606_v38  ;;  %1971 = vmatpush.msrb.mxu1 %v1670_v39  ;;  %v1333_v9 = vadd.f32 %v1332_v2, %v1310_v1  ;;  %v1703_v29 = vld [vmem:[#allocation3 + $0x1390] sm:$0xff] }
 0x1b3   : > { %v1666_v43 = vld [vmem:[#allocation3 + $0x1268] sm:$0xff]  ;;  %1996 = vmatpush.msrb.mxu2 %v1726_v40  ;;  %2018 = vmatpush.msrb.mxu3 %v1794_v48  ;;  %v1759_v30 = vld [vmem:[#allocation3 + $0x1550] sm:$0xff] }
 0x1b4   : > { %v1722_v53 = vld [vmem:[#allocation3 + $0x1428] sm:$0xff]  ;;  %1949 = vmatpush.msrb.mxu0 %v1602_v42  ;;  %1972 = vmatpush.msrb.mxu1 %v1666_v43  ;;  %v1546_v12 = vrot.slane %v1333_v9, 7  ;;  %v1827_v31 = vld [vmem:[#allocation3 + $0x1770] sm:$0xff] }
 0x1b5   : > { %v1790_v54 = vld [vmem:[#allocation3 + $0x1648] sm:$0xff]  ;;  %1997 = vmatpush.msrb.mxu2 %v1722_v53  ;;  %v1635_v33 = vld [vmem:[#allocation3 + $0x1170] sm:$0xff] }
 0x1b6   : > { %v1598_v46 = vld [vmem:[#allocation3 + $0x1048] sm:$0xff]  ;;  %2019 = vmatpush.msrb.mxu3 %v1790_v54  ;;  %v2925_v27 = vsel %vm1539_vm1, %v1541_v45, %v1546_v12  ;;  %v1699_v34 = vld [vmem:[#allocation3 + $0x1370] sm:$0xff] }
 0x1b7   : > { %v1662_v51 = vld [vmem:[#allocation3 + $0x1248] sm:$0xff]  ;;  %1950 = vmatpush.msrb.mxu0 %v1598_v46  ;;  %v1755_v35 = vld [vmem:[#allocation3 + $0x1530] sm:$0xff] }
 0x1b8   : > { %v1718_v49 = vld [vmem:[#allocation3 + $0x1408] sm:$0xff]  ;;  %1973 = vmatpush.msrb.mxu1 %v1662_v51  ;;  %v1823_v37 = vld [vmem:[#allocation3 + $0x1750] sm:$0xff] }
 0x1b9   : > { %v1786_v55 = vld [vmem:[#allocation3 + $0x1628] sm:$0xff]  ;;  %1998 = vmatpush.msrb.mxu2 %v1718_v49  ;;  %v1631_v44 = vld [vmem:[#allocation3 + $0x1150] sm:$0xff] }
 0x1ba   : > { %v1594_v59 = vld [vmem:[#allocation3 + $0x1028] sm:$0xff]  ;;  %2020 = vmatpush.msrb.mxu3 %v1786_v55  ;;  %1999 = vmatmul.f32.vlgmr.msrb.gmra.mxu2 %v2909_v0  ;;  %v1695_v39 = vld [vmem:[#allocation3 + $0x1350] sm:$0xff] }
 0x1bb   : > { %v1658_v62 = vld [vmem:[#allocation3 + $0x1228] sm:$0xff]  ;;  %2075 = vmatpush.msra.mxu2 %v1779_v58  ;;  %1951 = vmatpush.msrb.mxu0 %v1594_v59  ;;  %v1751_v40 = vld [vmem:[#allocation3 + $0x1510] sm:$0xff] }
 0x1bc   : > { %v1782_v61 = vld [vmem:[#allocation3 + $0x1608] sm:$0xff]  ;;  %1974 = vmatpush.msrb.mxu1 %v1658_v62  ;;  %v1819_v41 = vld [vmem:[#allocation3 + $0x1730] sm:$0xff] }
 0x1bd   : > { %v1590_v5 = vld [vmem:[#allocation3 + $0x1008] sm:$0xff]  ;;  %2021 = vmatpush.msrb.mxu3 %v1782_v61  ;;  %2076 = vmatpush.msra.mxu2 %v1775_v4  ;;  %v1627_v48 = vld [vmem:[#allocation3 + $0x1130] sm:$0xff] }
 0x1be   : > { %v1654_v6 = vld [vmem:[#allocation3 + $0x1208] sm:$0xff]  ;;  %2022 = vmatmul.f32.vlgmr.msrb.gmra.mxu3 %v2913_v10  ;;  %1952 = vmatpush.msrb.mxu0 %v1590_v5  ;;  %v1691_v42 = vld [vmem:[#allocation3 + $0x1330] sm:$0xff] }
 0x1bf   : > { %2098 = vmatpush.msra.mxu3 %v1843_v3  ;;  %1975 = vmatpush.msrb.mxu1 %v1654_v6  ;;  %v1528_v15 = vld [vmem:[#allocation2 + $0x48] sm:$0x1]  ;;  %v1747_v43 = vld [vmem:[#allocation3 + $0x14f0] sm:$0xff] }
 0x1c0   : > { %1953 = vmatmul.f32.vlgmr.msrb.gmra.mxu0 %v2917_v18  ;;  %v2921_v16 = vld [vmem:[%s2757_s24 + $0x8] sm:$0xff]  ;;  %v1573_v19 = vadd.f32 %v1546_v12, %v1528_v15  ;;  %2077 = vmatpush.msra.mxu2 %v1771_v11  ;;  %v1815_v53 = vld [vmem:[#allocation3 + $0x1710] sm:$0xff] }
 0x1c1   : > { %1976 = vmatmul.f32.vlgmr.msrb.gmra.mxu1 %v2921_v16  ;;  %2029 = vmatpush.msra.mxu0 %v1651_v7  ;;  %v2940_v38 = vld [vmem:[%s2757_s24 + $0x28] sm:$0xff]  ;;  %v1623_v45 = vld [vmem:[#allocation3 + $0x1110] sm:$0xff] }
 0x1c2   : > { %2052 = vmatpush.msra.mxu1 %v1715_v8  ;;  %2099 = vmatpush.msra.mxu3 %v1839_v13  ;;  %1585 = vst [vmem:[#allocation2 + $0x48] sm:$0x1] %v1573_v19  ;;  %v1687_v54 = vld [vmem:[#allocation3 + $0x1310] sm:$0xff] }
 0x1c3   : > { %2030 = vmatpush.msra.mxu0 %v1647_v14  ;;  %2078 = vmatpush.msra.mxu2 %v1767_v17  ;;  %v1743_v46 = vld [vmem:[#allocation3 + $0x14d0] sm:$0xff] }
 0x1c4   : > { %2053 = vmatpush.msra.mxu1 %v1711_v24  ;;  %2100 = vmatpush.msra.mxu3 %v1835_v20  ;;  %v1811_v47 = vld [vmem:[#allocation3 + $0x16f0] sm:$0xff]  ;;  %v1521_v20 = vld [vmem:[#allocation2 + $0x58] sm:$0xfe] }
 0x1c5   : > { %2002 = vmatmul.f32.gmra.mxu2 %v2928_v26  ;;  %2031 = vmatpush.msra.mxu0 %v1643_v21  ;;  %v1619_v51 = vld [vmem:[#allocation3 + $0x10f0] sm:$0xff] }
 0x1c6   : > { %2054 = vmatpush.msra.mxu1 %v1707_v22  ;;  %2079 = vmatpush.msra.mxu2 %v1763_v23  ;;  %v1683_v49 = vld [vmem:[#allocation3 + $0x12f0] sm:$0xff] }
 0x1c7   : > { %2101 = vmatpush.msra.mxu3 %v1831_v25  ;;  %2032 = vmatpush.msra.mxu0 %v1639_v28  ;;  %v1739_v50 = vld [vmem:[#allocation3 + $0x14b0] sm:$0xff] }
 0x1c8   : > { %2025 = vmatmul.f32.gmra.mxu3 %v2932_v32  ;;  %2055 = vmatpush.msra.mxu1 %v1703_v29  ;;  %v1807_v55 = vld [vmem:[#allocation3 + $0x16d0] sm:$0xff] }
 0x1c9   : > { %2080 = vmatpush.msra.mxu2 %v1759_v30  ;;  %2102 = vmatpush.msra.mxu3 %v1827_v31  ;;  %v1352_v52 = vpop.f32.mrf.mxu0  ;;  %v1615_v56 = vld [vmem:[#allocation3 + $0x10d0] sm:$0xff]  ;;  %v1375_v63 = vpop.f32.mrf.mxu1  ;;  %v1780_v31 = vld [vmem:[#allocation3 + $0x15f8] sm:$0xff] }
 0x1ca   : > { %1956 = vmatmul.f32.gmra.mxu0 %v2936_v36  ;;  %1979 = vmatmul.f32.gmra.mxu1 %v2940_v38  ;;  %v1398_v58 = vpop.f32.mrf.mxu2  ;;  %v1679_v59 = vld [vmem:[#allocation3 + $0x12d0] sm:$0xff]  ;;  %v1376_v62 = vadd.f32 %v1375_v63, %v1352_v52  ;;  %v1768_v52 = vld [vmem:[#allocation3 + $0x1598] sm:$0xff] }
 0x1cb   : > { %2033 = vmatpush.msra.mxu0 %v1635_v33  ;;  %2056 = vmatpush.msra.mxu1 %v1699_v34  ;;  %v1735_v60 = vld [vmem:[#allocation3 + $0x1490] sm:$0xff]  ;;  %v1836_v63 = vld [vmem:[#allocation3 + $0x17b8] sm:$0xff] }
 0x1cc   : > { %2081 = vmatpush.msra.mxu2 %v1755_v35  ;;  %2103 = vmatpush.msra.mxu3 %v1823_v37  ;;  %v1803_v61 = vld [vmem:[#allocation3 + $0x16b0] sm:$0xff]  ;;  %v1399_v3 = vadd.f32 %v1398_v58, %v1376_v62  ;;  %v1644_v58 = vld [vmem:[#allocation3 + $0x11b8] sm:$0xff] }
 0x1cd   : > { %2034 = vmatpush.msra.mxu0 %v1631_v44  ;;  %2057 = vmatpush.msra.mxu1 %v1695_v39  ;;  %v1611_v4 = vld [vmem:[#allocation3 + $0x10b0] sm:$0xff]  ;;  %v1421_v5 = vpop.f32.mrf.mxu3  ;;  %v1776_v44 = vld [vmem:[#allocation3 + $0x15d8] sm:$0xff] }
 0x1ce   : > { %2082 = vmatpush.msra.mxu2 %v1751_v40  ;;  %2104 = vmatpush.msra.mxu3 %v1819_v41  ;;  %v1675_v1 = vld [vmem:[#allocation3 + $0x12b0] sm:$0xff]  ;;  %v2943_v11 = vadd.f32 %v1421_v5, %v1399_v3  ;;  %v1844_v41 = vld [vmem:[#allocation3 + $0x17f8] sm:$0xff] }
 0x1cf   : > { %2035 = vmatpush.msra.mxu0 %v1627_v48  ;;  %2058 = vmatpush.msra.mxu1 %v1691_v42  ;;  %v1731_v2 = vld [vmem:[#allocation3 + $0x1470] sm:$0xff]  ;;  %v1832_v62 = vld [vmem:[#allocation3 + $0x1798] sm:$0xff] }
 0x1d0   : > { %2083 = vmatpush.msra.mxu2 %v1747_v43  ;;  %2105 = vmatpush.msra.mxu3 %v1815_v53  ;;  %v1799_v6 = vld [vmem:[#allocation3 + $0x1690] sm:$0xff]  ;;  %v1542_v24 = vrot.slane %v2943_v11, 7  ;;  %v1652_v53 = vld [vmem:[#allocation3 + $0x11f8] sm:$0xff] }
 0x1d1   : > { %2036 = vmatpush.msra.mxu0 %v1623_v45  ;;  %2059 = vmatpush.msra.mxu1 %v1687_v54  ;;  %v1607_v9 = vld [vmem:[#allocation3 + $0x1090] sm:$0xff]  ;;  %v1716_v45 = vld [vmem:[#allocation3 + $0x13f8] sm:$0xff] }
 0x1d2   : > { %2084 = vmatpush.msra.mxu2 %v1743_v46  ;;  %2106 = vmatpush.msra.mxu3 %v1811_v47  ;;  %v1671_v7 = vld [vmem:[#allocation3 + $0x1290] sm:$0xff]  ;;  %v1566_v23 = vadd.f32 %v1542_v24, %v1521_v20  ;;  %v1772_v54 = vld [vmem:[#allocation3 + $0x15b8] sm:$0xff] }
 0x1d3   : > { %2037 = vmatpush.msra.mxu0 %v1619_v51  ;;  %2060 = vmatpush.msra.mxu1 %v1683_v49  ;;  %v1727_v8 = vld [vmem:[#allocation3 + $0x1450] sm:$0xff]  ;;  %v1355_v25 = vpop.f32.mrf.mxu0  ;;  %v1378_v29 = vpop.f32.mrf.mxu1  ;;  %v1840_v47 = vld [vmem:[#allocation3 + $0x17d8] sm:$0xff] }
 0x1d4   : > { %2085 = vmatpush.msra.mxu2 %v1739_v50  ;;  %2107 = vmatpush.msra.mxu3 %v1807_v55  ;;  %v1795_v12 = vld [vmem:[#allocation3 + $0x1670] sm:$0xff]  ;;  %v1401_v30 = vpop.f32.mrf.mxu2  ;;  %1578 = vst [vmem:[#allocation2 + $0x58] sm:$0xfe] %v1566_v23  ;;  %v1379_v34 = vadd.f32 %v1378_v29, %v1355_v25  ;;  %v1648_v51 = vld [vmem:[#allocation3 + $0x11d8] sm:$0xff] }
 0x1d5   : > { %2038 = vmatpush.msra.mxu0 %v1615_v56  ;;  %2061 = vmatpush.msra.mxu1 %v1679_v59  ;;  %v1603_v13 = vld [vmem:[#allocation3 + $0x1070] sm:$0xff]  ;;  %v1712_v50 = vld [vmem:[#allocation3 + $0x13d8] sm:$0xff] }
 0x1d6   : > { %2086 = vmatpush.msra.mxu2 %v1735_v60  ;;  %2108 = vmatpush.msra.mxu3 %v1803_v61  ;;  %v1667_v14 = vld [vmem:[#allocation3 + $0x1270] sm:$0xff]  ;;  %v1402_v39 = vadd.f32 %v1401_v30, %v1379_v34  ;;  %v1708_v59 = vld [vmem:[#allocation3 + $0x13b8] sm:$0xff] }
 0x1d7   : > { %2039 = vmatpush.msra.mxu0 %v1611_v4  ;;  %2062 = vmatpush.msra.mxu1 %v1675_v1  ;;  %v1723_v15 = vld [vmem:[#allocation3 + $0x1430] sm:$0xff]  ;;  %v1424_v40 = vpop.f32.mrf.mxu3  ;;  %v1764_v60 = vld [vmem:[#allocation3 + $0x1578] sm:$0xff] }
 0x1d8   : > { %2087 = vmatpush.msra.mxu2 %v1731_v2  ;;  %2109 = vmatpush.msra.mxu3 %v1799_v6  ;;  %v1791_v17 = vld [vmem:[#allocation3 + $0x1650] sm:$0xff]  ;;  %v1425_v43 = vadd.f32 %v1424_v40, %v1402_v39  ;;  %v1640_v61 = vld [vmem:[#allocation3 + $0x1198] sm:$0xff] }
 0x1d9   : > { %2040 = vmatpush.msra.mxu0 %v1607_v9  ;;  %2063 = vmatpush.msra.mxu1 %v1671_v7  ;;  %v1599_v19 = vld [vmem:[#allocation3 + $0x1050] sm:$0xff]  ;;  %v1704_v4 = vld [vmem:[#allocation3 + $0x1398] sm:$0xff] }
 0x1da   : > { %2088 = vmatpush.msra.mxu2 %v1727_v8  ;;  %2110 = vmatpush.msra.mxu3 %v1795_v12  ;;  %v1663_v21 = vld [vmem:[#allocation3 + $0x1250] sm:$0xff]  ;;  %v1548_v46 = vrot.slane %v1425_v43, 7  ;;  %v1760_v1 = vld [vmem:[#allocation3 + $0x1558] sm:$0xff] }
 0x1db   : > { %2041 = vmatpush.msra.mxu0 %v1603_v13  ;;  %v1719_v22 = vld [vmem:[#allocation3 + $0x1410] sm:$0xff]  ;;  %2064 = vmatpush.msra.mxu1 %v1667_v14  ;;  %v1828_v2 = vld [vmem:[#allocation3 + $0x1778] sm:$0xff] }
 0x1dc   : > { %2089 = vmatpush.msra.mxu2 %v1723_v15  ;;  %v1787_v28 = vld [vmem:[#allocation3 + $0x1630] sm:$0xff]  ;;  %2111 = vmatpush.msra.mxu3 %v1791_v17  ;;  %v2951_v55 = vsel %vm1539_vm1, %v1542_v24, %v1548_v46  ;;  %v1636_v3 = vld [vmem:[#allocation3 + $0x1178] sm:$0xff] }
 0x1dd   : > { %2042 = vmatpush.msra.mxu0 %v1599_v19  ;;  %v1595_v33 = vld [vmem:[#allocation3 + $0x1030] sm:$0xff]  ;;  %2065 = vmatpush.msra.mxu1 %v1663_v21  ;;  %v1700_v5 = vld [vmem:[#allocation3 + $0x1378] sm:$0xff] }
 0x1de   : > { %2090 = vmatpush.msra.mxu2 %v1719_v22  ;;  %v1659_v35 = vld [vmem:[#allocation3 + $0x1230] sm:$0xff]  ;;  %2112 = vmatpush.msra.mxu3 %v1787_v28  ;;  %v1756_v6 = vld [vmem:[#allocation3 + $0x1538] sm:$0xff] }
 0x1df   : > { %v1783_v37 = vld [vmem:[#allocation3 + $0x1610] sm:$0xff]  ;;  %2091 = vmatmul.f32.vlgmr.msra.gmra.mxu2 %v2909_v0  ;;  %2043 = vmatpush.msra.mxu0 %v1595_v33  ;;  %v1824_v9 = vld [vmem:[#allocation3 + $0x1758] sm:$0xff] }
 0x1e0   : > { %2167 = vmatpush.msrb.mxu2 %v1780_v31  ;;  %v1591_v48 = vld [vmem:[#allocation3 + $0x1010] sm:$0xff]  ;;  %2066 = vmatpush.msra.mxu1 %v1659_v35  ;;  %v1632_v7 = vld [vmem:[#allocation3 + $0x1158] sm:$0xff] }
 0x1e1   : > { %2113 = vmatpush.msra.mxu3 %v1783_v37  ;;  %v1655_v42 = vld [vmem:[#allocation3 + $0x1210] sm:$0xff]  ;;  %2044 = vmatpush.msra.mxu0 %v1591_v48  ;;  %v1696_v8 = vld [vmem:[#allocation3 + $0x1358] sm:$0xff] }
 0x1e2   : > { %2114 = vmatmul.f32.vlgmr.msra.gmra.mxu3 %v2913_v10  ;;  %2168 = vmatpush.msrb.mxu2 %v1776_v44  ;;  %v1529_v49 = vld [vmem:[#allocation2 + $0x10] sm:$0x1]  ;;  %v1752_v11 = vld [vmem:[#allocation3 + $0x1518] sm:$0xff] }
 0x1e3   : > { %2190 = vmatpush.msrb.mxu3 %v1844_v41  ;;  %2067 = vmatpush.msra.mxu1 %v1655_v42  ;;  %v1574_v56 = vadd.f32 %v1548_v46, %v1529_v49  ;;  %v1820_v12 = vld [vmem:[#allocation3 + $0x1738] sm:$0xff] }
 0x1e4   : > { %2045 = vmatmul.f32.vlgmr.msra.gmra.mxu0 %v2917_v18  ;;  %2068 = vmatmul.f32.vlgmr.msra.gmra.mxu1 %v2921_v16  ;;  %v1628_v13 = vld [vmem:[#allocation3 + $0x1138] sm:$0xff] }
 0x1e5   : > { %2121 = vmatpush.msrb.mxu0 %v1652_v53  ;;  %2144 = vmatpush.msrb.mxu1 %v1716_v45  ;;  %1586 = vst [vmem:[#allocation2 + $0x10] sm:$0x1] %v1574_v56  ;;  %v1692_v14 = vld [vmem:[#allocation3 + $0x1338] sm:$0xff] }
 0x1e6   : > { %2169 = vmatpush.msrb.mxu2 %v1772_v54  ;;  %2191 = vmatpush.msrb.mxu3 %v1840_v47  ;;  %v1748_v15 = vld [vmem:[#allocation3 + $0x14f8] sm:$0xff] }
 0x1e7   : > { %2122 = vmatpush.msrb.mxu0 %v1648_v51  ;;  %2145 = vmatpush.msrb.mxu1 %v1712_v50  ;;  %v1816_v24 = vld [vmem:[#allocation3 + $0x1718] sm:$0xff] }
 0x1e8   : > { %2170 = vmatpush.msrb.mxu2 %v1768_v52  ;;  %2192 = vmatpush.msrb.mxu3 %v1836_v63  ;;  %v1624_v17 = vld [vmem:[#allocation3 + $0x1118] sm:$0xff] }
 0x1e9   : > { %2094 = vmatmul.f32.gmra.mxu2 %v2928_v26  ;;  %2123 = vmatpush.msrb.mxu0 %v1644_v58  ;;  %v1688_v19 = vld [vmem:[#allocation3 + $0x1318] sm:$0xff] }
 0x1ea   : > { %2146 = vmatpush.msrb.mxu1 %v1708_v59  ;;  %2171 = vmatpush.msrb.mxu2 %v1764_v60  ;;  %v1744_v20 = vld [vmem:[#allocation3 + $0x14d8] sm:$0xff] }
 0x1eb   : > { %2193 = vmatpush.msrb.mxu3 %v1832_v62  ;;  %2124 = vmatpush.msrb.mxu0 %v1640_v61  ;;  %v1812_v21 = vld [vmem:[#allocation3 + $0x16f8] sm:$0xff] }
 0x1ec   : > { %2117 = vmatmul.f32.gmra.mxu3 %v2932_v32  ;;  %2147 = vmatpush.msrb.mxu1 %v1704_v4  ;;  %v1620_v22 = vld [vmem:[#allocation3 + $0x10f8] sm:$0xff] }
 0x1ed   : > { %2172 = vmatpush.msrb.mxu2 %v1760_v1  ;;  %2194 = vmatpush.msrb.mxu3 %v1828_v2  ;;  %v1684_v23 = vld [vmem:[#allocation3 + $0x12f8] sm:$0xff] }
 0x1ee   : > { %2048 = vmatmul.f32.gmra.mxu0 %v2936_v36  ;;  %2071 = vmatmul.f32.gmra.mxu1 %v2940_v38  ;;  %v1740_v25 = vld [vmem:[#allocation3 + $0x14b8] sm:$0xff] }
 0x1ef   : > { %2125 = vmatpush.msrb.mxu0 %v1636_v3  ;;  %2148 = vmatpush.msrb.mxu1 %v1700_v5  ;;  %v1808_v29 = vld [vmem:[#allocation3 + $0x16d8] sm:$0xff] }
 0x1f0   : > { %2173 = vmatpush.msrb.mxu2 %v1756_v6  ;;  %2195 = vmatpush.msrb.mxu3 %v1824_v9  ;;  %v1444_v28 = vpop.f32.mrf.mxu0  ;;  %v1616_v30 = vld [vmem:[#allocation3 + $0x10d8] sm:$0xff]  ;;  %v1467_v31 = vpop.f32.mrf.mxu1 }
 0x1f1   : > { %2126 = vmatpush.msrb.mxu0 %v1632_v7  ;;  %2149 = vmatpush.msrb.mxu1 %v1696_v8  ;;  %v1490_v33 = vpop.f32.mrf.mxu2  ;;  %v1680_v34 = vld [vmem:[#allocation3 + $0x12d8] sm:$0xff]  ;;  %v1468_v37 = vadd.f32 %v1467_v31, %v1444_v28 }
 0x1f2   : > { %2174 = vmatpush.msrb.mxu2 %v1752_v11  ;;  %2196 = vmatpush.msrb.mxu3 %v1820_v12  ;;  %v1736_v35 = vld [vmem:[#allocation3 + $0x1498] sm:$0xff] }
 0x1f3   : > { %2127 = vmatpush.msrb.mxu0 %v1628_v13  ;;  %2150 = vmatpush.msrb.mxu1 %v1692_v14  ;;  %v1804_v44 = vld [vmem:[#allocation3 + $0x16b8] sm:$0xff]  ;;  %v1491_v48 = vadd.f32 %v1490_v33, %v1468_v37  ;;  %v2245_v33 = vld [vmem:[#allocation2 + $0x28] sm:$0x1] }
 0x1f4   : > { %2175 = vmatpush.msrb.mxu2 %v1748_v15  ;;  %2197 = vmatpush.msrb.mxu3 %v1816_v24  ;;  %v1612_v39 = vld [vmem:[#allocation3 + $0x10b8] sm:$0xff]  ;;  %v1513_v42 = vpop.f32.mrf.mxu3  ;;  %v1530_v15 = vld [vmem:[#allocation2 + $0x40] sm:$0x1] }
 0x1f5   : > { %2128 = vmatpush.msrb.mxu0 %v1624_v17  ;;  %2151 = vmatpush.msrb.mxu1 %v1688_v19  ;;  %v1676_v40 = vld [vmem:[#allocation3 + $0x12b8] sm:$0xff]  ;;  %v1514_v46 = vadd.f32 %v1513_v42, %v1491_v48 }
 0x1f6   : > { %2176 = vmatpush.msrb.mxu2 %v1744_v20  ;;  %2198 = vmatpush.msrb.mxu3 %v1812_v21  ;;  %v1732_v41 = vld [vmem:[#allocation3 + $0x1478] sm:$0xff] }
 0x1f7   : > { %2129 = vmatpush.msrb.mxu0 %v1620_v22  ;;  %2152 = vmatpush.msrb.mxu1 %v1684_v23  ;;  %v1800_v43 = vld [vmem:[#allocation3 + $0x1698] sm:$0xff]  ;;  %v1543_v52 = vrot.slane %v1514_v46, 7  ;;  %v2213_v22 = vld [vmem:[#allocation2 + $0x30] sm:$0xff]  ;;  %v2214_v46 = vld [vmem:[#allocation2] sm:$0xff] }
 0x1f8   : > { %2177 = vmatpush.msrb.mxu2 %v1740_v25  ;;  %2199 = vmatpush.msrb.mxu3 %v1808_v29  ;;  %v1608_v53 = vld [vmem:[#allocation3 + $0x1098] sm:$0xff] }
 0x1f9   : > { %2130 = vmatpush.msrb.mxu0 %v1616_v30  ;;  %2153 = vmatpush.msrb.mxu1 %v1680_v34  ;;  %v1672_v45 = vld [vmem:[#allocation3 + $0x1298] sm:$0xff] }
 0x1fa   : > { %2178 = vmatpush.msrb.mxu2 %v1736_v35  ;;  %2200 = vmatpush.msrb.mxu3 %v1804_v44  ;;  %v1728_v54 = vld [vmem:[#allocation3 + $0x1458] sm:$0xff]  ;;  %v1447_v61 = vpop.f32.mrf.mxu0  ;;  %v1470_v1 = vpop.f32.mrf.mxu1  ;;  %v2274_v44 = vrot.slane %v2245_v33, 1 }
 0x1fb   : > { %2131 = vmatpush.msrb.mxu0 %v1612_v39  ;;  %2154 = vmatpush.msrb.mxu1 %v1676_v40  ;;  %v1796_v47 = vld [vmem:[#allocation3 + $0x1678] sm:$0xff]  ;;  %v1493_v2 = vpop.f32.mrf.mxu2  ;;  %v1471_v6 = vadd.f32 %v1470_v1, %v1447_v61 }
 0x1fc   : > { %2179 = vmatpush.msrb.mxu2 %v1732_v41  ;;  %v1604_v51 = vld [vmem:[#allocation3 + $0x1078] sm:$0xff]  ;;  %2201 = vmatpush.msrb.mxu3 %v1800_v43 }
 0x1fd   : > { %2132 = vmatpush.msrb.mxu0 %v1608_v53  ;;  %v1668_v49 = vld [vmem:[#allocation3 + $0x1278] sm:$0xff]  ;;  %2155 = vmatpush.msrb.mxu1 %v1672_v45  ;;  %v1494_v8 = vadd.f32 %v1493_v2, %v1471_v6 }
 0x1fe   : > { %v1724_v50 = vld [vmem:[#allocation3 + $0x1438] sm:$0xff]  ;;  %2180 = vmatpush.msrb.mxu2 %v1728_v54  ;;  %2202 = vmatpush.msrb.mxu3 %v1796_v47  ;;  %v1516_v11 = vpop.f32.mrf.mxu3 }
 0x1ff   : > { %v1792_v56 = vld [vmem:[#allocation3 + $0x1658] sm:$0xff]  ;;  %2133 = vmatpush.msrb.mxu0 %v1604_v51  ;;  %2156 = vmatpush.msrb.mxu1 %v1668_v49  ;;  %v1517_v13 = vadd.f32 %v1516_v11, %v1494_v8 }
 0x200   : > { %v1600_v63 = vld [vmem:[#allocation3 + $0x1058] sm:$0xff]  ;;  %2181 = vmatpush.msrb.mxu2 %v1724_v50  ;;  %2203 = vmatpush.msrb.mxu3 %v1792_v56 }
 0x201   : > { %v1522_v58 = vld [vmem:[#allocation2 + $0x18] sm:$0xfe]  ;;  %2134 = vmatpush.msrb.mxu0 %v1600_v63  ;;  %v1550_v14 = vrot.slane %v1517_v13, 7 }
 0x202   : > { %v1664_v59 = vld [vmem:[#allocation3 + $0x1258] sm:$0xff]  ;;  %v1567_v62 = vadd.f32 %v1543_v52, %v1522_v58  ;;  %v1524_v58 = vld [vmem:[#allocation2 + $0x20] sm:$0xff] }
 0x203   : > { %v1720_v60 = vld [vmem:[#allocation3 + $0x1418] sm:$0xff]  ;;  %2157 = vmatpush.msrb.mxu1 %v1664_v59  ;;  %v1575_v24 = vadd.f32 %v1550_v14, %v1530_v15  ;;  %v1569_v59 = vadd.f32 %v2925_v27, %v1524_v58 }
 0x204   : > { %v1788_v4 = vld [vmem:[#allocation3 + $0x1638] sm:$0xff]  ;;  %1579 = vst [vmem:[#allocation2 + $0x18] sm:$0xfe] %v1567_v62  ;;  %2182 = vmatpush.msrb.mxu2 %v1720_v60  ;;  %v2246_v62 = vld [vmem:[#allocation2 + $0x48] sm:$0x1] }
 0x205   : > { %v1596_v3 = vld [vmem:[#allocation3 + $0x1038] sm:$0xff]  ;;  %2204 = vmatpush.msrb.mxu3 %v1788_v4  ;;  %2183 = vmatmul.f32.vlgmr.msrb.gmra.mxu2 %v2909_v0  ;;  %v2962_v0 = vsel %vm1539_vm1, %v1543_v52, %v1550_v14  ;;  %1587 = vst [vmem:[#allocation2 + $0x40] sm:$0x1] %v1575_v24  ;;  %v2276_v2 = vrot.slane %v2246_v62, 1 }
 0x206   : > { %v1660_v5 = vld [vmem:[#allocation3 + $0x1238] sm:$0xff]  ;;  %2135 = vmatpush.msrb.mxu0 %v1596_v3 }
 0x207   : > { %v1784_v9 = vld [vmem:[#allocation3 + $0x1618] sm:$0xff]  ;;  %2158 = vmatpush.msrb.mxu1 %v1660_v5 }
 0x208   : > { %v1592_v7 = vld [vmem:[#allocation3 + $0x1018] sm:$0xff]  ;;  %2205 = vmatpush.msrb.mxu3 %v1784_v9 }
 0x209   : > { %v1656_v12 = vld [vmem:[#allocation3 + $0x1218] sm:$0xff]  ;;  %2206 = vmatmul.f32.vlgmr.msrb.gmra.mxu3 %v2913_v10  ;;  %2136 = vmatpush.msrb.mxu0 %v1592_v7 }
 0x20a   : > { %2159 = vmatpush.msrb.mxu1 %v1656_v12  ;;  %2137 = vmatmul.f32.vlgmr.msrb.gmra.mxu0 %v2917_v18  ;;  %v2215_v14 = vld [vmem:[#allocation2 + $0x58] sm:$0xff] }
 0x20b   : > { %2160 = vmatmul.f32.vlgmr.msrb.gmra.mxu1 %v2921_v16 }
 0x20d   : > { %2186 = vmatmul.f32.gmra.mxu2 %v2928_v26 }
 0x211   : > { %2209 = vmatmul.f32.gmra.mxu3 %v2932_v32 }
 0x212   : > { %2140 = vmatmul.f32.gmra.mxu0 %v2936_v36  ;;  %v1523_v36 = vld [vmem:[#allocation2 + $0x50] sm:$0xff] }
 0x213   : > { %2163 = vmatmul.f32.gmra.mxu1 %v2940_v38  ;;  %v1568_v38 = vadd.f32 %v2899_v57, %v1523_v36 }
 0x216   : > { %v1862_v10 = vpop.f32.mrf.mxu0  ;;  %v1885_v17 = vpop.f32.mrf.mxu1 }
 0x217   : > { %v1908_v18 = vpop.f32.mrf.mxu2  ;;  %v1886_v19 = vadd.f32 %v1885_v17, %v1862_v10 }
 0x219   : > { %v1909_v20 = vadd.f32 %v1908_v18, %v1886_v19 }
 0x21a   : > { %v1931_v16 = vpop.f32.mrf.mxu3 }
 0x21b   : > { %v1932_v21 = vadd.f32 %v1931_v16, %v1909_v20  ;;  %v1525_v16 = vld [vmem:[#allocation2 + $0x8] sm:$0xff] }
 0x21d   : > { %v2221_v23 = vadd.f32 %v2213_v22, %v1932_v21  ;;  %v1570_v21 = vadd.f32 %v2951_v55, %v1525_v16 }
 0x21f   : > { %2229 = vst [vmem:[#allocation2 + $0x30] sm:$0xff] %v2221_v23  ;;  %v2247_v23 = vld [vmem:[#allocation2 + $0x10] sm:$0x1] }
 0x220   : > { %v1865_v25 = vpop.f32.mrf.mxu0  ;;  %v1888_v28 = vpop.f32.mrf.mxu1 }
 0x221   : > { %v1911_v26 = vpop.f32.mrf.mxu2  ;;  %v1889_v29 = vadd.f32 %v1888_v28, %v1865_v25 }
 0x223   : > { %v1912_v32 = vadd.f32 %v1911_v26, %v1889_v29  ;;  %v2278_v29 = vrot.slane %v2247_v23, 1 }
 0x224   : > { %v1934_v30 = vpop.f32.mrf.mxu3 }
 0x225   : > { %v1935_v31 = vadd.f32 %v1934_v30, %v1912_v32 }
 0x226   : > { %v2237_v34 = vld [vmem:[#allocation2 + $0x30] sm:$0xfe] }
 0x227   : > { %v2262_v35 = vrot.slane %v2237_v34, 1  ;;  %v2225_v37 = vadd.f32 %v1935_v31, %v1568_v38 }
 0x229   : > { %2233 = vst [vmem:[#allocation2 + $0x50] sm:$0xff] %v2225_v37  ;;  %v2263_v39 = vrot.slane %v2225_v37, 1 }
 0x22b   : > { %v2264_v40 = vsel %vm2261_vm2, %v2262_v35, %v2263_v39  ;;  %v2275_v41 = vsel %vm2261_vm2, %v2263_v39, %v2274_v44  ;;  %v2216_v44 = vld [vmem:[#allocation2 + $0x18] sm:$0xff] }
 0x22c   : > { %2290 = vst [vmem:[%s2973_s15] sm:$0xff] %v2264_v40 }
 0x22d   : > { %2294 = vst [vmem:[%s2973_s15 + $0x20] sm:$0xff] %v2275_v41 }
 0x23d   : > { %v1954_v57 = vpop.f32.mrf.mxu0  ;;  %v2000_v42 = vpop.f32.mrf.mxu2 }
 0x23e   : > { %v1977_v48 = vpop.f32.mrf.mxu1 }
 0x23f   : > { %v1978_v43 = vadd.f32 %v1977_v48, %v1954_v57 }
 0x241   : > { %v2001_v53 = vadd.f32 %v2000_v42, %v1978_v43  ;;  %v2023_v45 = vpop.f32.mrf.mxu3  ;;  %v1526_v43 = vld [vmem:[#allocation2 + $0x38] sm:$0xff] }
 0x243   : > { %v2024_v54 = vadd.f32 %v2023_v45, %v2001_v53  ;;  %v1571_v45 = vadd.f32 %v2962_v0, %v1526_v43 }
 0x245   : > { %v2222_v47 = vadd.f32 %v2214_v46, %v2024_v54  ;;  %v2248_v46 = vld [vmem:[#allocation2 + $0x40] sm:$0x1] }
 0x247   : > { %2230 = vst [vmem:[#allocation2] sm:$0xff] %v2222_v47  ;;  %v1957_v51 = vpop.f32.mrf.mxu0  ;;  %v1980_v49 = vpop.f32.mrf.mxu1 }
 0x248   : > { %v2003_v50 = vpop.f32.mrf.mxu2  ;;  %v1981_v52 = vadd.f32 %v1980_v49, %v1957_v51  ;;  %v2280_v49 = vrot.slane %v2248_v46, 1 }
 0x24a   : > { %v2004_v56 = vadd.f32 %v2003_v50, %v1981_v52 }
 0x24b   : > { %v2026_v63 = vpop.f32.mrf.mxu3 }
 0x24c   : > { %v2027_v60 = vadd.f32 %v2026_v63, %v2004_v56 }
 0x24e   : > { %v2238_v61 = vld [vmem:[#allocation2] sm:$0xfe]  ;;  %v2226_v1 = vadd.f32 %v2027_v60, %v1569_v59 }
 0x24f   : > { %v2265_v4 = vrot.slane %v2238_v61, 1 }
 0x250   : > { %2234 = vst [vmem:[#allocation2 + $0x20] sm:$0xff] %v2226_v1  ;;  %v2266_v3 = vrot.slane %v2226_v1, 1 }
 0x252   : > { %v2267_v5 = vsel %vm2261_vm2, %v2265_v4, %v2266_v3  ;;  %v2277_v6 = vsel %vm2261_vm2, %v2266_v3, %v2276_v2 }
 0x253   : > { %2291 = vst [vmem:[%s2973_s15 + $0x8] sm:$0xff] %v2267_v5 }
 0x254   : > { %2295 = vst [vmem:[%s2973_s15 + $0x28] sm:$0xff] %v2277_v6 }
 0x261   : > { %v2046_v9 = vpop.f32.mrf.mxu0  ;;  %v2069_v7 = vpop.f32.mrf.mxu1 }
 0x262   : > { %v2092_v8 = vpop.f32.mrf.mxu2  ;;  %v2070_v11 = vadd.f32 %v2069_v7, %v2046_v9 }
 0x264   : > { %v2093_v12 = vadd.f32 %v2092_v8, %v2070_v11 }
 0x265   : > { %v2115_v27 = vpop.f32.mrf.mxu3 }
 0x266   : > { %v2116_v13 = vadd.f32 %v2115_v27, %v2093_v12 }
 0x268   : > { %v2223_v15 = vadd.f32 %v2215_v14, %v2116_v13 }
 0x26a   : > { %2231 = vst [vmem:[#allocation2 + $0x58] sm:$0xff] %v2223_v15 }
 0x26b   : > { %v2049_v24 = vpop.f32.mrf.mxu0  ;;  %v2072_v10 = vpop.f32.mrf.mxu1 }
 0x26c   : > { %v2095_v17 = vpop.f32.mrf.mxu2  ;;  %v2073_v18 = vadd.f32 %v2072_v10, %v2049_v24 }
 0x26e   : > { %v2096_v19 = vadd.f32 %v2095_v17, %v2073_v18 }
 0x26f   : > { %v2118_v20 = vpop.f32.mrf.mxu3 }
 0x270   : > { %v2119_v22 = vadd.f32 %v2118_v20, %v2096_v19 }
 0x271   : > { %v2239_v25 = vld [vmem:[#allocation2 + $0x58] sm:$0xfe] }
 0x272   : > { %v2268_v28 = vrot.slane %v2239_v25, 1  ;;  %v2227_v26 = vadd.f32 %v2119_v22, %v1570_v21 }
 0x274   : > { %2235 = vst [vmem:[#allocation2 + $0x8] sm:$0xff] %v2227_v26  ;;  %v2269_v32 = vrot.slane %v2227_v26, 1 }
 0x276   : > { %v2270_v30 = vsel %vm2261_vm2, %v2268_v28, %v2269_v32  ;;  %v2279_v36 = vsel %vm2261_vm2, %v2269_v32, %v2278_v29 }
 0x277   : > { %2292 = vst [vmem:[%s2973_s15 + $0x10] sm:$0xff] %v2270_v30 }
 0x278   : > { %2296 = vst [vmem:[%s2973_s15 + $0x30] sm:$0xff] %v2279_v36 }
 0x287   : > { %v2138_v38 = vpop.f32.mrf.mxu0 }
 0x288   : > { %v2161_v31 = vpop.f32.mrf.mxu1  ;;  %v2184_v34 = vpop.f32.mrf.mxu2 }
 0x289   : > { %v2162_v33 = vadd.f32 %v2161_v31, %v2138_v38 }
 0x28b   : > { %v2185_v55 = vadd.f32 %v2184_v34, %v2162_v33 }
 0x28c   : > { %v2207_v35 = vpop.f32.mrf.mxu3 }
 0x28d   : > { %v2208_v37 = vadd.f32 %v2207_v35, %v2185_v55 }
 0x28f   : > { %v2224_v39 = vadd.f32 %v2216_v44, %v2208_v37  ;;  %v2141_v40 = vpop.f32.mrf.mxu0 }
 0x290   : > { %v2164_v41 = vpop.f32.mrf.mxu1  ;;  %v2187_v48 = vpop.f32.mrf.mxu2 }
 0x291   : > { %2232 = vst [vmem:[#allocation2 + $0x18] sm:$0xff] %v2224_v39  ;;  %v2165_v57 = vadd.f32 %v2164_v41, %v2141_v40 }
 0x293   : > { %v2188_v42 = vadd.f32 %v2187_v48, %v2165_v57 }
 0x294   : > { %v2210_v53 = vpop.f32.mrf.mxu3 }
 0x295   : > { %v2211_v54 = vadd.f32 %v2210_v53, %v2188_v42 }
 0x297   : > { %v2228_v47 = vadd.f32 %v2211_v54, %v1571_v45 }
 0x298   : > { %v2240_v51 = vld [vmem:[#allocation2 + $0x18] sm:$0xfe] }
 0x299   : > { %v2271_v50 = vrot.slane %v2240_v51, 1  ;;  %2236 = vst [vmem:[#allocation2 + $0x38] sm:$0xff] %v2228_v47  ;;  %v2272_v52 = vrot.slane %v2228_v47, 1 }
 0x29b   : > { %v2273_v56 = vsel %vm2261_vm2, %v2271_v50, %v2272_v52  ;;  %v2281_v63 = vsel %vm2261_vm2, %v2272_v52, %v2280_v49 }
 0x29c   : > { %2293 = vst [vmem:[%s2973_s15 + $0x18] sm:$0xff] %v2273_v56 }
 0x29d   : > { %2297 = vst [vmem:[%s2973_s15 + $0x38] sm:$0xff] %v2281_v63 }
 0x29e   : > { %2582 = shalt.err (!%p2579_p10)
}
 0x29f   : > { %s2631_s5 = smov 512   ;;  %s2632_s30 = smov 32  }
 0x2a0   : > { %2423 = dma.vmem_to_hbm [thread:$0]  (%p2717_p3), %s2312_s17, 1024, %s2314_s18, %s2299_s13, %s2631_s5, %s2631_s5, %s2632_s30  }
 0x2a1 PF: > { %s2328_s6 = sand.u32 1, %s2613_s9   ;;  %p3034_p12 = scmp.ge.s32.totalorder %s2625_s12, 2 }
 0x2a2   : > { %s2329_s7 = scalar_lea.sflag [#allocation5], %s2328_s6 }
 0x2a3   : > { %p2434_p13 = pnand %p3034_p12, %p2683_p6 }
 0x2a5   : > { %p2435_p0 = pneg %p2434_p13 }
 0x2a7   : > { %2608 = dma.done.wait (%p2435_p0), %s2329_s7, 1024  }
 0x2a8   : > { %2610 = vsyncadd (%p2435_p0), %s2329_s7, 4294966272  ;;  %p16_p5 = scmp.ge.s32.totalorder %s2701_s23, 4   ;;  %s3035_s9 = smov %s2617_s10 }
 0x2a9   : > { %s3036_s10 = smov %s2621_s11  ;;  %s3037_s11 = smov %s2713_s28 }
 0x2aa   : > { %s3038_s12 = smov %s2701_s23  ;;  %18 = sbr.rel (!%p16_p5) target bundleno = 6 (0x6), region = 80 }
 0x2af   :  { %2335 = vsyncpa [#allocation4], 1 }
 0x2b0   :  { %2337 = vsyncpa [#allocation4 + $0x1], 1 }
 0x2b1   :  { %2338 = vsyncpa [#allocation7], 1 }
 0x2b2   :  { %2340 = vsyncpa [#allocation7 + $0x1], 1 }
 0x2b3   :  { %2341 = vsyncpa [#allocation5], 1 }
 0x2b4   :  { %2343 = vsyncpa [#allocation5 + $0x1], 1 }

</bundles_post_ra>
